<compile_context>
chip_gen: v7x
topology: tpu7x:2x2x1
jax: 0.10.0
libtpu: 0.0.40
codegen_flags: <defaults>
</compile_context>

<pallas_src>
import functools

import jax
import jax.numpy as jnp
from jax import lax
from jax.experimental import pallas as pl
from jax.experimental.pallas import tpu as pltpu

_VMEM_LIMIT = 32 * 1024 * 1024   # explicit scoped-VMEM budget (safe on v5e/v6e/v7x)
_SUBLANE = 8                     # f32 sublane tile


def _round_up(x, m):
    return (x + m - 1) // m * m


# ============================================================================
# Single fused kernel: CNN -> multi-layer BiLSTM -> word attention
# ============================================================================
def _make_fused_kernel(*, B, W_in, K, pad, pool_s, H, num_layers):
    """B: padded stacked batch (multiple of 8). W_in: conv length axis (=embedded_size).
    Everything operates on position-major slabs with rows = pos*B + b."""
    l1 = W_in + 2 * pad - K + 1            # conv1 output length (stride 1)
    l2 = (l1 - K) // pool_s + 1            # maxpool output length
    T = l2 + 2 * pad - K + 1               # conv2 output length == LSTM seq length
    B2 = 2 * B
    H2, H3, H4, H8 = 2 * H, 3 * H, 4 * H, 8 * H

    def kernel(*refs):
        x_ref, w1_ref, b1_ref, w2_ref, b2_ref = refs[:5]
        lstm_refs = refs[5:5 + 3 * num_layers]
        wt_ref, bw_ref, v_ref = refs[5 + 3 * num_layers: 8 + 3 * num_layers]
        out_ref = refs[8 + 3 * num_layers]
        xgc_ref, hout_ref = refs[9 + 3 * num_layers:]
        f32 = jnp.float32

        # ---------------- CNN: Conv1d+ReLU -> MaxPool1d -> Conv1d+ReLU ------------
        x = x_ref[...]                                             # ((W_in+2p)*B, C_in)
        # conv1: im2col = K aligned B-row-block slices lane-concatenated; one matmul
        patches1 = jnp.concatenate([x[k * B:(k + l1) * B, :] for k in range(K)], axis=1)
        h1 = jnp.dot(patches1, w1_ref[...], preferred_element_type=f32) + b1_ref[...]
        h1 = jnp.maximum(h1, 0.0)                                  # (l1*B, C_mid)
        # maxpool(kernel=K, stride=pool_s): window max via K-1 VALU maxes, then pick rows
        nwin = l1 - K + 1
        wm = h1[0:nwin * B, :]
        for w in range(1, K):
            wm = jnp.maximum(wm, h1[w * B:(w + nwin) * B, :])
        pooled = jnp.concatenate(
            [wm[m * pool_s * B:(m * pool_s + 1) * B, :] for m in range(l2)], axis=0)
        if pad > 0:
            zr = jnp.zeros((pad * B, pooled.shape[1]), f32)
            xp2 = jnp.concatenate([zr, pooled, zr], axis=0)
        else:
            xp2 = pooled
        # conv2: same im2col trick; its output is directly the time-major (T*B, E) slab
        patches2 = jnp.concatenate([xp2[k * B:(k + T) * B, :] for k in range(K)], axis=1)
        cur = jnp.dot(patches2, w2_ref[...], preferred_element_type=f32) + b2_ref[...]
        cur = jnp.maximum(cur, 0.0)                                # (T*B, C_out)
        # TODO(synk): nn.Dropout after conv2 is an eval-mode no-op and is omitted.

        # ---------------- hoisted lane constants for the LSTM gate math -----------
        lane8 = lax.broadcasted_iota(jnp.int32, (1, H8), 1)
        g8 = ((lane8 % H4) >= H2) & ((lane8 % H4) < H3)
        scale8 = jnp.where(g8, 1.0, 0.5).astype(f32)               # 0.5 on sigmoid lanes
        scale4 = scale8[:, 0:H4]
        lane4 = lax.broadcasted_iota(jnp.int32, (B2, H4), 1)
        g4 = (lane4 >= H2) & (lane4 < H3)
        post_scale = jnp.where(g4, 1.0, 0.5).astype(f32)
        post_shift = jnp.where(g4, 0.0, 0.5).astype(f32)
        row = lax.broadcasted_iota(jnp.int32, (B2, H2), 0)
        col = lax.broadcasted_iota(jnp.int32, (B2, H2), 1)
        dir_mask = jnp.where((row < B) == (col < H), 1.0, 0.0).astype(f32)

        # ---------------- multi-layer bidirectional LSTM ---------------------------
        for l in range(num_layers):
            wih = lstm_refs[3 * l][...]                            # (F_in, 8H) bf16/f32
            # recurrence weights stay f32 (no per-step h cast); sigmoid pre-scale folded
            whh = lstm_refs[3 * l + 1][...].astype(f32) * scale4   # (2H, 4H)
            bias = lstm_refs[3 * l + 2][...]                       # (1, 8H) f32
            # (1) bulk input projection, all timesteps & both directions: one matmul
            xg = jnp.dot(cur.astype(wih.dtype), wih,
                         preferred_element_type=f32) + bias        # (T*B, 8H)
            xg = xg * scale8                                       # fold 0.5 sigmoid pre-scale
            # (2) stage per-step gate inputs (fwd time t, bwd time T-1-t); off the
            #     serialized recurrence path, aligned (B is a multiple of 8)
            for t in range(T):
                xgc_ref[t] = jnp.concatenate(
                    [xg[t * B:(t + 1) * B, 0:H4],
                     xg[(T - 1 - t) * B:(T - t) * B, H4:H8]], axis=0)
            # (3) recurrence: fwd & bwd batched into one (2B,2H)x(2H,4H) matmul per step
            h2 = jnp.zeros((B2, H2), f32)                          # [h_f | 0] / [0 | h_b]
            c = jnp.zeros((B2, H), f32)                            # [c_f ; c_b]
            for t in range(T):
                gates = jnp.dot(h2, whh, preferred_element_type=f32) + xgc_ref[t]
                y = jnp.tanh(gates)                                # single EUP pass
                act = y * post_scale + post_shift                  # sigmoid lanes: 0.5y+0.5
                i_g = act[:, 0:H]
                f_g = act[:, H:H2]
                g_g = act[:, H2:H3]
                o_g = act[:, H3:H4]
                c = f_g * c + i_g * g_g
                h_new = o_g * jnp.tanh(c)                          # (2B, H)
                # merged (T*B, 2H) output scratch: fwd -> lanes [0:H] at time t,
                # bwd -> lanes [H:2H] at time T-1-t (tile-aligned sublane offsets)
                hout_ref[t * B:(t + 1) * B, 0:H] = h_new[0:B, :]
                hout_ref[(T - 1 - t) * B:(T - t) * B, H:H2] = h_new[B:B2, :]
                h2 = jnp.concatenate([h_new, h_new], axis=1) * dir_mask
            cur = hout_ref[...]                                    # next layer input slab
            # TODO(synk): inter-layer LSTM dropout is an eval-mode no-op and is omitted.

        # ---------------- word attention ------------------------------------------
        # one batched energy matmul over all (time, batch) rows + one lane reduce
        e = jnp.tanh(jnp.dot(cur, wt_ref[...], preferred_element_type=f32) + bw_ref[...])
        s = jnp.sum(e * v_ref[...], axis=1, keepdims=True)         # (T*B, 1) logits
        # per-batch softmax over time + weighted sum, vectorized over the 8-row batch
        # tile; unrolled over T with aligned (B,*) slices only
        s_t = [s[t * B:(t + 1) * B, :] for t in range(T)]          # each (B, 1)
        m = s_t[0]
        for t in range(1, T):
            m = jnp.maximum(m, s_t[t])
        p_t = [jnp.exp(st - m) for st in s_t]
        denom = p_t[0]
        for t in range(1, T):
            denom = denom + p_t[t]
        acc = p_t[0] * cur[0:B, :]
        for t in range(1, T):
            acc = acc + p_t[t] * cur[t * B:(t + 1) * B, :]
        out_ref[...] = acc / denom                                 # (B, 2H)

    return kernel, T


# ============================================================================
# Wrapper: layout plumbing + the single pallas_call
# ============================================================================
def cnn_lstm_forward(ids, params, *, config, matmul_dtype=jnp.bfloat16):
    """ids: (Bt, L) int token ids (Bt = stacked triplet batch).
    Returns (Bt, 2H) attention-pooled vectors."""
    mcfg = config['model']
    assert mcfg['bidirectional']
    assert mcfg['stride'] == 1, "TODO(synk): only stride=1 Conv1d is implemented (module config uses stride=1)"
    K, pad = mcfg['kernel_size'], mcfg['padding']
    E, H = mcfg['embedded_size'], mcfg['hidden_size']
    num_layers = mcfg['num_layers']
    Bt, L = ids.shape
    conv1_w = params['conv1_w']
    assert L == conv1_w.shape[1], (
        "Conv1d in_channels mismatch: the PyTorch module double-permutes, so it only "
        "runs with seq_len == embedded_size")

    # TODO(synk): the frozen-embedding gather stays in plain XLA (tiny, data-dependent).
    emb = jnp.take(params['embedding'], ids, axis=0).astype(jnp.float32)   # (Bt, L, E)

    # Pad the stacked triplet batch to a full f32 sublane tile so every per-step
    # block slice in the kernel is (8,128)-tile aligned; padded rows are sliced off.
    B = _round_up(Bt, _SUBLANE)
    emb = jnp.pad(emb, ((0, B - Bt), (0, 0), (0, 0)))

    # CNN_LSTM permute(0,2,1) + CNN permute(0,2,1) cancel, so Conv1d sees (N, C=L, W=E).
    # Present it as ONE position-major slab (row = pos*B + b, lanes = channels), already
    # zero-padded for conv1 -> the whole pipeline runs inside a single fused kernel.
    x_slab = jnp.transpose(emb, (2, 0, 1)).reshape(E * B, L)       # (W*B, C_in)
    x_slab = jnp.pad(x_slab, ((pad * B, pad * B), (0, 0)))

    # torch conv weights (O, I, K) -> matmul layout (K*I, O)
    def conv_w(w):
        return jnp.transpose(w, (2, 1, 0)).reshape(K * w.shape[1], w.shape[0]).astype(jnp.float32)

    w1m = conv_w(conv1_w)
    w2m = conv_w(params['conv2_w'])
    b1 = params['conv1_b'].reshape(1, -1).astype(jnp.float32)
    b2 = params['conv2_b'].reshape(1, -1).astype(jnp.float32)

    # LSTM weights: bulk x-projection in matmul_dtype (bf16 default), recurrence in f32
    lstm_flat = []
    for fwd_p, bwd_p in params['lstm']:
        w_ih_f, w_hh_f, b_ih_f, b_hh_f = fwd_p
        w_ih_b, w_hh_b, b_ih_b, b_hh_b = bwd_p
        wih = jnp.concatenate([w_ih_f.T, w_ih_b.T], axis=1).astype(matmul_dtype)   # (F_in, 8H)
        whh = jnp.concatenate([w_hh_f.T, w_hh_b.T], axis=0).astype(jnp.float32)    # (2H, 4H)
        bias = jnp.concatenate([b_ih_f + b_hh_f,
                                b_ih_b + b_hh_b])[None, :].astype(jnp.float32)     # (1, 8H)
        lstm_flat += [wih, whh, bias]

    wt = params['att_W'].T.astype(jnp.float32)                     # (2H, A)
    bw = params['att_bW'].reshape(1, -1).astype(jnp.float32)       # (1, A)
    v = params['att_V'].astype(jnp.float32)                        # (1, A)

    kernel, T = _make_fused_kernel(B=B, W_in=E, K=K, pad=pad,
                                   pool_s=2 * mcfg['stride'], H=H, num_layers=num_layers)

    out = pl.pallas_call(
        kernel,
        out_shape=jax.ShapeDtypeStruct((B, 2 * H), jnp.float32),
        scratch_shapes=[pltpu.VMEM((T, 2 * B, 4 * H), jnp.float32),   # staged gate inputs
                        pltpu.VMEM((T * B, 2 * H), jnp.float32)],     # merged LSTM output slab
        compiler_params=pltpu.CompilerParams(vmem_limit_bytes=_VMEM_LIMIT),
    )(x_slab, w1m, b1, w2m, b2, *lstm_flat, wt, bw, v)
    return out[:Bt]


def cnn_lstm_triplet_forward(anchor, positive, negative, params, *, config,
                             matmul_dtype=jnp.bfloat16):
    # The three siamese branches share all weights and have no cross-sample interaction,
    # so stack them on the batch axis: one fused kernel launch for the whole triplet.
    B0 = anchor.shape[0]
    ids = jnp.concatenate([anchor, positive, negative], axis=0)
    out = cnn_lstm_forward(ids, params, config=config, matmul_dtype=matmul_dtype)
    return out[:B0], out[B0:2 * B0], out[2 * B0:]


# ============================================================================
# Pure-JAX reference (mirrors the PyTorch module) for correctness checking.
# ============================================================================
_HI = lax.Precision.HIGHEST


def _ref_lstm_direction(x_seq, w_ih, w_hh, b_ih, b_hh):
    H = w_hh.shape[1]
    B = x_seq.shape[1]

    def step(carry, x_t):
        h, c = carry
        gates = (jnp.dot(x_t, w_ih.T, precision=_HI)
                 + jnp.dot(h, w_hh.T, precision=_HI) + b_ih + b_hh)
        i_g = jax.nn.sigmoid(gates[:, 0 * H:1 * H])
        f_g = jax.nn.sigmoid(gates[:, 1 * H:2 * H])
        g_g = jnp.tanh(gates[:, 2 * H:3 * H])
        o_g = jax.nn.sigmoid(gates[:, 3 * H:4 * H])
        c = f_g * c + i_g * g_g
        h = o_g * jnp.tanh(c)
        return (h, c), h

    init = (jnp.zeros((B, H), jnp.float32), jnp.zeros((B, H), jnp.float32))
    _, hs = lax.scan(step, init, x_seq)
    return hs


def ref_cnn_lstm_forward(ids, params, *, config):
    mcfg = config['model']
    s, p, k = mcfg['stride'], mcfg['padding'], mcfg['kernel_size']
    emb = jnp.take(params['embedding'], ids, axis=0)
    x = jnp.transpose(emb, (0, 2, 1))
    x = jnp.transpose(x, (0, 2, 1))                        # conv input (N, C, W)
    dn = ('NCH', 'OIH', 'NCH')
    y = lax.conv_general_dilated(x, params['conv1_w'], (s,), [(p, p)],
                                 dimension_numbers=dn, precision=_HI)
    y = jnp.maximum(y + params['conv1_b'][None, :, None], 0.0)
    y = lax.reduce_window(y, -jnp.inf, lax.max, (1, 1, k), (1, 1, 2 * s), 'VALID')
    y = lax.conv_general_dilated(y, params['conv2_w'], (s,), [(p, p)],
                                 dimension_numbers=dn, precision=_HI)
    y = jnp.maximum(y + params['conv2_b'][None, :, None], 0.0)
    layer_in = jnp.transpose(y, (2, 0, 1)).astype(jnp.float32)   # (T, B, E)
    for fwd_p, bwd_p in params['lstm']:
        out_f = _ref_lstm_direction(layer_in, *fwd_p)
        out_b = _ref_lstm_direction(layer_in[::-1], *bwd_p)[::-1]
        layer_in = jnp.concatenate([out_f, out_b], axis=-1)
    a_in = jnp.transpose(layer_in, (1, 0, 2))                     # (B, T, 2H)
    energy = jnp.tanh(jnp.einsum('btd,ad->bta', a_in, params['att_W'], precision=_HI)
                      + params['att_bW'])
    att = jnp.einsum('bta,a->bt', energy, params['att_V'][0], precision=_HI)
    att = jax.nn.softmax(att, axis=1)
    return jnp.einsum('bt,btd->bd', att, a_in, precision=_HI)


# ============================================================================
# Deterministic parameter init (PyTorch default inits, shapes from the module).
# ============================================================================
def _uniform(key, shape, bound):
    return jax.random.uniform(key, shape, jnp.float32, -bound, bound)


def init_params(key, config, vocab_size):
    mcfg = config['model']
    E, H, K, A = mcfg['embedded_size'], mcfg['hidden_size'], mcfg['kernel_size'], mcfg['attention_size']
    num_layers = mcfg['num_layers']
    ndir = 2 if mcfg['bidirectional'] else 1
    keys = jax.random.split(key, 12)
    params = {}
    # TODO(synk): nn.Embedding.from_pretrained table is generated in-script (no file I/O).
    params['embedding'] = jax.random.normal(keys[0], (vocab_size, E), jnp.float32) * 0.5
    cbound = 1.0 / (E * K) ** 0.5
    params['conv1_w'] = _uniform(keys[1], (E, E, K), cbound)
    params['conv1_b'] = _uniform(keys[2], (E,), cbound)
    params['conv2_w'] = _uniform(keys[3], (E, E, K), cbound)
    params['conv2_b'] = _uniform(keys[4], (E,), cbound)
    lbound = 1.0 / H ** 0.5
    lstm = []
    kk = keys[5]
    for layer in range(num_layers):
        in_size = E if layer == 0 else ndir * H
        dirs = []
        for _ in range(ndir):
            kk, k1, k2, k3, k4 = jax.random.split(kk, 5)
            dirs.append((_uniform(k1, (4 * H, in_size), lbound),
                         _uniform(k2, (4 * H, H), lbound),
                         _uniform(k3, (4 * H,), lbound),
                         _uniform(k4, (4 * H,), lbound)))
        lstm.append(tuple(dirs))
    params['lstm'] = lstm
    abound = 1.0 / (ndir * H) ** 0.5
    params['att_W'] = _uniform(keys[6], (A, ndir * H), abound)
    params['att_bW'] = _uniform(keys[7], (A,), abound)
    params['att_V'] = _uniform(keys[8], (1, A), 1.0 / A ** 0.5)
    return params


if __name__ == "__main__":
    config = {'model': {
        'embedded_size': 16, 'batch_size': 2, 'hidden_size': 32, 'num_layers': 2,
        'bidirectional': True, 'dropout': 0.25, 'kernel_size': 3, 'stride': 1,
        'padding': 1, 'p_drop': 0.1, 'attention_size': 24, 'embeddings': None}}
    B = config['model']['batch_size']
    E = config['model']['embedded_size']
    H2 = 2 * config['model']['hidden_size']
    # NOTE: the PyTorch module permutes twice before Conv1d(in_channels=embedded_size),
    # so it only runs when seq_len == embedded_size; we honour that constraint.
    L = E
    vocab = 50

    key = jax.random.PRNGKey(0)
    key, kp, ka, kpos, kn = jax.random.split(key, 5)
    params = init_params(kp, config, vocab)
    anchor = jax.random.randint(ka, (B, L), 0, vocab)
    positive = jax.random.randint(kpos, (B, L), 0, vocab)
    negative = jax.random.randint(kn, (B, L), 0, vocab)

    # strict-f32 configuration (bit-faithful module semantics)
    fwd_f32 = jax.jit(functools.partial(cnn_lstm_triplet_forward, config=config,
                                        matmul_dtype=jnp.float32))
    out_a, out_p, out_n = jax.block_until_ready(fwd_f32(anchor, positive, negative, params))

    ref_a = ref_cnn_lstm_forward(anchor, params, config=config)
    ref_p = ref_cnn_lstm_forward(positive, params, config=config)
    ref_n = ref_cnn_lstm_forward(negative, params, config=config)
    ref_a, ref_p, ref_n = jax.block_until_ready((ref_a, ref_p, ref_n))

    assert out_a.shape == (B, H2), out_a.shape
    for got, ref in ((out_a, ref_a), (out_p, ref_p), (out_n, ref_n)):
        err = float(jnp.max(jnp.abs(got - ref)))
        assert jnp.allclose(got, ref, atol=5e-3, rtol=5e-3), err

    # bf16-fed MXU for the bulk x-projection (performance default); recurrence stays f32
    fwd_bf16 = jax.jit(functools.partial(cnn_lstm_triplet_forward, config=config,
                                         matmul_dtype=jnp.bfloat16))
    bf_a, bf_p, bf_n = jax.block_until_ready(fwd_bf16(anchor, positive, negative, params))
    for got, ref in ((bf_a, ref_a), (bf_p, ref_p), (bf_n, ref_n)):
        err = float(jnp.max(jnp.abs(got - ref)))
        assert jnp.allclose(got, ref, atol=5e-2, rtol=5e-2), err

    print("KERNEL_OK")
</pallas_src>

<mosaic_0001>
module attributes {stable_mosaic.version = 11 : i64} {
  func.func @kernel(%arg0: memref<144x16xf32, #tpu.memory_space<vmem>>, %arg1: memref<48x16xf32, #tpu.memory_space<vmem>>, %arg2: memref<1x16xf32, #tpu.memory_space<vmem>>, %arg3: memref<48x16xf32, #tpu.memory_space<vmem>>, %arg4: memref<1x16xf32, #tpu.memory_space<vmem>>, %arg5: memref<16x256xf32, #tpu.memory_space<vmem>>, %arg6: memref<64x128xf32, #tpu.memory_space<vmem>>, %arg7: memref<1x256xf32, #tpu.memory_space<vmem>>, %arg8: memref<64x256xf32, #tpu.memory_space<vmem>>, %arg9: memref<64x128xf32, #tpu.memory_space<vmem>>, %arg10: memref<1x256xf32, #tpu.memory_space<vmem>>, %arg11: memref<64x24xf32, #tpu.memory_space<vmem>>, %arg12: memref<1x24xf32, #tpu.memory_space<vmem>>, %arg13: memref<1x24xf32, #tpu.memory_space<vmem>>, %arg14: memref<8x64xf32, #tpu.memory_space<vmem>>, %arg15: memref<7x16x128xf32, #tpu.memory_space<vmem>>, %arg16: memref<56x64xf32, #tpu.memory_space<vmem>>) attributes {dimension_semantics = [], scalar_prefetch = 0 : i64, scratch_operands = 2 : i64, tpu.core_type = #tpu.core_type<tc>} {
    %c0 = arith.constant 0 : index
    %c0_0 = arith.constant 0 : index
    %0 = vector.load %arg0[%c0, %c0_0] : memref<144x16xf32, #tpu.memory_space<vmem>>, vector<144x16xf32>
    %1 = vector.extract_strided_slice %0 {offsets = [0, 0], sizes = [128, 16], strides = [1, 1]} : vector<144x16xf32> to vector<128x16xf32>
    %2 = vector.extract_strided_slice %0 {offsets = [8, 0], sizes = [128, 16], strides = [1, 1]} : vector<144x16xf32> to vector<128x16xf32>
    %3 = vector.extract_strided_slice %0 {offsets = [16, 0], sizes = [128, 16], strides = [1, 1]} : vector<144x16xf32> to vector<128x16xf32>
    %4 = tpu.concatenate %1, %2, %3 in 1 : vector<128x16xf32>, vector<128x16xf32>, vector<128x16xf32> -> vector<128x48xf32>
    %c0_1 = arith.constant 0 : index
    %c0_2 = arith.constant 0 : index
    %5 = vector.load %arg1[%c0_1, %c0_2] : memref<48x16xf32, #tpu.memory_space<vmem>>, vector<48x16xf32>
    %cst = arith.constant dense<0.000000e+00> : vector<128x16xf32>
    %6 = tpu.matmul %4, %5, %cst {dimension_numbers = #tpu.dot_dimension_numbers<[1], [0], [0], [1], [0, 0, 1, 1], [], []>} : vector<128x48xf32>, vector<48x16xf32>, vector<128x16xf32> -> vector<128x16xf32>
    %c0_3 = arith.constant 0 : index
    %c0_4 = arith.constant 0 : index
    %7 = vector.load %arg2[%c0_3, %c0_4] : memref<1x16xf32, #tpu.memory_space<vmem>>, vector<1x16xf32>
    %8 = vector.broadcast %7 : vector<1x16xf32> to vector<128x16xf32>
    %9 = arith.addf %6, %8 : vector<128x16xf32>
    %cst_5 = arith.constant 0.000000e+00 : f32
    %10 = vector.broadcast %cst_5 : f32 to vector<128x16xf32>
    %11 = arith.maximumf %9, %10 : vector<128x16xf32>
    %12 = vector.extract_strided_slice %11 {offsets = [0, 0], sizes = [112, 16], strides = [1, 1]} : vector<128x16xf32> to vector<112x16xf32>
    %13 = vector.extract_strided_slice %11 {offsets = [8, 0], sizes = [112, 16], strides = [1, 1]} : vector<128x16xf32> to vector<112x16xf32>
    %14 = arith.maximumf %12, %13 : vector<112x16xf32>
    %15 = vector.extract_strided_slice %11 {offsets = [16, 0], sizes = [112, 16], strides = [1, 1]} : vector<128x16xf32> to vector<112x16xf32>
    %16 = arith.maximumf %14, %15 : vector<112x16xf32>
    %17 = vector.extract_strided_slice %16 {offsets = [0, 0], sizes = [8, 16], strides = [1, 1]} : vector<112x16xf32> to vector<8x16xf32>
    %18 = vector.extract_strided_slice %16 {offsets = [16, 0], sizes = [8, 16], strides = [1, 1]} : vector<112x16xf32> to vector<8x16xf32>
    %19 = vector.extract_strided_slice %16 {offsets = [32, 0], sizes = [8, 16], strides = [1, 1]} : vector<112x16xf32> to vector<8x16xf32>
    %20 = vector.extract_strided_slice %16 {offsets = [48, 0], sizes = [8, 16], strides = [1, 1]} : vector<112x16xf32> to vector<8x16xf32>
    %21 = vector.extract_strided_slice %16 {offsets = [64, 0], sizes = [8, 16], strides = [1, 1]} : vector<112x16xf32> to vector<8x16xf32>
    %22 = vector.extract_strided_slice %16 {offsets = [80, 0], sizes = [8, 16], strides = [1, 1]} : vector<112x16xf32> to vector<8x16xf32>
    %23 = vector.extract_strided_slice %16 {offsets = [96, 0], sizes = [8, 16], strides = [1, 1]} : vector<112x16xf32> to vector<8x16xf32>
    %24 = tpu.concatenate %17, %18, %19, %20, %21, %22, %23 in 0 : vector<8x16xf32>, vector<8x16xf32>, vector<8x16xf32>, vector<8x16xf32>, vector<8x16xf32>, vector<8x16xf32>, vector<8x16xf32> -> vector<56x16xf32>
    %cst_6 = arith.constant 0.000000e+00 : f32
    %25 = vector.broadcast %cst_6 : f32 to vector<8x16xf32>
    %26 = tpu.concatenate %25, %24, %25 in 0 : vector<8x16xf32>, vector<56x16xf32>, vector<8x16xf32> -> vector<72x16xf32>
    %27 = vector.extract_strided_slice %26 {offsets = [0, 0], sizes = [56, 16], strides = [1, 1]} : vector<72x16xf32> to vector<56x16xf32>
    %28 = vector.extract_strided_slice %26 {offsets = [8, 0], sizes = [56, 16], strides = [1, 1]} : vector<72x16xf32> to vector<56x16xf32>
    %29 = vector.extract_strided_slice %26 {offsets = [16, 0], sizes = [56, 16], strides = [1, 1]} : vector<72x16xf32> to vector<56x16xf32>
    %30 = tpu.concatenate %27, %28, %29 in 1 : vector<56x16xf32>, vector<56x16xf32>, vector<56x16xf32> -> vector<56x48xf32>
    %c0_7 = arith.constant 0 : index
    %c0_8 = arith.constant 0 : index
    %31 = vector.load %arg3[%c0_7, %c0_8] : memref<48x16xf32, #tpu.memory_space<vmem>>, vector<48x16xf32>
    %cst_9 = arith.constant dense<0.000000e+00> : vector<56x16xf32>
    %32 = tpu.matmul %30, %31, %cst_9 {dimension_numbers = #tpu.dot_dimension_numbers<[1], [0], [0], [1], [0, 0, 1, 1], [], []>} : vector<56x48xf32>, vector<48x16xf32>, vector<56x16xf32> -> vector<56x16xf32>
    %c0_10 = arith.constant 0 : index
    %c0_11 = arith.constant 0 : index
    %33 = vector.load %arg4[%c0_10, %c0_11] : memref<1x16xf32, #tpu.memory_space<vmem>>, vector<1x16xf32>
    %34 = vector.broadcast %33 : vector<1x16xf32> to vector<56x16xf32>
    %35 = arith.addf %32, %34 : vector<56x16xf32>
    %cst_12 = arith.constant 0.000000e+00 : f32
    %36 = vector.broadcast %cst_12 : f32 to vector<56x16xf32>
    %37 = arith.maximumf %35, %36 : vector<56x16xf32>
    %38 = tpu.iota {dimensions = array<i32: 1>} : vector<1x256xi32>
    %c128_i32 = arith.constant 128 : i32
    %c0_i32 = arith.constant 0 : i32
    %39 = arith.cmpi eq, %c128_i32, %c0_i32 : i32
    %c1_i32 = arith.constant 1 : i32
    %40 = arith.select %39, %c1_i32, %c128_i32 : i32
    %41 = vector.broadcast %40 : i32 to vector<1x256xi32>
    %42 = arith.remsi %38, %41 : vector<1x256xi32>
    %c0_i32_13 = arith.constant 0 : i32
    %43 = vector.broadcast %c0_i32_13 : i32 to vector<1x256xi32>
    %44 = arith.cmpi ne, %42, %43 : vector<1x256xi32>
    %c0_i32_14 = arith.constant 0 : i32
    %45 = vector.broadcast %c0_i32_14 : i32 to vector<1x256xi32>
    %46 = arith.cmpi slt, %42, %45 : vector<1x256xi32>
    %c0_i32_15 = arith.constant 0 : i32
    %47 = arith.cmpi slt, %40, %c0_i32_15 : i32
    %48 = vector.broadcast %47 : i1 to vector<1x256xi1>
    %49 = vector.broadcast %48 : vector<1x256xi1> to vector<1x256xi1>
    %50 = arith.xori %46, %49 : vector<1x256xi1>
    %51 = arith.andi %50, %44 : vector<1x256xi1>
    %52 = vector.broadcast %40 : i32 to vector<1x256xi32>
    %53 = arith.addi %42, %52 : vector<1x256xi32>
    %54 = arith.select %51, %53, %42 : vector<1x256xi1>, vector<1x256xi32>
    %c64_i32 = arith.constant 64 : i32
    %55 = vector.broadcast %c64_i32 : i32 to vector<1x256xi32>
    %56 = arith.cmpi sge, %54, %55 : vector<1x256xi32>
    %c128_i32_16 = arith.constant 128 : i32
    %c0_i32_17 = arith.constant 0 : i32
    %57 = arith.cmpi eq, %c128_i32_16, %c0_i32_17 : i32
    %c1_i32_18 = arith.constant 1 : i32
    %58 = arith.select %57, %c1_i32_18, %c128_i32_16 : i32
    %59 = vector.broadcast %58 : i32 to vector<1x256xi32>
    %60 = arith.remsi %38, %59 : vector<1x256xi32>
    %c0_i32_19 = arith.constant 0 : i32
    %61 = vector.broadcast %c0_i32_19 : i32 to vector<1x256xi32>
    %62 = arith.cmpi ne, %60, %61 : vector<1x256xi32>
    %c0_i32_20 = arith.constant 0 : i32
    %63 = vector.broadcast %c0_i32_20 : i32 to vector<1x256xi32>
    %64 = arith.cmpi slt, %60, %63 : vector<1x256xi32>
    %c0_i32_21 = arith.constant 0 : i32
    %65 = arith.cmpi slt, %58, %c0_i32_21 : i32
    %66 = vector.broadcast %65 : i1 to vector<1x256xi1>
    %67 = vector.broadcast %66 : vector<1x256xi1> to vector<1x256xi1>
    %68 = arith.xori %64, %67 : vector<1x256xi1>
    %69 = arith.andi %68, %62 : vector<1x256xi1>
    %70 = vector.broadcast %58 : i32 to vector<1x256xi32>
    %71 = arith.addi %60, %70 : vector<1x256xi32>
    %72 = arith.select %69, %71, %60 : vector<1x256xi1>, vector<1x256xi32>
    %c96_i32 = arith.constant 96 : i32
    %73 = vector.broadcast %c96_i32 : i32 to vector<1x256xi32>
    %74 = arith.cmpi slt, %72, %73 : vector<1x256xi32>
    %75 = arith.andi %56, %74 : vector<1x256xi1>
    %cst_22 = arith.constant 1.000000e+00 : f32
    %cst_23 = arith.constant 5.000000e-01 : f32
    %76 = vector.broadcast %cst_22 : f32 to vector<1x256xf32>
    %77 = vector.broadcast %cst_23 : f32 to vector<1x256xf32>
    %78 = arith.select %75, %76, %77 : vector<1x256xi1>, vector<1x256xf32>
    %79 = vector.extract_strided_slice %78 {offsets = [0, 0], sizes = [1, 128], strides = [1, 1]} : vector<1x256xf32> to vector<1x128xf32>
    %80 = tpu.iota {dimensions = array<i32: 1>} : vector<16x128xi32>
    %c64_i32_24 = arith.constant 64 : i32
    %81 = vector.broadcast %c64_i32_24 : i32 to vector<16x128xi32>
    %82 = arith.cmpi sge, %80, %81 : vector<16x128xi32>
    %c96_i32_25 = arith.constant 96 : i32
    %83 = vector.broadcast %c96_i32_25 : i32 to vector<16x128xi32>
    %84 = arith.cmpi slt, %80, %83 : vector<16x128xi32>
    %85 = arith.andi %82, %84 : vector<16x128xi1>
    %cst_26 = arith.constant 1.000000e+00 : f32
    %cst_27 = arith.constant 5.000000e-01 : f32
    %86 = vector.broadcast %cst_26 : f32 to vector<16x128xf32>
    %87 = vector.broadcast %cst_27 : f32 to vector<16x128xf32>
    %88 = arith.select %85, %86, %87 : vector<16x128xi1>, vector<16x128xf32>
    %cst_28 = arith.constant 0.000000e+00 : f32
    %cst_29 = arith.constant 5.000000e-01 : f32
    %89 = vector.broadcast %cst_28 : f32 to vector<16x128xf32>
    %90 = vector.broadcast %cst_29 : f32 to vector<16x128xf32>
    %91 = arith.select %85, %89, %90 : vector<16x128xi1>, vector<16x128xf32>
    %92 = tpu.iota {dimensions = array<i32: 0>} : vector<16x64xi32>
    %93 = tpu.iota {dimensions = array<i32: 1>} : vector<16x64xi32>
    %c8_i32 = arith.constant 8 : i32
    %94 = vector.broadcast %c8_i32 : i32 to vector<16x64xi32>
    %95 = arith.cmpi slt, %92, %94 : vector<16x64xi32>
    %c32_i32 = arith.constant 32 : i32
    %96 = vector.broadcast %c32_i32 : i32 to vector<16x64xi32>
    %97 = arith.cmpi slt, %93, %96 : vector<16x64xi32>
    %98 = arith.xori %95, %97 : vector<16x64xi1>
    %cst_30 = arith.constant dense<true> : vector<16x64xi1>
    %99 = arith.xori %98, %cst_30 : vector<16x64xi1>
    %cst_31 = arith.constant 1.000000e+00 : f32
    %cst_32 = arith.constant 0.000000e+00 : f32
    %100 = vector.broadcast %cst_31 : f32 to vector<16x64xf32>
    %101 = vector.broadcast %cst_32 : f32 to vector<16x64xf32>
    %102 = arith.select %99, %100, %101 : vector<16x64xi1>, vector<16x64xf32>
    %c0_33 = arith.constant 0 : index
    %c0_34 = arith.constant 0 : index
    %103 = vector.load %arg5[%c0_33, %c0_34] : memref<16x256xf32, #tpu.memory_space<vmem>>, vector<16x256xf32>
    %c0_35 = arith.constant 0 : index
    %c0_36 = arith.constant 0 : index
    %104 = vector.load %arg6[%c0_35, %c0_36] : memref<64x128xf32, #tpu.memory_space<vmem>>, vector<64x128xf32>
    %105 = vector.broadcast %79 : vector<1x128xf32> to vector<64x128xf32>
    %106 = arith.mulf %104, %105 : vector<64x128xf32>
    %c0_37 = arith.constant 0 : index
    %c0_38 = arith.constant 0 : index
    %107 = vector.load %arg7[%c0_37, %c0_38] : memref<1x256xf32, #tpu.memory_space<vmem>>, vector<1x256xf32>
    %cst_39 = arith.constant dense<0.000000e+00> : vector<56x256xf32>
    %108 = tpu.matmul %37, %103, %cst_39 {dimension_numbers = #tpu.dot_dimension_numbers<[1], [0], [0], [1], [0, 0, 1, 1], [], []>} : vector<56x16xf32>, vector<16x256xf32>, vector<56x256xf32> -> vector<56x256xf32>
    %109 = vector.broadcast %107 : vector<1x256xf32> to vector<56x256xf32>
    %110 = arith.addf %108, %109 : vector<56x256xf32>
    %111 = vector.broadcast %78 : vector<1x256xf32> to vector<56x256xf32>
    %112 = arith.mulf %110, %111 : vector<56x256xf32>
    %113 = vector.extract_strided_slice %112 {offsets = [0, 0], sizes = [8, 128], strides = [1, 1]} : vector<56x256xf32> to vector<8x128xf32>
    %114 = vector.extract_strided_slice %112 {offsets = [48, 128], sizes = [8, 128], strides = [1, 1]} : vector<56x256xf32> to vector<8x128xf32>
    %115 = tpu.concatenate %113, %114 in 0 : vector<8x128xf32>, vector<8x128xf32> -> vector<16x128xf32>
    %c0_40 = arith.constant 0 : index
    %c0_41 = arith.constant 0 : index
    %c0_42 = arith.constant 0 : index
    %116 = vector.load %arg15[%c0_40, %c0_41, %c0_42] : memref<7x16x128xf32, #tpu.memory_space<vmem>>, vector<1x16x128xf32>
    %117 = vector.shape_cast %116 : vector<1x16x128xf32> to vector<16x128xf32>
    %118 = vector.shape_cast %115 : vector<16x128xf32> to vector<1x16x128xf32>
    tpu.vector_store %arg15[%c0_40, %c0_41, %c0_42], %118 {strides = array<i32>} : memref<7x16x128xf32, #tpu.memory_space<vmem>>, vector<1x16x128xf32>,
    %119 = vector.extract_strided_slice %112 {offsets = [8, 0], sizes = [8, 128], strides = [1, 1]} : vector<56x256xf32> to vector<8x128xf32>
    %120 = vector.extract_strided_slice %112 {offsets = [40, 128], sizes = [8, 128], strides = [1, 1]} : vector<56x256xf32> to vector<8x128xf32>
    %121 = tpu.concatenate %119, %120 in 0 : vector<8x128xf32>, vector<8x128xf32> -> vector<16x128xf32>
    %c1 = arith.constant 1 : index
    %c0_43 = arith.constant 0 : index
    %c0_44 = arith.constant 0 : index
    %122 = vector.load %arg15[%c1, %c0_43, %c0_44] : memref<7x16x128xf32, #tpu.memory_space<vmem>>, vector<1x16x128xf32>
    %123 = vector.shape_cast %122 : vector<1x16x128xf32> to vector<16x128xf32>
    %124 = vector.shape_cast %121 : vector<16x128xf32> to vector<1x16x128xf32>
    tpu.vector_store %arg15[%c1, %c0_43, %c0_44], %124 {strides = array<i32>} : memref<7x16x128xf32, #tpu.memory_space<vmem>>, vector<1x16x128xf32>,
    %125 = vector.extract_strided_slice %112 {offsets = [16, 0], sizes = [8, 128], strides = [1, 1]} : vector<56x256xf32> to vector<8x128xf32>
    %126 = vector.extract_strided_slice %112 {offsets = [32, 128], sizes = [8, 128], strides = [1, 1]} : vector<56x256xf32> to vector<8x128xf32>
    %127 = tpu.concatenate %125, %126 in 0 : vector<8x128xf32>, vector<8x128xf32> -> vector<16x128xf32>
    %c2 = arith.constant 2 : index
    %c0_45 = arith.constant 0 : index
    %c0_46 = arith.constant 0 : index
    %128 = vector.load %arg15[%c2, %c0_45, %c0_46] : memref<7x16x128xf32, #tpu.memory_space<vmem>>, vector<1x16x128xf32>
    %129 = vector.shape_cast %128 : vector<1x16x128xf32> to vector<16x128xf32>
    %130 = vector.shape_cast %127 : vector<16x128xf32> to vector<1x16x128xf32>
    tpu.vector_store %arg15[%c2, %c0_45, %c0_46], %130 {strides = array<i32>} : memref<7x16x128xf32, #tpu.memory_space<vmem>>, vector<1x16x128xf32>,
    %131 = vector.extract_strided_slice %112 {offsets = [24, 0], sizes = [8, 128], strides = [1, 1]} : vector<56x256xf32> to vector<8x128xf32>
    %132 = vector.extract_strided_slice %112 {offsets = [24, 128], sizes = [8, 128], strides = [1, 1]} : vector<56x256xf32> to vector<8x128xf32>
    %133 = tpu.concatenate %131, %132 in 0 : vector<8x128xf32>, vector<8x128xf32> -> vector<16x128xf32>
    %c3 = arith.constant 3 : index
    %c0_47 = arith.constant 0 : index
    %c0_48 = arith.constant 0 : index
    %134 = vector.load %arg15[%c3, %c0_47, %c0_48] : memref<7x16x128xf32, #tpu.memory_space<vmem>>, vector<1x16x128xf32>
    %135 = vector.shape_cast %134 : vector<1x16x128xf32> to vector<16x128xf32>
    %136 = vector.shape_cast %133 : vector<16x128xf32> to vector<1x16x128xf32>
    tpu.vector_store %arg15[%c3, %c0_47, %c0_48], %136 {strides = array<i32>} : memref<7x16x128xf32, #tpu.memory_space<vmem>>, vector<1x16x128xf32>,
    %137 = vector.extract_strided_slice %112 {offsets = [32, 0], sizes = [8, 128], strides = [1, 1]} : vector<56x256xf32> to vector<8x128xf32>
    %138 = vector.extract_strided_slice %112 {offsets = [16, 128], sizes = [8, 128], strides = [1, 1]} : vector<56x256xf32> to vector<8x128xf32>
    %139 = tpu.concatenate %137, %138 in 0 : vector<8x128xf32>, vector<8x128xf32> -> vector<16x128xf32>
    %c4 = arith.constant 4 : index
    %c0_49 = arith.constant 0 : index
    %c0_50 = arith.constant 0 : index
    %140 = vector.load %arg15[%c4, %c0_49, %c0_50] : memref<7x16x128xf32, #tpu.memory_space<vmem>>, vector<1x16x128xf32>
    %141 = vector.shape_cast %140 : vector<1x16x128xf32> to vector<16x128xf32>
    %142 = vector.shape_cast %139 : vector<16x128xf32> to vector<1x16x128xf32>
    tpu.vector_store %arg15[%c4, %c0_49, %c0_50], %142 {strides = array<i32>} : memref<7x16x128xf32, #tpu.memory_space<vmem>>, vector<1x16x128xf32>,
    %143 = vector.extract_strided_slice %112 {offsets = [40, 0], sizes = [8, 128], strides = [1, 1]} : vector<56x256xf32> to vector<8x128xf32>
    %144 = vector.extract_strided_slice %112 {offsets = [8, 128], sizes = [8, 128], strides = [1, 1]} : vector<56x256xf32> to vector<8x128xf32>
    %145 = tpu.concatenate %143, %144 in 0 : vector<8x128xf32>, vector<8x128xf32> -> vector<16x128xf32>
    %c5 = arith.constant 5 : index
    %c0_51 = arith.constant 0 : index
    %c0_52 = arith.constant 0 : index
    %146 = vector.load %arg15[%c5, %c0_51, %c0_52] : memref<7x16x128xf32, #tpu.memory_space<vmem>>, vector<1x16x128xf32>
    %147 = vector.shape_cast %146 : vector<1x16x128xf32> to vector<16x128xf32>
    %148 = vector.shape_cast %145 : vector<16x128xf32> to vector<1x16x128xf32>
    tpu.vector_store %arg15[%c5, %c0_51, %c0_52], %148 {strides = array<i32>} : memref<7x16x128xf32, #tpu.memory_space<vmem>>, vector<1x16x128xf32>,
    %149 = vector.extract_strided_slice %112 {offsets = [48, 0], sizes = [8, 128], strides = [1, 1]} : vector<56x256xf32> to vector<8x128xf32>
    %150 = vector.extract_strided_slice %112 {offsets = [0, 128], sizes = [8, 128], strides = [1, 1]} : vector<56x256xf32> to vector<8x128xf32>
    %151 = tpu.concatenate %149, %150 in 0 : vector<8x128xf32>, vector<8x128xf32> -> vector<16x128xf32>
    %c6 = arith.constant 6 : index
    %c0_53 = arith.constant 0 : index
    %c0_54 = arith.constant 0 : index
    %152 = vector.load %arg15[%c6, %c0_53, %c0_54] : memref<7x16x128xf32, #tpu.memory_space<vmem>>, vector<1x16x128xf32>
    %153 = vector.shape_cast %152 : vector<1x16x128xf32> to vector<16x128xf32>
    %154 = vector.shape_cast %151 : vector<16x128xf32> to vector<1x16x128xf32>
    tpu.vector_store %arg15[%c6, %c0_53, %c0_54], %154 {strides = array<i32>} : memref<7x16x128xf32, #tpu.memory_space<vmem>>, vector<1x16x128xf32>,
    %cst_55 = arith.constant 0.000000e+00 : f32
    %155 = vector.broadcast %cst_55 : f32 to vector<16x64xf32>
    %cst_56 = arith.constant 0.000000e+00 : f32
    %156 = vector.broadcast %cst_56 : f32 to vector<16x32xf32>
    %cst_57 = arith.constant dense<0.000000e+00> : vector<16x128xf32>
    %157 = tpu.matmul %155, %106, %cst_57 {dimension_numbers = #tpu.dot_dimension_numbers<[1], [0], [0], [1], [0, 0, 1, 1], [], []>} : vector<16x64xf32>, vector<64x128xf32>, vector<16x128xf32> -> vector<16x128xf32>
    %c0_58 = arith.constant 0 : index
    %c0_59 = arith.constant 0 : index
    %c0_60 = arith.constant 0 : index
    %158 = vector.load %arg15[%c0_58, %c0_59, %c0_60] : memref<7x16x128xf32, #tpu.memory_space<vmem>>, vector<1x16x128xf32>
    %159 = vector.shape_cast %158 : vector<1x16x128xf32> to vector<16x128xf32>
    %160 = arith.addf %157, %159 : vector<16x128xf32>
    %161 = math.tanh %160 : vector<16x128xf32>
    %162 = arith.mulf %161, %88 : vector<16x128xf32>
    %163 = arith.addf %162, %91 : vector<16x128xf32>
    %164 = vector.extract_strided_slice %163 {offsets = [0, 0], sizes = [16, 32], strides = [1, 1]} : vector<16x128xf32> to vector<16x32xf32>
    %165 = vector.extract_strided_slice %163 {offsets = [0, 32], sizes = [16, 32], strides = [1, 1]} : vector<16x128xf32> to vector<16x32xf32>
    %166 = vector.extract_strided_slice %163 {offsets = [0, 64], sizes = [16, 32], strides = [1, 1]} : vector<16x128xf32> to vector<16x32xf32>
    %167 = vector.extract_strided_slice %163 {offsets = [0, 96], sizes = [16, 32], strides = [1, 1]} : vector<16x128xf32> to vector<16x32xf32>
    %168 = arith.mulf %165, %156 : vector<16x32xf32>
    %169 = arith.mulf %164, %166 : vector<16x32xf32>
    %170 = arith.addf %168, %169 : vector<16x32xf32>
    %171 = math.tanh %170 : vector<16x32xf32>
    %172 = arith.mulf %167, %171 : vector<16x32xf32>
    %173 = vector.extract_strided_slice %172 {offsets = [0, 0], sizes = [8, 32], strides = [1, 1]} : vector<16x32xf32> to vector<8x32xf32>
    %c0_61 = arith.constant 0 : index
    %c0_62 = arith.constant 0 : index
    %174 = vector.load %arg16[%c0_61, %c0_62] : memref<56x64xf32, #tpu.memory_space<vmem>>, vector<8x32xf32>
    tpu.vector_store %arg16[%c0_61, %c0_62], %173 {strides = array<i32>} : memref<56x64xf32, #tpu.memory_space<vmem>>, vector<8x32xf32>,
    %175 = vector.extract_strided_slice %172 {offsets = [8, 0], sizes = [8, 32], strides = [1, 1]} : vector<16x32xf32> to vector<8x32xf32>
    %c48 = arith.constant 48 : index
    %c32 = arith.constant 32 : index
    %176 = vector.load %arg16[%c48, %c32] : memref<56x64xf32, #tpu.memory_space<vmem>>, vector<8x32xf32>
    tpu.vector_store %arg16[%c48, %c32], %175 {strides = array<i32>} : memref<56x64xf32, #tpu.memory_space<vmem>>, vector<8x32xf32>,
    %177 = tpu.concatenate %172, %172 in 1 : vector<16x32xf32>, vector<16x32xf32> -> vector<16x64xf32>
    %178 = arith.mulf %177, %102 : vector<16x64xf32>
    %cst_63 = arith.constant dense<0.000000e+00> : vector<16x128xf32>
    %179 = tpu.matmul %178, %106, %cst_63 {dimension_numbers = #tpu.dot_dimension_numbers<[1], [0], [0], [1], [0, 0, 1, 1], [], []>} : vector<16x64xf32>, vector<64x128xf32>, vector<16x128xf32> -> vector<16x128xf32>
    %c1_64 = arith.constant 1 : index
    %c0_65 = arith.constant 0 : index
    %c0_66 = arith.constant 0 : index
    %180 = vector.load %arg15[%c1_64, %c0_65, %c0_66] : memref<7x16x128xf32, #tpu.memory_space<vmem>>, vector<1x16x128xf32>
    %181 = vector.shape_cast %180 : vector<1x16x128xf32> to vector<16x128xf32>
    %182 = arith.addf %179, %181 : vector<16x128xf32>
    %183 = math.tanh %182 : vector<16x128xf32>
    %184 = arith.mulf %183, %88 : vector<16x128xf32>
    %185 = arith.addf %184, %91 : vector<16x128xf32>
    %186 = vector.extract_strided_slice %185 {offsets = [0, 0], sizes = [16, 32], strides = [1, 1]} : vector<16x128xf32> to vector<16x32xf32>
    %187 = vector.extract_strided_slice %185 {offsets = [0, 32], sizes = [16, 32], strides = [1, 1]} : vector<16x128xf32> to vector<16x32xf32>
    %188 = vector.extract_strided_slice %185 {offsets = [0, 64], sizes = [16, 32], strides = [1, 1]} : vector<16x128xf32> to vector<16x32xf32>
    %189 = vector.extract_strided_slice %185 {offsets = [0, 96], sizes = [16, 32], strides = [1, 1]} : vector<16x128xf32> to vector<16x32xf32>
    %190 = arith.mulf %187, %170 : vector<16x32xf32>
    %191 = arith.mulf %186, %188 : vector<16x32xf32>
    %192 = arith.addf %190, %191 : vector<16x32xf32>
    %193 = math.tanh %192 : vector<16x32xf32>
    %194 = arith.mulf %189, %193 : vector<16x32xf32>
    %195 = vector.extract_strided_slice %194 {offsets = [0, 0], sizes = [8, 32], strides = [1, 1]} : vector<16x32xf32> to vector<8x32xf32>
    %c8 = arith.constant 8 : index
    %c0_67 = arith.constant 0 : index
    %196 = vector.load %arg16[%c8, %c0_67] : memref<56x64xf32, #tpu.memory_space<vmem>>, vector<8x32xf32>
    tpu.vector_store %arg16[%c8, %c0_67], %195 {strides = array<i32>} : memref<56x64xf32, #tpu.memory_space<vmem>>, vector<8x32xf32>,
    %197 = vector.extract_strided_slice %194 {offsets = [8, 0], sizes = [8, 32], strides = [1, 1]} : vector<16x32xf32> to vector<8x32xf32>
    %c40 = arith.constant 40 : index
    %c32_68 = arith.constant 32 : index
    %198 = vector.load %arg16[%c40, %c32_68] : memref<56x64xf32, #tpu.memory_space<vmem>>, vector<8x32xf32>
    tpu.vector_store %arg16[%c40, %c32_68], %197 {strides = array<i32>} : memref<56x64xf32, #tpu.memory_space<vmem>>, vector<8x32xf32>,
    %199 = tpu.concatenate %194, %194 in 1 : vector<16x32xf32>, vector<16x32xf32> -> vector<16x64xf32>
    %200 = arith.mulf %199, %102 : vector<16x64xf32>
    %cst_69 = arith.constant dense<0.000000e+00> : vector<16x128xf32>
    %201 = tpu.matmul %200, %106, %cst_69 {dimension_numbers = #tpu.dot_dimension_numbers<[1], [0], [0], [1], [0, 0, 1, 1], [], []>} : vector<16x64xf32>, vector<64x128xf32>, vector<16x128xf32> -> vector<16x128xf32>
    %c2_70 = arith.constant 2 : index
    %c0_71 = arith.constant 0 : index
    %c0_72 = arith.constant 0 : index
    %202 = vector.load %arg15[%c2_70, %c0_71, %c0_72] : memref<7x16x128xf32, #tpu.memory_space<vmem>>, vector<1x16x128xf32>
    %203 = vector.shape_cast %202 : vector<1x16x128xf32> to vector<16x128xf32>
    %204 = arith.addf %201, %203 : vector<16x128xf32>
    %205 = math.tanh %204 : vector<16x128xf32>
    %206 = arith.mulf %205, %88 : vector<16x128xf32>
    %207 = arith.addf %206, %91 : vector<16x128xf32>
    %208 = vector.extract_strided_slice %207 {offsets = [0, 0], sizes = [16, 32], strides = [1, 1]} : vector<16x128xf32> to vector<16x32xf32>
    %209 = vector.extract_strided_slice %207 {offsets = [0, 32], sizes = [16, 32], strides = [1, 1]} : vector<16x128xf32> to vector<16x32xf32>
    %210 = vector.extract_strided_slice %207 {offsets = [0, 64], sizes = [16, 32], strides = [1, 1]} : vector<16x128xf32> to vector<16x32xf32>
    %211 = vector.extract_strided_slice %207 {offsets = [0, 96], sizes = [16, 32], strides = [1, 1]} : vector<16x128xf32> to vector<16x32xf32>
    %212 = arith.mulf %209, %192 : vector<16x32xf32>
    %213 = arith.mulf %208, %210 : vector<16x32xf32>
    %214 = arith.addf %212, %213 : vector<16x32xf32>
    %215 = math.tanh %214 : vector<16x32xf32>
    %216 = arith.mulf %211, %215 : vector<16x32xf32>
    %217 = vector.extract_strided_slice %216 {offsets = [0, 0], sizes = [8, 32], strides = [1, 1]} : vector<16x32xf32> to vector<8x32xf32>
    %c16 = arith.constant 16 : index
    %c0_73 = arith.constant 0 : index
    %218 = vector.load %arg16[%c16, %c0_73] : memref<56x64xf32, #tpu.memory_space<vmem>>, vector<8x32xf32>
    tpu.vector_store %arg16[%c16, %c0_73], %217 {strides = array<i32>} : memref<56x64xf32, #tpu.memory_space<vmem>>, vector<8x32xf32>,
    %219 = vector.extract_strided_slice %216 {offsets = [8, 0], sizes = [8, 32], strides = [1, 1]} : vector<16x32xf32> to vector<8x32xf32>
    %c32_74 = arith.constant 32 : index
    %c32_75 = arith.constant 32 : index
    %220 = vector.load %arg16[%c32_74, %c32_75] : memref<56x64xf32, #tpu.memory_space<vmem>>, vector<8x32xf32>
    tpu.vector_store %arg16[%c32_74, %c32_75], %219 {strides = array<i32>} : memref<56x64xf32, #tpu.memory_space<vmem>>, vector<8x32xf32>,
    %221 = tpu.concatenate %216, %216 in 1 : vector<16x32xf32>, vector<16x32xf32> -> vector<16x64xf32>
    %222 = arith.mulf %221, %102 : vector<16x64xf32>
    %cst_76 = arith.constant dense<0.000000e+00> : vector<16x128xf32>
    %223 = tpu.matmul %222, %106, %cst_76 {dimension_numbers = #tpu.dot_dimension_numbers<[1], [0], [0], [1], [0, 0, 1, 1], [], []>} : vector<16x64xf32>, vector<64x128xf32>, vector<16x128xf32> -> vector<16x128xf32>
    %c3_77 = arith.constant 3 : index
    %c0_78 = arith.constant 0 : index
    %c0_79 = arith.constant 0 : index
    %224 = vector.load %arg15[%c3_77, %c0_78, %c0_79] : memref<7x16x128xf32, #tpu.memory_space<vmem>>, vector<1x16x128xf32>
    %225 = vector.shape_cast %224 : vector<1x16x128xf32> to vector<16x128xf32>
    %226 = arith.addf %223, %225 : vector<16x128xf32>
    %227 = math.tanh %226 : vector<16x128xf32>
    %228 = arith.mulf %227, %88 : vector<16x128xf32>
    %229 = arith.addf %228, %91 : vector<16x128xf32>
    %230 = vector.extract_strided_slice %229 {offsets = [0, 0], sizes = [16, 32], strides = [1, 1]} : vector<16x128xf32> to vector<16x32xf32>
    %231 = vector.extract_strided_slice %229 {offsets = [0, 32], sizes = [16, 32], strides = [1, 1]} : vector<16x128xf32> to vector<16x32xf32>
    %232 = vector.extract_strided_slice %229 {offsets = [0, 64], sizes = [16, 32], strides = [1, 1]} : vector<16x128xf32> to vector<16x32xf32>
    %233 = vector.extract_strided_slice %229 {offsets = [0, 96], sizes = [16, 32], strides = [1, 1]} : vector<16x128xf32> to vector<16x32xf32>
    %234 = arith.mulf %231, %214 : vector<16x32xf32>
    %235 = arith.mulf %230, %232 : vector<16x32xf32>
    %236 = arith.addf %234, %235 : vector<16x32xf32>
    %237 = math.tanh %236 : vector<16x32xf32>
    %238 = arith.mulf %233, %237 : vector<16x32xf32>
    %239 = vector.extract_strided_slice %238 {offsets = [0, 0], sizes = [8, 32], strides = [1, 1]} : vector<16x32xf32> to vector<8x32xf32>
    %c24 = arith.constant 24 : index
    %c0_80 = arith.constant 0 : index
    %240 = vector.load %arg16[%c24, %c0_80] : memref<56x64xf32, #tpu.memory_space<vmem>>, vector<8x32xf32>
    tpu.vector_store %arg16[%c24, %c0_80], %239 {strides = array<i32>} : memref<56x64xf32, #tpu.memory_space<vmem>>, vector<8x32xf32>,
    %241 = vector.extract_strided_slice %238 {offsets = [8, 0], sizes = [8, 32], strides = [1, 1]} : vector<16x32xf32> to vector<8x32xf32>
    %c24_81 = arith.constant 24 : index
    %c32_82 = arith.constant 32 : index
    %242 = vector.load %arg16[%c24_81, %c32_82] : memref<56x64xf32, #tpu.memory_space<vmem>>, vector<8x32xf32>
    tpu.vector_store %arg16[%c24_81, %c32_82], %241 {strides = array<i32>} : memref<56x64xf32, #tpu.memory_space<vmem>>, vector<8x32xf32>,
    %243 = tpu.concatenate %238, %238 in 1 : vector<16x32xf32>, vector<16x32xf32> -> vector<16x64xf32>
    %244 = arith.mulf %243, %102 : vector<16x64xf32>
    %cst_83 = arith.constant dense<0.000000e+00> : vector<16x128xf32>
    %245 = tpu.matmul %244, %106, %cst_83 {dimension_numbers = #tpu.dot_dimension_numbers<[1], [0], [0], [1], [0, 0, 1, 1], [], []>} : vector<16x64xf32>, vector<64x128xf32>, vector<16x128xf32> -> vector<16x128xf32>
    %c4_84 = arith.constant 4 : index
    %c0_85 = arith.constant 0 : index
    %c0_86 = arith.constant 0 : index
    %246 = vector.load %arg15[%c4_84, %c0_85, %c0_86] : memref<7x16x128xf32, #tpu.memory_space<vmem>>, vector<1x16x128xf32>
    %247 = vector.shape_cast %246 : vector<1x16x128xf32> to vector<16x128xf32>
    %248 = arith.addf %245, %247 : vector<16x128xf32>
    %249 = math.tanh %248 : vector<16x128xf32>
    %250 = arith.mulf %249, %88 : vector<16x128xf32>
    %251 = arith.addf %250, %91 : vector<16x128xf32>
    %252 = vector.extract_strided_slice %251 {offsets = [0, 0], sizes = [16, 32], strides = [1, 1]} : vector<16x128xf32> to vector<16x32xf32>
    %253 = vector.extract_strided_slice %251 {offsets = [0, 32], sizes = [16, 32], strides = [1, 1]} : vector<16x128xf32> to vector<16x32xf32>
    %254 = vector.extract_strided_slice %251 {offsets = [0, 64], sizes = [16, 32], strides = [1, 1]} : vector<16x128xf32> to vector<16x32xf32>
    %255 = vector.extract_strided_slice %251 {offsets = [0, 96], sizes = [16, 32], strides = [1, 1]} : vector<16x128xf32> to vector<16x32xf32>
    %256 = arith.mulf %253, %236 : vector<16x32xf32>
    %257 = arith.mulf %252, %254 : vector<16x32xf32>
    %258 = arith.addf %256, %257 : vector<16x32xf32>
    %259 = math.tanh %258 : vector<16x32xf32>
    %260 = arith.mulf %255, %259 : vector<16x32xf32>
    %261 = vector.extract_strided_slice %260 {offsets = [0, 0], sizes = [8, 32], strides = [1, 1]} : vector<16x32xf32> to vector<8x32xf32>
    %c32_87 = arith.constant 32 : index
    %c0_88 = arith.constant 0 : index
    %262 = vector.load %arg16[%c32_87, %c0_88] : memref<56x64xf32, #tpu.memory_space<vmem>>, vector<8x32xf32>
    tpu.vector_store %arg16[%c32_87, %c0_88], %261 {strides = array<i32>} : memref<56x64xf32, #tpu.memory_space<vmem>>, vector<8x32xf32>,
    %263 = vector.extract_strided_slice %260 {offsets = [8, 0], sizes = [8, 32], strides = [1, 1]} : vector<16x32xf32> to vector<8x32xf32>
    %c16_89 = arith.constant 16 : index
    %c32_90 = arith.constant 32 : index
    %264 = vector.load %arg16[%c16_89, %c32_90] : memref<56x64xf32, #tpu.memory_space<vmem>>, vector<8x32xf32>
    tpu.vector_store %arg16[%c16_89, %c32_90], %263 {strides = array<i32>} : memref<56x64xf32, #tpu.memory_space<vmem>>, vector<8x32xf32>,
    %265 = tpu.concatenate %260, %260 in 1 : vector<16x32xf32>, vector<16x32xf32> -> vector<16x64xf32>
    %266 = arith.mulf %265, %102 : vector<16x64xf32>
    %cst_91 = arith.constant dense<0.000000e+00> : vector<16x128xf32>
    %267 = tpu.matmul %266, %106, %cst_91 {dimension_numbers = #tpu.dot_dimension_numbers<[1], [0], [0], [1], [0, 0, 1, 1], [], []>} : vector<16x64xf32>, vector<64x128xf32>, vector<16x128xf32> -> vector<16x128xf32>
    %c5_92 = arith.constant 5 : index
    %c0_93 = arith.constant 0 : index
    %c0_94 = arith.constant 0 : index
    %268 = vector.load %arg15[%c5_92, %c0_93, %c0_94] : memref<7x16x128xf32, #tpu.memory_space<vmem>>, vector<1x16x128xf32>
    %269 = vector.shape_cast %268 : vector<1x16x128xf32> to vector<16x128xf32>
    %270 = arith.addf %267, %269 : vector<16x128xf32>
    %271 = math.tanh %270 : vector<16x128xf32>
    %272 = arith.mulf %271, %88 : vector<16x128xf32>
    %273 = arith.addf %272, %91 : vector<16x128xf32>
    %274 = vector.extract_strided_slice %273 {offsets = [0, 0], sizes = [16, 32], strides = [1, 1]} : vector<16x128xf32> to vector<16x32xf32>
    %275 = vector.extract_strided_slice %273 {offsets = [0, 32], sizes = [16, 32], strides = [1, 1]} : vector<16x128xf32> to vector<16x32xf32>
    %276 = vector.extract_strided_slice %273 {offsets = [0, 64], sizes = [16, 32], strides = [1, 1]} : vector<16x128xf32> to vector<16x32xf32>
    %277 = vector.extract_strided_slice %273 {offsets = [0, 96], sizes = [16, 32], strides = [1, 1]} : vector<16x128xf32> to vector<16x32xf32>
    %278 = arith.mulf %275, %258 : vector<16x32xf32>
    %279 = arith.mulf %274, %276 : vector<16x32xf32>
    %280 = arith.addf %278, %279 : vector<16x32xf32>
    %281 = math.tanh %280 : vector<16x32xf32>
    %282 = arith.mulf %277, %281 : vector<16x32xf32>
    %283 = vector.extract_strided_slice %282 {offsets = [0, 0], sizes = [8, 32], strides = [1, 1]} : vector<16x32xf32> to vector<8x32xf32>
    %c40_95 = arith.constant 40 : index
    %c0_96 = arith.constant 0 : index
    %284 = vector.load %arg16[%c40_95, %c0_96] : memref<56x64xf32, #tpu.memory_space<vmem>>, vector<8x32xf32>
    tpu.vector_store %arg16[%c40_95, %c0_96], %283 {strides = array<i32>} : memref<56x64xf32, #tpu.memory_space<vmem>>, vector<8x32xf32>,
    %285 = vector.extract_strided_slice %282 {offsets = [8, 0], sizes = [8, 32], strides = [1, 1]} : vector<16x32xf32> to vector<8x32xf32>
    %c8_97 = arith.constant 8 : index
    %c32_98 = arith.constant 32 : index
    %286 = vector.load %arg16[%c8_97, %c32_98] : memref<56x64xf32, #tpu.memory_space<vmem>>, vector<8x32xf32>
    tpu.vector_store %arg16[%c8_97, %c32_98], %285 {strides = array<i32>} : memref<56x64xf32, #tpu.memory_space<vmem>>, vector<8x32xf32>,
    %287 = tpu.concatenate %282, %282 in 1 : vector<16x32xf32>, vector<16x32xf32> -> vector<16x64xf32>
    %288 = arith.mulf %287, %102 : vector<16x64xf32>
    %cst_99 = arith.constant dense<0.000000e+00> : vector<16x128xf32>
    %289 = tpu.matmul %288, %106, %cst_99 {dimension_numbers = #tpu.dot_dimension_numbers<[1], [0], [0], [1], [0, 0, 1, 1], [], []>} : vector<16x64xf32>, vector<64x128xf32>, vector<16x128xf32> -> vector<16x128xf32>
    %c6_100 = arith.constant 6 : index
    %c0_101 = arith.constant 0 : index
    %c0_102 = arith.constant 0 : index
    %290 = vector.load %arg15[%c6_100, %c0_101, %c0_102] : memref<7x16x128xf32, #tpu.memory_space<vmem>>, vector<1x16x128xf32>
    %291 = vector.shape_cast %290 : vector<1x16x128xf32> to vector<16x128xf32>
    %292 = arith.addf %289, %291 : vector<16x128xf32>
    %293 = math.tanh %292 : vector<16x128xf32>
    %294 = arith.mulf %293, %88 : vector<16x128xf32>
    %295 = arith.addf %294, %91 : vector<16x128xf32>
    %296 = vector.extract_strided_slice %295 {offsets = [0, 0], sizes = [16, 32], strides = [1, 1]} : vector<16x128xf32> to vector<16x32xf32>
    %297 = vector.extract_strided_slice %295 {offsets = [0, 32], sizes = [16, 32], strides = [1, 1]} : vector<16x128xf32> to vector<16x32xf32>
    %298 = vector.extract_strided_slice %295 {offsets = [0, 64], sizes = [16, 32], strides = [1, 1]} : vector<16x128xf32> to vector<16x32xf32>
    %299 = vector.extract_strided_slice %295 {offsets = [0, 96], sizes = [16, 32], strides = [1, 1]} : vector<16x128xf32> to vector<16x32xf32>
    %300 = arith.mulf %297, %280 : vector<16x32xf32>
    %301 = arith.mulf %296, %298 : vector<16x32xf32>
    %302 = arith.addf %300, %301 : vector<16x32xf32>
    %303 = math.tanh %302 : vector<16x32xf32>
    %304 = arith.mulf %299, %303 : vector<16x32xf32>
    %305 = vector.extract_strided_slice %304 {offsets = [0, 0], sizes = [8, 32], strides = [1, 1]} : vector<16x32xf32> to vector<8x32xf32>
    %c48_103 = arith.constant 48 : index
    %c0_104 = arith.constant 0 : index
    %306 = vector.load %arg16[%c48_103, %c0_104] : memref<56x64xf32, #tpu.memory_space<vmem>>, vector<8x32xf32>
    tpu.vector_store %arg16[%c48_103, %c0_104], %305 {strides = array<i32>} : memref<56x64xf32, #tpu.memory_space<vmem>>, vector<8x32xf32>,
    %307 = vector.extract_strided_slice %304 {offsets = [8, 0], sizes = [8, 32], strides = [1, 1]} : vector<16x32xf32> to vector<8x32xf32>
    %c0_105 = arith.constant 0 : index
    %c32_106 = arith.constant 32 : index
    %308 = vector.load %arg16[%c0_105, %c32_106] : memref<56x64xf32, #tpu.memory_space<vmem>>, vector<8x32xf32>
    tpu.vector_store %arg16[%c0_105, %c32_106], %307 {strides = array<i32>} : memref<56x64xf32, #tpu.memory_space<vmem>>, vector<8x32xf32>,
    %c0_107 = arith.constant 0 : index
    %c0_108 = arith.constant 0 : index
    %309 = vector.load %arg16[%c0_107, %c0_108] : memref<56x64xf32, #tpu.memory_space<vmem>>, vector<56x64xf32>
    %c0_109 = arith.constant 0 : index
    %c0_110 = arith.constant 0 : index
    %310 = vector.load %arg8[%c0_109, %c0_110] : memref<64x256xf32, #tpu.memory_space<vmem>>, vector<64x256xf32>
    %c0_111 = arith.constant 0 : index
    %c0_112 = arith.constant 0 : index
    %311 = vector.load %arg9[%c0_111, %c0_112] : memref<64x128xf32, #tpu.memory_space<vmem>>, vector<64x128xf32>
    %312 = vector.broadcast %79 : vector<1x128xf32> to vector<64x128xf32>
    %313 = arith.mulf %311, %312 : vector<64x128xf32>
    %c0_113 = arith.constant 0 : index
    %c0_114 = arith.constant 0 : index
    %314 = vector.load %arg10[%c0_113, %c0_114] : memref<1x256xf32, #tpu.memory_space<vmem>>, vector<1x256xf32>
    %cst_115 = arith.constant dense<0.000000e+00> : vector<56x256xf32>
    %315 = tpu.matmul %309, %310, %cst_115 {dimension_numbers = #tpu.dot_dimension_numbers<[1], [0], [0], [1], [0, 0, 1, 1], [], []>} : vector<56x64xf32>, vector<64x256xf32>, vector<56x256xf32> -> vector<56x256xf32>
    %316 = vector.broadcast %314 : vector<1x256xf32> to vector<56x256xf32>
    %317 = arith.addf %315, %316 : vector<56x256xf32>
    %318 = vector.broadcast %78 : vector<1x256xf32> to vector<56x256xf32>
    %319 = arith.mulf %317, %318 : vector<56x256xf32>
    %320 = vector.extract_strided_slice %319 {offsets = [0, 0], sizes = [8, 128], strides = [1, 1]} : vector<56x256xf32> to vector<8x128xf32>
    %321 = vector.extract_strided_slice %319 {offsets = [48, 128], sizes = [8, 128], strides = [1, 1]} : vector<56x256xf32> to vector<8x128xf32>
    %322 = tpu.concatenate %320, %321 in 0 : vector<8x128xf32>, vector<8x128xf32> -> vector<16x128xf32>
    %c0_116 = arith.constant 0 : index
    %c0_117 = arith.constant 0 : index
    %c0_118 = arith.constant 0 : index
    %323 = vector.load %arg15[%c0_116, %c0_117, %c0_118] : memref<7x16x128xf32, #tpu.memory_space<vmem>>, vector<1x16x128xf32>
    %324 = vector.shape_cast %323 : vector<1x16x128xf32> to vector<16x128xf32>
    %325 = vector.shape_cast %322 : vector<16x128xf32> to vector<1x16x128xf32>
    tpu.vector_store %arg15[%c0_116, %c0_117, %c0_118], %325 {strides = array<i32>} : memref<7x16x128xf32, #tpu.memory_space<vmem>>, vector<1x16x128xf32>,
    %326 = vector.extract_strided_slice %319 {offsets = [8, 0], sizes = [8, 128], strides = [1, 1]} : vector<56x256xf32> to vector<8x128xf32>
    %327 = vector.extract_strided_slice %319 {offsets = [40, 128], sizes = [8, 128], strides = [1, 1]} : vector<56x256xf32> to vector<8x128xf32>
    %328 = tpu.concatenate %326, %327 in 0 : vector<8x128xf32>, vector<8x128xf32> -> vector<16x128xf32>
    %c1_119 = arith.constant 1 : index
    %c0_120 = arith.constant 0 : index
    %c0_121 = arith.constant 0 : index
    %329 = vector.load %arg15[%c1_119, %c0_120, %c0_121] : memref<7x16x128xf32, #tpu.memory_space<vmem>>, vector<1x16x128xf32>
    %330 = vector.shape_cast %329 : vector<1x16x128xf32> to vector<16x128xf32>
    %331 = vector.shape_cast %328 : vector<16x128xf32> to vector<1x16x128xf32>
    tpu.vector_store %arg15[%c1_119, %c0_120, %c0_121], %331 {strides = array<i32>} : memref<7x16x128xf32, #tpu.memory_space<vmem>>, vector<1x16x128xf32>,
    %332 = vector.extract_strided_slice %319 {offsets = [16, 0], sizes = [8, 128], strides = [1, 1]} : vector<56x256xf32> to vector<8x128xf32>
    %333 = vector.extract_strided_slice %319 {offsets = [32, 128], sizes = [8, 128], strides = [1, 1]} : vector<56x256xf32> to vector<8x128xf32>
    %334 = tpu.concatenate %332, %333 in 0 : vector<8x128xf32>, vector<8x128xf32> -> vector<16x128xf32>
    %c2_122 = arith.constant 2 : index
    %c0_123 = arith.constant 0 : index
    %c0_124 = arith.constant 0 : index
    %335 = vector.load %arg15[%c2_122, %c0_123, %c0_124] : memref<7x16x128xf32, #tpu.memory_space<vmem>>, vector<1x16x128xf32>
    %336 = vector.shape_cast %335 : vector<1x16x128xf32> to vector<16x128xf32>
    %337 = vector.shape_cast %334 : vector<16x128xf32> to vector<1x16x128xf32>
    tpu.vector_store %arg15[%c2_122, %c0_123, %c0_124], %337 {strides = array<i32>} : memref<7x16x128xf32, #tpu.memory_space<vmem>>, vector<1x16x128xf32>,
    %338 = vector.extract_strided_slice %319 {offsets = [24, 0], sizes = [8, 128], strides = [1, 1]} : vector<56x256xf32> to vector<8x128xf32>
    %339 = vector.extract_strided_slice %319 {offsets = [24, 128], sizes = [8, 128], strides = [1, 1]} : vector<56x256xf32> to vector<8x128xf32>
    %340 = tpu.concatenate %338, %339 in 0 : vector<8x128xf32>, vector<8x128xf32> -> vector<16x128xf32>
    %c3_125 = arith.constant 3 : index
    %c0_126 = arith.constant 0 : index
    %c0_127 = arith.constant 0 : index
    %341 = vector.load %arg15[%c3_125, %c0_126, %c0_127] : memref<7x16x128xf32, #tpu.memory_space<vmem>>, vector<1x16x128xf32>
    %342 = vector.shape_cast %341 : vector<1x16x128xf32> to vector<16x128xf32>
    %343 = vector.shape_cast %340 : vector<16x128xf32> to vector<1x16x128xf32>
    tpu.vector_store %arg15[%c3_125, %c0_126, %c0_127], %343 {strides = array<i32>} : memref<7x16x128xf32, #tpu.memory_space<vmem>>, vector<1x16x128xf32>,
    %344 = vector.extract_strided_slice %319 {offsets = [32, 0], sizes = [8, 128], strides = [1, 1]} : vector<56x256xf32> to vector<8x128xf32>
    %345 = vector.extract_strided_slice %319 {offsets = [16, 128], sizes = [8, 128], strides = [1, 1]} : vector<56x256xf32> to vector<8x128xf32>
    %346 = tpu.concatenate %344, %345 in 0 : vector<8x128xf32>, vector<8x128xf32> -> vector<16x128xf32>
    %c4_128 = arith.constant 4 : index
    %c0_129 = arith.constant 0 : index
    %c0_130 = arith.constant 0 : index
    %347 = vector.load %arg15[%c4_128, %c0_129, %c0_130] : memref<7x16x128xf32, #tpu.memory_space<vmem>>, vector<1x16x128xf32>
    %348 = vector.shape_cast %347 : vector<1x16x128xf32> to vector<16x128xf32>
    %349 = vector.shape_cast %346 : vector<16x128xf32> to vector<1x16x128xf32>
    tpu.vector_store %arg15[%c4_128, %c0_129, %c0_130], %349 {strides = array<i32>} : memref<7x16x128xf32, #tpu.memory_space<vmem>>, vector<1x16x128xf32>,
    %350 = vector.extract_strided_slice %319 {offsets = [40, 0], sizes = [8, 128], strides = [1, 1]} : vector<56x256xf32> to vector<8x128xf32>
    %351 = vector.extract_strided_slice %319 {offsets = [8, 128], sizes = [8, 128], strides = [1, 1]} : vector<56x256xf32> to vector<8x128xf32>
    %352 = tpu.concatenate %350, %351 in 0 : vector<8x128xf32>, vector<8x128xf32> -> vector<16x128xf32>
    %c5_131 = arith.constant 5 : index
    %c0_132 = arith.constant 0 : index
    %c0_133 = arith.constant 0 : index
    %353 = vector.load %arg15[%c5_131, %c0_132, %c0_133] : memref<7x16x128xf32, #tpu.memory_space<vmem>>, vector<1x16x128xf32>
    %354 = vector.shape_cast %353 : vector<1x16x128xf32> to vector<16x128xf32>
    %355 = vector.shape_cast %352 : vector<16x128xf32> to vector<1x16x128xf32>
    tpu.vector_store %arg15[%c5_131, %c0_132, %c0_133], %355 {strides = array<i32>} : memref<7x16x128xf32, #tpu.memory_space<vmem>>, vector<1x16x128xf32>,
    %356 = vector.extract_strided_slice %319 {offsets = [48, 0], sizes = [8, 128], strides = [1, 1]} : vector<56x256xf32> to vector<8x128xf32>
    %357 = vector.extract_strided_slice %319 {offsets = [0, 128], sizes = [8, 128], strides = [1, 1]} : vector<56x256xf32> to vector<8x128xf32>
    %358 = tpu.concatenate %356, %357 in 0 : vector<8x128xf32>, vector<8x128xf32> -> vector<16x128xf32>
    %c6_134 = arith.constant 6 : index
    %c0_135 = arith.constant 0 : index
    %c0_136 = arith.constant 0 : index
    %359 = vector.load %arg15[%c6_134, %c0_135, %c0_136] : memref<7x16x128xf32, #tpu.memory_space<vmem>>, vector<1x16x128xf32>
    %360 = vector.shape_cast %359 : vector<1x16x128xf32> to vector<16x128xf32>
    %361 = vector.shape_cast %358 : vector<16x128xf32> to vector<1x16x128xf32>
    tpu.vector_store %arg15[%c6_134, %c0_135, %c0_136], %361 {strides = array<i32>} : memref<7x16x128xf32, #tpu.memory_space<vmem>>, vector<1x16x128xf32>,
    %cst_137 = arith.constant 0.000000e+00 : f32
    %362 = vector.broadcast %cst_137 : f32 to vector<16x64xf32>
    %cst_138 = arith.constant 0.000000e+00 : f32
    %363 = vector.broadcast %cst_138 : f32 to vector<16x32xf32>
    %cst_139 = arith.constant dense<0.000000e+00> : vector<16x128xf32>
    %364 = tpu.matmul %362, %313, %cst_139 {dimension_numbers = #tpu.dot_dimension_numbers<[1], [0], [0], [1], [0, 0, 1, 1], [], []>} : vector<16x64xf32>, vector<64x128xf32>, vector<16x128xf32> -> vector<16x128xf32>
    %c0_140 = arith.constant 0 : index
    %c0_141 = arith.constant 0 : index
    %c0_142 = arith.constant 0 : index
    %365 = vector.load %arg15[%c0_140, %c0_141, %c0_142] : memref<7x16x128xf32, #tpu.memory_space<vmem>>, vector<1x16x128xf32>
    %366 = vector.shape_cast %365 : vector<1x16x128xf32> to vector<16x128xf32>
    %367 = arith.addf %364, %366 : vector<16x128xf32>
    %368 = math.tanh %367 : vector<16x128xf32>
    %369 = arith.mulf %368, %88 : vector<16x128xf32>
    %370 = arith.addf %369, %91 : vector<16x128xf32>
    %371 = vector.extract_strided_slice %370 {offsets = [0, 0], sizes = [16, 32], strides = [1, 1]} : vector<16x128xf32> to vector<16x32xf32>
    %372 = vector.extract_strided_slice %370 {offsets = [0, 32], sizes = [16, 32], strides = [1, 1]} : vector<16x128xf32> to vector<16x32xf32>
    %373 = vector.extract_strided_slice %370 {offsets = [0, 64], sizes = [16, 32], strides = [1, 1]} : vector<16x128xf32> to vector<16x32xf32>
    %374 = vector.extract_strided_slice %370 {offsets = [0, 96], sizes = [16, 32], strides = [1, 1]} : vector<16x128xf32> to vector<16x32xf32>
    %375 = arith.mulf %372, %363 : vector<16x32xf32>
    %376 = arith.mulf %371, %373 : vector<16x32xf32>
    %377 = arith.addf %375, %376 : vector<16x32xf32>
    %378 = math.tanh %377 : vector<16x32xf32>
    %379 = arith.mulf %374, %378 : vector<16x32xf32>
    %380 = vector.extract_strided_slice %379 {offsets = [0, 0], sizes = [8, 32], strides = [1, 1]} : vector<16x32xf32> to vector<8x32xf32>
    %c0_143 = arith.constant 0 : index
    %c0_144 = arith.constant 0 : index
    %381 = vector.load %arg16[%c0_143, %c0_144] : memref<56x64xf32, #tpu.memory_space<vmem>>, vector<8x32xf32>
    tpu.vector_store %arg16[%c0_143, %c0_144], %380 {strides = array<i32>} : memref<56x64xf32, #tpu.memory_space<vmem>>, vector<8x32xf32>,
    %382 = vector.extract_strided_slice %379 {offsets = [8, 0], sizes = [8, 32], strides = [1, 1]} : vector<16x32xf32> to vector<8x32xf32>
    %c48_145 = arith.constant 48 : index
    %c32_146 = arith.constant 32 : index
    %383 = vector.load %arg16[%c48_145, %c32_146] : memref<56x64xf32, #tpu.memory_space<vmem>>, vector<8x32xf32>
    tpu.vector_store %arg16[%c48_145, %c32_146], %382 {strides = array<i32>} : memref<56x64xf32, #tpu.memory_space<vmem>>, vector<8x32xf32>,
    %384 = tpu.concatenate %379, %379 in 1 : vector<16x32xf32>, vector<16x32xf32> -> vector<16x64xf32>
    %385 = arith.mulf %384, %102 : vector<16x64xf32>
    %cst_147 = arith.constant dense<0.000000e+00> : vector<16x128xf32>
    %386 = tpu.matmul %385, %313, %cst_147 {dimension_numbers = #tpu.dot_dimension_numbers<[1], [0], [0], [1], [0, 0, 1, 1], [], []>} : vector<16x64xf32>, vector<64x128xf32>, vector<16x128xf32> -> vector<16x128xf32>
    %c1_148 = arith.constant 1 : index
    %c0_149 = arith.constant 0 : index
    %c0_150 = arith.constant 0 : index
    %387 = vector.load %arg15[%c1_148, %c0_149, %c0_150] : memref<7x16x128xf32, #tpu.memory_space<vmem>>, vector<1x16x128xf32>
    %388 = vector.shape_cast %387 : vector<1x16x128xf32> to vector<16x128xf32>
    %389 = arith.addf %386, %388 : vector<16x128xf32>
    %390 = math.tanh %389 : vector<16x128xf32>
    %391 = arith.mulf %390, %88 : vector<16x128xf32>
    %392 = arith.addf %391, %91 : vector<16x128xf32>
    %393 = vector.extract_strided_slice %392 {offsets = [0, 0], sizes = [16, 32], strides = [1, 1]} : vector<16x128xf32> to vector<16x32xf32>
    %394 = vector.extract_strided_slice %392 {offsets = [0, 32], sizes = [16, 32], strides = [1, 1]} : vector<16x128xf32> to vector<16x32xf32>
    %395 = vector.extract_strided_slice %392 {offsets = [0, 64], sizes = [16, 32], strides = [1, 1]} : vector<16x128xf32> to vector<16x32xf32>
    %396 = vector.extract_strided_slice %392 {offsets = [0, 96], sizes = [16, 32], strides = [1, 1]} : vector<16x128xf32> to vector<16x32xf32>
    %397 = arith.mulf %394, %377 : vector<16x32xf32>
    %398 = arith.mulf %393, %395 : vector<16x32xf32>
    %399 = arith.addf %397, %398 : vector<16x32xf32>
    %400 = math.tanh %399 : vector<16x32xf32>
    %401 = arith.mulf %396, %400 : vector<16x32xf32>
    %402 = vector.extract_strided_slice %401 {offsets = [0, 0], sizes = [8, 32], strides = [1, 1]} : vector<16x32xf32> to vector<8x32xf32>
    %c8_151 = arith.constant 8 : index
    %c0_152 = arith.constant 0 : index
    %403 = vector.load %arg16[%c8_151, %c0_152] : memref<56x64xf32, #tpu.memory_space<vmem>>, vector<8x32xf32>
    tpu.vector_store %arg16[%c8_151, %c0_152], %402 {strides = array<i32>} : memref<56x64xf32, #tpu.memory_space<vmem>>, vector<8x32xf32>,
    %404 = vector.extract_strided_slice %401 {offsets = [8, 0], sizes = [8, 32], strides = [1, 1]} : vector<16x32xf32> to vector<8x32xf32>
    %c40_153 = arith.constant 40 : index
    %c32_154 = arith.constant 32 : index
    %405 = vector.load %arg16[%c40_153, %c32_154] : memref<56x64xf32, #tpu.memory_space<vmem>>, vector<8x32xf32>
    tpu.vector_store %arg16[%c40_153, %c32_154], %404 {strides = array<i32>} : memref<56x64xf32, #tpu.memory_space<vmem>>, vector<8x32xf32>,
    %406 = tpu.concatenate %401, %401 in 1 : vector<16x32xf32>, vector<16x32xf32> -> vector<16x64xf32>
    %407 = arith.mulf %406, %102 : vector<16x64xf32>
    %cst_155 = arith.constant dense<0.000000e+00> : vector<16x128xf32>
    %408 = tpu.matmul %407, %313, %cst_155 {dimension_numbers = #tpu.dot_dimension_numbers<[1], [0], [0], [1], [0, 0, 1, 1], [], []>} : vector<16x64xf32>, vector<64x128xf32>, vector<16x128xf32> -> vector<16x128xf32>
    %c2_156 = arith.constant 2 : index
    %c0_157 = arith.constant 0 : index
    %c0_158 = arith.constant 0 : index
    %409 = vector.load %arg15[%c2_156, %c0_157, %c0_158] : memref<7x16x128xf32, #tpu.memory_space<vmem>>, vector<1x16x128xf32>
    %410 = vector.shape_cast %409 : vector<1x16x128xf32> to vector<16x128xf32>
    %411 = arith.addf %408, %410 : vector<16x128xf32>
    %412 = math.tanh %411 : vector<16x128xf32>
    %413 = arith.mulf %412, %88 : vector<16x128xf32>
    %414 = arith.addf %413, %91 : vector<16x128xf32>
    %415 = vector.extract_strided_slice %414 {offsets = [0, 0], sizes = [16, 32], strides = [1, 1]} : vector<16x128xf32> to vector<16x32xf32>
    %416 = vector.extract_strided_slice %414 {offsets = [0, 32], sizes = [16, 32], strides = [1, 1]} : vector<16x128xf32> to vector<16x32xf32>
    %417 = vector.extract_strided_slice %414 {offsets = [0, 64], sizes = [16, 32], strides = [1, 1]} : vector<16x128xf32> to vector<16x32xf32>
    %418 = vector.extract_strided_slice %414 {offsets = [0, 96], sizes = [16, 32], strides = [1, 1]} : vector<16x128xf32> to vector<16x32xf32>
    %419 = arith.mulf %416, %399 : vector<16x32xf32>
    %420 = arith.mulf %415, %417 : vector<16x32xf32>
    %421 = arith.addf %419, %420 : vector<16x32xf32>
    %422 = math.tanh %421 : vector<16x32xf32>
    %423 = arith.mulf %418, %422 : vector<16x32xf32>
    %424 = vector.extract_strided_slice %423 {offsets = [0, 0], sizes = [8, 32], strides = [1, 1]} : vector<16x32xf32> to vector<8x32xf32>
    %c16_159 = arith.constant 16 : index
    %c0_160 = arith.constant 0 : index
    %425 = vector.load %arg16[%c16_159, %c0_160] : memref<56x64xf32, #tpu.memory_space<vmem>>, vector<8x32xf32>
    tpu.vector_store %arg16[%c16_159, %c0_160], %424 {strides = array<i32>} : memref<56x64xf32, #tpu.memory_space<vmem>>, vector<8x32xf32>,
    %426 = vector.extract_strided_slice %423 {offsets = [8, 0], sizes = [8, 32], strides = [1, 1]} : vector<16x32xf32> to vector<8x32xf32>
    %c32_161 = arith.constant 32 : index
    %c32_162 = arith.constant 32 : index
    %427 = vector.load %arg16[%c32_161, %c32_162] : memref<56x64xf32, #tpu.memory_space<vmem>>, vector<8x32xf32>
    tpu.vector_store %arg16[%c32_161, %c32_162], %426 {strides = array<i32>} : memref<56x64xf32, #tpu.memory_space<vmem>>, vector<8x32xf32>,
    %428 = tpu.concatenate %423, %423 in 1 : vector<16x32xf32>, vector<16x32xf32> -> vector<16x64xf32>
    %429 = arith.mulf %428, %102 : vector<16x64xf32>
    %cst_163 = arith.constant dense<0.000000e+00> : vector<16x128xf32>
    %430 = tpu.matmul %429, %313, %cst_163 {dimension_numbers = #tpu.dot_dimension_numbers<[1], [0], [0], [1], [0, 0, 1, 1], [], []>} : vector<16x64xf32>, vector<64x128xf32>, vector<16x128xf32> -> vector<16x128xf32>
    %c3_164 = arith.constant 3 : index
    %c0_165 = arith.constant 0 : index
    %c0_166 = arith.constant 0 : index
    %431 = vector.load %arg15[%c3_164, %c0_165, %c0_166] : memref<7x16x128xf32, #tpu.memory_space<vmem>>, vector<1x16x128xf32>
    %432 = vector.shape_cast %431 : vector<1x16x128xf32> to vector<16x128xf32>
    %433 = arith.addf %430, %432 : vector<16x128xf32>
    %434 = math.tanh %433 : vector<16x128xf32>
    %435 = arith.mulf %434, %88 : vector<16x128xf32>
    %436 = arith.addf %435, %91 : vector<16x128xf32>
    %437 = vector.extract_strided_slice %436 {offsets = [0, 0], sizes = [16, 32], strides = [1, 1]} : vector<16x128xf32> to vector<16x32xf32>
    %438 = vector.extract_strided_slice %436 {offsets = [0, 32], sizes = [16, 32], strides = [1, 1]} : vector<16x128xf32> to vector<16x32xf32>
    %439 = vector.extract_strided_slice %436 {offsets = [0, 64], sizes = [16, 32], strides = [1, 1]} : vector<16x128xf32> to vector<16x32xf32>
    %440 = vector.extract_strided_slice %436 {offsets = [0, 96], sizes = [16, 32], strides = [1, 1]} : vector<16x128xf32> to vector<16x32xf32>
    %441 = arith.mulf %438, %421 : vector<16x32xf32>
    %442 = arith.mulf %437, %439 : vector<16x32xf32>
    %443 = arith.addf %441, %442 : vector<16x32xf32>
    %444 = math.tanh %443 : vector<16x32xf32>
    %445 = arith.mulf %440, %444 : vector<16x32xf32>
    %446 = vector.extract_strided_slice %445 {offsets = [0, 0], sizes = [8, 32], strides = [1, 1]} : vector<16x32xf32> to vector<8x32xf32>
    %c24_167 = arith.constant 24 : index
    %c0_168 = arith.constant 0 : index
    %447 = vector.load %arg16[%c24_167, %c0_168] : memref<56x64xf32, #tpu.memory_space<vmem>>, vector<8x32xf32>
    tpu.vector_store %arg16[%c24_167, %c0_168], %446 {strides = array<i32>} : memref<56x64xf32, #tpu.memory_space<vmem>>, vector<8x32xf32>,
    %448 = vector.extract_strided_slice %445 {offsets = [8, 0], sizes = [8, 32], strides = [1, 1]} : vector<16x32xf32> to vector<8x32xf32>
    %c24_169 = arith.constant 24 : index
    %c32_170 = arith.constant 32 : index
    %449 = vector.load %arg16[%c24_169, %c32_170] : memref<56x64xf32, #tpu.memory_space<vmem>>, vector<8x32xf32>
    tpu.vector_store %arg16[%c24_169, %c32_170], %448 {strides = array<i32>} : memref<56x64xf32, #tpu.memory_space<vmem>>, vector<8x32xf32>,
    %450 = tpu.concatenate %445, %445 in 1 : vector<16x32xf32>, vector<16x32xf32> -> vector<16x64xf32>
    %451 = arith.mulf %450, %102 : vector<16x64xf32>
    %cst_171 = arith.constant dense<0.000000e+00> : vector<16x128xf32>
    %452 = tpu.matmul %451, %313, %cst_171 {dimension_numbers = #tpu.dot_dimension_numbers<[1], [0], [0], [1], [0, 0, 1, 1], [], []>} : vector<16x64xf32>, vector<64x128xf32>, vector<16x128xf32> -> vector<16x128xf32>
    %c4_172 = arith.constant 4 : index
    %c0_173 = arith.constant 0 : index
    %c0_174 = arith.constant 0 : index
    %453 = vector.load %arg15[%c4_172, %c0_173, %c0_174] : memref<7x16x128xf32, #tpu.memory_space<vmem>>, vector<1x16x128xf32>
    %454 = vector.shape_cast %453 : vector<1x16x128xf32> to vector<16x128xf32>
    %455 = arith.addf %452, %454 : vector<16x128xf32>
    %456 = math.tanh %455 : vector<16x128xf32>
    %457 = arith.mulf %456, %88 : vector<16x128xf32>
    %458 = arith.addf %457, %91 : vector<16x128xf32>
    %459 = vector.extract_strided_slice %458 {offsets = [0, 0], sizes = [16, 32], strides = [1, 1]} : vector<16x128xf32> to vector<16x32xf32>
    %460 = vector.extract_strided_slice %458 {offsets = [0, 32], sizes = [16, 32], strides = [1, 1]} : vector<16x128xf32> to vector<16x32xf32>
    %461 = vector.extract_strided_slice %458 {offsets = [0, 64], sizes = [16, 32], strides = [1, 1]} : vector<16x128xf32> to vector<16x32xf32>
    %462 = vector.extract_strided_slice %458 {offsets = [0, 96], sizes = [16, 32], strides = [1, 1]} : vector<16x128xf32> to vector<16x32xf32>
    %463 = arith.mulf %460, %443 : vector<16x32xf32>
    %464 = arith.mulf %459, %461 : vector<16x32xf32>
    %465 = arith.addf %463, %464 : vector<16x32xf32>
    %466 = math.tanh %465 : vector<16x32xf32>
    %467 = arith.mulf %462, %466 : vector<16x32xf32>
    %468 = vector.extract_strided_slice %467 {offsets = [0, 0], sizes = [8, 32], strides = [1, 1]} : vector<16x32xf32> to vector<8x32xf32>
    %c32_175 = arith.constant 32 : index
    %c0_176 = arith.constant 0 : index
    %469 = vector.load %arg16[%c32_175, %c0_176] : memref<56x64xf32, #tpu.memory_space<vmem>>, vector<8x32xf32>
    tpu.vector_store %arg16[%c32_175, %c0_176], %468 {strides = array<i32>} : memref<56x64xf32, #tpu.memory_space<vmem>>, vector<8x32xf32>,
    %470 = vector.extract_strided_slice %467 {offsets = [8, 0], sizes = [8, 32], strides = [1, 1]} : vector<16x32xf32> to vector<8x32xf32>
    %c16_177 = arith.constant 16 : index
    %c32_178 = arith.constant 32 : index
    %471 = vector.load %arg16[%c16_177, %c32_178] : memref<56x64xf32, #tpu.memory_space<vmem>>, vector<8x32xf32>
    tpu.vector_store %arg16[%c16_177, %c32_178], %470 {strides = array<i32>} : memref<56x64xf32, #tpu.memory_space<vmem>>, vector<8x32xf32>,
    %472 = tpu.concatenate %467, %467 in 1 : vector<16x32xf32>, vector<16x32xf32> -> vector<16x64xf32>
    %473 = arith.mulf %472, %102 : vector<16x64xf32>
    %cst_179 = arith.constant dense<0.000000e+00> : vector<16x128xf32>
    %474 = tpu.matmul %473, %313, %cst_179 {dimension_numbers = #tpu.dot_dimension_numbers<[1], [0], [0], [1], [0, 0, 1, 1], [], []>} : vector<16x64xf32>, vector<64x128xf32>, vector<16x128xf32> -> vector<16x128xf32>
    %c5_180 = arith.constant 5 : index
    %c0_181 = arith.constant 0 : index
    %c0_182 = arith.constant 0 : index
    %475 = vector.load %arg15[%c5_180, %c0_181, %c0_182] : memref<7x16x128xf32, #tpu.memory_space<vmem>>, vector<1x16x128xf32>
    %476 = vector.shape_cast %475 : vector<1x16x128xf32> to vector<16x128xf32>
    %477 = arith.addf %474, %476 : vector<16x128xf32>
    %478 = math.tanh %477 : vector<16x128xf32>
    %479 = arith.mulf %478, %88 : vector<16x128xf32>
    %480 = arith.addf %479, %91 : vector<16x128xf32>
    %481 = vector.extract_strided_slice %480 {offsets = [0, 0], sizes = [16, 32], strides = [1, 1]} : vector<16x128xf32> to vector<16x32xf32>
    %482 = vector.extract_strided_slice %480 {offsets = [0, 32], sizes = [16, 32], strides = [1, 1]} : vector<16x128xf32> to vector<16x32xf32>
    %483 = vector.extract_strided_slice %480 {offsets = [0, 64], sizes = [16, 32], strides = [1, 1]} : vector<16x128xf32> to vector<16x32xf32>
    %484 = vector.extract_strided_slice %480 {offsets = [0, 96], sizes = [16, 32], strides = [1, 1]} : vector<16x128xf32> to vector<16x32xf32>
    %485 = arith.mulf %482, %465 : vector<16x32xf32>
    %486 = arith.mulf %481, %483 : vector<16x32xf32>
    %487 = arith.addf %485, %486 : vector<16x32xf32>
    %488 = math.tanh %487 : vector<16x32xf32>
    %489 = arith.mulf %484, %488 : vector<16x32xf32>
    %490 = vector.extract_strided_slice %489 {offsets = [0, 0], sizes = [8, 32], strides = [1, 1]} : vector<16x32xf32> to vector<8x32xf32>
    %c40_183 = arith.constant 40 : index
    %c0_184 = arith.constant 0 : index
    %491 = vector.load %arg16[%c40_183, %c0_184] : memref<56x64xf32, #tpu.memory_space<vmem>>, vector<8x32xf32>
    tpu.vector_store %arg16[%c40_183, %c0_184], %490 {strides = array<i32>} : memref<56x64xf32, #tpu.memory_space<vmem>>, vector<8x32xf32>,
    %492 = vector.extract_strided_slice %489 {offsets = [8, 0], sizes = [8, 32], strides = [1, 1]} : vector<16x32xf32> to vector<8x32xf32>
    %c8_185 = arith.constant 8 : index
    %c32_186 = arith.constant 32 : index
    %493 = vector.load %arg16[%c8_185, %c32_186] : memref<56x64xf32, #tpu.memory_space<vmem>>, vector<8x32xf32>
    tpu.vector_store %arg16[%c8_185, %c32_186], %492 {strides = array<i32>} : memref<56x64xf32, #tpu.memory_space<vmem>>, vector<8x32xf32>,
    %494 = tpu.concatenate %489, %489 in 1 : vector<16x32xf32>, vector<16x32xf32> -> vector<16x64xf32>
    %495 = arith.mulf %494, %102 : vector<16x64xf32>
    %cst_187 = arith.constant dense<0.000000e+00> : vector<16x128xf32>
    %496 = tpu.matmul %495, %313, %cst_187 {dimension_numbers = #tpu.dot_dimension_numbers<[1], [0], [0], [1], [0, 0, 1, 1], [], []>} : vector<16x64xf32>, vector<64x128xf32>, vector<16x128xf32> -> vector<16x128xf32>
    %c6_188 = arith.constant 6 : index
    %c0_189 = arith.constant 0 : index
    %c0_190 = arith.constant 0 : index
    %497 = vector.load %arg15[%c6_188, %c0_189, %c0_190] : memref<7x16x128xf32, #tpu.memory_space<vmem>>, vector<1x16x128xf32>
    %498 = vector.shape_cast %497 : vector<1x16x128xf32> to vector<16x128xf32>
    %499 = arith.addf %496, %498 : vector<16x128xf32>
    %500 = math.tanh %499 : vector<16x128xf32>
    %501 = arith.mulf %500, %88 : vector<16x128xf32>
    %502 = arith.addf %501, %91 : vector<16x128xf32>
    %503 = vector.extract_strided_slice %502 {offsets = [0, 0], sizes = [16, 32], strides = [1, 1]} : vector<16x128xf32> to vector<16x32xf32>
    %504 = vector.extract_strided_slice %502 {offsets = [0, 32], sizes = [16, 32], strides = [1, 1]} : vector<16x128xf32> to vector<16x32xf32>
    %505 = vector.extract_strided_slice %502 {offsets = [0, 64], sizes = [16, 32], strides = [1, 1]} : vector<16x128xf32> to vector<16x32xf32>
    %506 = vector.extract_strided_slice %502 {offsets = [0, 96], sizes = [16, 32], strides = [1, 1]} : vector<16x128xf32> to vector<16x32xf32>
    %507 = arith.mulf %504, %487 : vector<16x32xf32>
    %508 = arith.mulf %503, %505 : vector<16x32xf32>
    %509 = arith.addf %507, %508 : vector<16x32xf32>
    %510 = math.tanh %509 : vector<16x32xf32>
    %511 = arith.mulf %506, %510 : vector<16x32xf32>
    %512 = vector.extract_strided_slice %511 {offsets = [0, 0], sizes = [8, 32], strides = [1, 1]} : vector<16x32xf32> to vector<8x32xf32>
    %c48_191 = arith.constant 48 : index
    %c0_192 = arith.constant 0 : index
    %513 = vector.load %arg16[%c48_191, %c0_192] : memref<56x64xf32, #tpu.memory_space<vmem>>, vector<8x32xf32>
    tpu.vector_store %arg16[%c48_191, %c0_192], %512 {strides = array<i32>} : memref<56x64xf32, #tpu.memory_space<vmem>>, vector<8x32xf32>,
    %514 = vector.extract_strided_slice %511 {offsets = [8, 0], sizes = [8, 32], strides = [1, 1]} : vector<16x32xf32> to vector<8x32xf32>
    %c0_193 = arith.constant 0 : index
    %c32_194 = arith.constant 32 : index
    %515 = vector.load %arg16[%c0_193, %c32_194] : memref<56x64xf32, #tpu.memory_space<vmem>>, vector<8x32xf32>
    tpu.vector_store %arg16[%c0_193, %c32_194], %514 {strides = array<i32>} : memref<56x64xf32, #tpu.memory_space<vmem>>, vector<8x32xf32>,
    %c0_195 = arith.constant 0 : index
    %c0_196 = arith.constant 0 : index
    %516 = vector.load %arg16[%c0_195, %c0_196] : memref<56x64xf32, #tpu.memory_space<vmem>>, vector<56x64xf32>
    %c0_197 = arith.constant 0 : index
    %c0_198 = arith.constant 0 : index
    %517 = vector.load %arg11[%c0_197, %c0_198] : memref<64x24xf32, #tpu.memory_space<vmem>>, vector<64x24xf32>
    %cst_199 = arith.constant dense<0.000000e+00> : vector<56x24xf32>
    %518 = tpu.matmul %516, %517, %cst_199 {dimension_numbers = #tpu.dot_dimension_numbers<[1], [0], [0], [1], [0, 0, 1, 1], [], []>} : vector<56x64xf32>, vector<64x24xf32>, vector<56x24xf32> -> vector<56x24xf32>
    %c0_200 = arith.constant 0 : index
    %c0_201 = arith.constant 0 : index
    %519 = vector.load %arg12[%c0_200, %c0_201] : memref<1x24xf32, #tpu.memory_space<vmem>>, vector<1x24xf32>
    %520 = vector.broadcast %519 : vector<1x24xf32> to vector<56x24xf32>
    %521 = arith.addf %518, %520 : vector<56x24xf32>
    %522 = math.tanh %521 : vector<56x24xf32>
    %c0_202 = arith.constant 0 : index
    %c0_203 = arith.constant 0 : index
    %523 = vector.load %arg13[%c0_202, %c0_203] : memref<1x24xf32, #tpu.memory_space<vmem>>, vector<1x24xf32>
    %524 = vector.broadcast %523 : vector<1x24xf32> to vector<56x24xf32>
    %525 = arith.mulf %522, %524 : vector<56x24xf32>
    %cst_204 = arith.constant dense<0.000000e+00> : vector<56xf32>
    %526 = vector.multi_reduction <add>, %525, %cst_204 [1] : vector<56x24xf32> to vector<56xf32>
    %527 = vector.shape_cast %526 : vector<56xf32> to vector<56x1xf32>
    %528 = vector.extract_strided_slice %527 {offsets = [0, 0], sizes = [8, 1], strides = [1, 1]} : vector<56x1xf32> to vector<8x1xf32>
    %529 = vector.extract_strided_slice %527 {offsets = [8, 0], sizes = [8, 1], strides = [1, 1]} : vector<56x1xf32> to vector<8x1xf32>
    %530 = vector.extract_strided_slice %527 {offsets = [16, 0], sizes = [8, 1], strides = [1, 1]} : vector<56x1xf32> to vector<8x1xf32>
    %531 = vector.extract_strided_slice %527 {offsets = [24, 0], sizes = [8, 1], strides = [1, 1]} : vector<56x1xf32> to vector<8x1xf32>
    %532 = vector.extract_strided_slice %527 {offsets = [32, 0], sizes = [8, 1], strides = [1, 1]} : vector<56x1xf32> to vector<8x1xf32>
    %533 = vector.extract_strided_slice %527 {offsets = [40, 0], sizes = [8, 1], strides = [1, 1]} : vector<56x1xf32> to vector<8x1xf32>
    %534 = vector.extract_strided_slice %527 {offsets = [48, 0], sizes = [8, 1], strides = [1, 1]} : vector<56x1xf32> to vector<8x1xf32>
    %535 = arith.maximumf %528, %529 : vector<8x1xf32>
    %536 = arith.maximumf %535, %530 : vector<8x1xf32>
    %537 = arith.maximumf %536, %531 : vector<8x1xf32>
    %538 = arith.maximumf %537, %532 : vector<8x1xf32>
    %539 = arith.maximumf %538, %533 : vector<8x1xf32>
    %540 = arith.maximumf %539, %534 : vector<8x1xf32>
    %541 = arith.subf %528, %540 : vector<8x1xf32>
    %542 = math.exp %541 : vector<8x1xf32>
    %543 = arith.subf %529, %540 : vector<8x1xf32>
    %544 = math.exp %543 : vector<8x1xf32>
    %545 = arith.subf %530, %540 : vector<8x1xf32>
    %546 = math.exp %545 : vector<8x1xf32>
    %547 = arith.subf %531, %540 : vector<8x1xf32>
    %548 = math.exp %547 : vector<8x1xf32>
    %549 = arith.subf %532, %540 : vector<8x1xf32>
    %550 = math.exp %549 : vector<8x1xf32>
    %551 = arith.subf %533, %540 : vector<8x1xf32>
    %552 = math.exp %551 : vector<8x1xf32>
    %553 = arith.subf %534, %540 : vector<8x1xf32>
    %554 = math.exp %553 : vector<8x1xf32>
    %555 = arith.addf %542, %544 : vector<8x1xf32>
    %556 = arith.addf %555, %546 : vector<8x1xf32>
    %557 = arith.addf %556, %548 : vector<8x1xf32>
    %558 = arith.addf %557, %550 : vector<8x1xf32>
    %559 = arith.addf %558, %552 : vector<8x1xf32>
    %560 = arith.addf %559, %554 : vector<8x1xf32>
    %561 = vector.extract_strided_slice %516 {offsets = [0, 0], sizes = [8, 64], strides = [1, 1]} : vector<56x64xf32> to vector<8x64xf32>
    %562 = vector.broadcast %542 : vector<8x1xf32> to vector<8x64xf32>
    %563 = arith.mulf %562, %561 : vector<8x64xf32>
    %564 = vector.extract_strided_slice %516 {offsets = [8, 0], sizes = [8, 64], strides = [1, 1]} : vector<56x64xf32> to vector<8x64xf32>
    %565 = vector.broadcast %544 : vector<8x1xf32> to vector<8x64xf32>
    %566 = arith.mulf %565, %564 : vector<8x64xf32>
    %567 = arith.addf %563, %566 : vector<8x64xf32>
    %568 = vector.extract_strided_slice %516 {offsets = [16, 0], sizes = [8, 64], strides = [1, 1]} : vector<56x64xf32> to vector<8x64xf32>
    %569 = vector.broadcast %546 : vector<8x1xf32> to vector<8x64xf32>
    %570 = arith.mulf %569, %568 : vector<8x64xf32>
    %571 = arith.addf %567, %570 : vector<8x64xf32>
    %572 = vector.extract_strided_slice %516 {offsets = [24, 0], sizes = [8, 64], strides = [1, 1]} : vector<56x64xf32> to vector<8x64xf32>
    %573 = vector.broadcast %548 : vector<8x1xf32> to vector<8x64xf32>
    %574 = arith.mulf %573, %572 : vector<8x64xf32>
    %575 = arith.addf %571, %574 : vector<8x64xf32>
    %576 = vector.extract_strided_slice %516 {offsets = [32, 0], sizes = [8, 64], strides = [1, 1]} : vector<56x64xf32> to vector<8x64xf32>
    %577 = vector.broadcast %550 : vector<8x1xf32> to vector<8x64xf32>
    %578 = arith.mulf %577, %576 : vector<8x64xf32>
    %579 = arith.addf %575, %578 : vector<8x64xf32>
    %580 = vector.extract_strided_slice %516 {offsets = [40, 0], sizes = [8, 64], strides = [1, 1]} : vector<56x64xf32> to vector<8x64xf32>
    %581 = vector.broadcast %552 : vector<8x1xf32> to vector<8x64xf32>
    %582 = arith.mulf %581, %580 : vector<8x64xf32>
    %583 = arith.addf %579, %582 : vector<8x64xf32>
    %584 = vector.extract_strided_slice %516 {offsets = [48, 0], sizes = [8, 64], strides = [1, 1]} : vector<56x64xf32> to vector<8x64xf32>
    %585 = vector.broadcast %554 : vector<8x1xf32> to vector<8x64xf32>
    %586 = arith.mulf %585, %584 : vector<8x64xf32>
    %587 = arith.addf %583, %586 : vector<8x64xf32>
    %588 = vector.broadcast %560 : vector<8x1xf32> to vector<8x64xf32>
    %589 = arith.divf %587, %588 : vector<8x64xf32>
    %c0_205 = arith.constant 0 : index
    %c0_206 = arith.constant 0 : index
    %590 = vector.load %arg14[%c0_205, %c0_206] : memref<8x64xf32, #tpu.memory_space<vmem>>, vector<8x64xf32>
    tpu.vector_store %arg14[%c0_205, %c0_206], %589 {strides = array<i32>} : memref<8x64xf32, #tpu.memory_space<vmem>>, vector<8x64xf32>,
    return
  }
}

</mosaic_0001>

<bundles_post_ra>
// kernel: cnn_lstm_triplet_forward.1
= control target key start
LH: loop header
LB: loop body
LE: loop exit
PB: predicated region body
PF: predicated region fallthrough
CT: control target
= control target key end

     0   :  { %s4385_s17 = smov 32   ;;  %s4386_s18 = smov 16   ;;  %vm178_vm0 = vcmask 130048   ;;  %vm195_vm1 = vcmask 261120   ;;  %vm225_vm2 = vcmask 392192   ;;  %vm4388_vm3 = vmmov 0   ;;  %s5656_s0 = inlined_call_operand.vmem [shape: f32[144,16], index: 0, kind: input, shape index: {}]   ;;  %s5657_s1 = inlined_call_operand.vmem [shape: f32[48,16], index: 1, kind: input, shape index: {}]   ;;  %s5658_s3 = inlined_call_operand.vmem [shape: f32[48,16], index: 3, kind: input, shape index: {}]   ;;  %s5659_s2 = inlined_call_operand.vmem [shape: f32[1,16], index: 2, kind: input, shape index: {}]   ;;  %s5660_s6 = inlined_call_operand.vmem [shape: f32[64,128], index: 6, kind: input, shape index: {}]   ;;  %s5661_s5 = inlined_call_operand.vmem [shape: f32[16,256], index: 5, kind: input, shape index: {}]   ;;  %s5662_s4 = inlined_call_operand.vmem [shape: f32[1,16], index: 4, kind: input, shape index: {}]   ;;  %s5663_s7 = inlined_call_operand.vmem [shape: f32[1,256], index: 7, kind: input, shape index: {}]   ;;  %s5664_s8 = inlined_call_operand.vmem [shape: f32[64,256], index: 8, kind: input, shape index: {}]   ;;  %s5665_s9 = inlined_call_operand.vmem [shape: f32[64,128], index: 9, kind: input, shape index: {}]   ;;  %s5666_s10 = inlined_call_operand.vmem [shape: f32[1,256], index: 10, kind: input, shape index: {}]   ;;  %s5667_s11 = inlined_call_operand.vmem [shape: f32[64,24], index: 11, kind: input, shape index: {}]   ;;  %s5668_s12 = inlined_call_operand.vmem [shape: f32[1,24], index: 12, kind: input, shape index: {}]   ;;  %s5669_s13 = inlined_call_operand.vmem [shape: f32[1,24], index: 13, kind: input, shape index: {}]   ;;  %s5670_s14 = inlined_call_operand.vmem [shape: f32[8,64], index: 14, kind: output, shape index: {}]  }
   0x1   :  { %v4471_v0 = vld [vmem:[%s5656_s0 + $0x10] sm:$0xff]  ;;  %v4476_v1 = vld [vmem:[%s5656_s0 + $0x8] sm:$0xff]  ;;  %v4485_v2 = vld [vmem:[%s5656_s0 + $0x18] sm:$0xff]  ;;  %vm4392_vm11 = vmmov 1   ;;  %vm900_vm14 = vcmask 523264  }
   0x2   :  { %130 = vrot.lane.b32.xlu1 %v4471_v0, %s4385_s17  ;;  %81 = vrot.lane.b32.xlu0 %v4476_v1, %s4386_s18  ;;  %v4494_v3 = vld [vmem:[%s5656_s0 + $0x20] sm:$0xff]  ;;  %v213_v5 = vld [vmem:[%s5657_s1 + $0x8] sm:$0xff] }
   0x3   :  { %v212_v4 = vld [vmem:[%s5657_s1] sm:$0xff]  ;;  %v214_v7 = vld [vmem:[%s5657_s1 + $0x10] sm:$0xff]  ;;  %v215_v8 = vld [vmem:[%s5657_s1 + $0x18] sm:$0xff] }
   0x4   :  { %v3952_v6 = vpack.c.bf16 %v213_v5, %v212_v4  ;;  %v3956_v9 = vpack.c.bf16 %v215_v8, %v214_v7  ;;  %v216_v10 = vld [vmem:[%s5657_s1 + $0x20] sm:$0xff]  ;;  %v217_v11 = vld [vmem:[%s5657_s1 + $0x28] sm:$0xff]  ;;  %v4530_v14 = vld [vmem:[%s5656_s0 + $0x30] sm:$0xff] }
   0x5   :  { %v4521_v12 = vld [vmem:[%s5656_s0 + $0x28] sm:$0xff]  ;;  %v3960_v13 = vpack.c.bf16 %v217_v11, %v216_v10  ;;  %v4539_v15 = vld [vmem:[%s5656_s0 + $0x38] sm:$0xff]  ;;  %v4548_v16 = vld [vmem:[%s5656_s0 + $0x40] sm:$0xff] }
   0x6   :  { %132 = vrot.lane.b32.xlu1 %v4485_v2, %s4385_s17  ;;  %83 = vrot.lane.b32.xlu0 %v4471_v0, %s4386_s18  ;;  %v4557_v17 = vld [vmem:[%s5656_s0 + $0x48] sm:$0xff]  ;;  %v4566_v18 = vld [vmem:[%s5656_s0 + $0x50] sm:$0xff] }
   0x7   :  { %3953 = vmatprep.subr.bf16.mxu0 %v3952_v6  ;;  %v4575_v19 = vld [vmem:[%s5656_s0 + $0x58] sm:$0xff]  ;;  %v4584_v20 = vld [vmem:[%s5656_s0 + $0x60] sm:$0xff]  ;;  %v4593_v21 = vld [vmem:[%s5656_s0 + $0x68] sm:$0xff] }
   0x8   :  { %3955 = vmatpush3.bf16.msra.mxu0 %v3952_v6  ;;  %v4602_v22 = vld [vmem:[%s5656_s0 + $0x70] sm:$0xff]  ;;  %v4611_v23 = vld [vmem:[%s5656_s0 + $0x78] sm:$0xff]  ;;  %v63_v24 = vld [vmem:[%s5656_s0 + $0x80] sm:$0xff] }
   0x9   :  { %3957 = vmatprep.subr.bf16.mxu0 %v3956_v9  ;;  %v64_v25 = vld [vmem:[%s5656_s0 + $0x88] sm:$0xff]  ;;  %v47_v26 = vld [vmem:[%s5656_s0] sm:$0xff] }
   0xa   :  { %87 = vrot.lane.b32.xlu1 %v4494_v3, %s4386_s18  ;;  %85 = vrot.lane.b32.xlu0 %v4485_v2, %s4386_s18 }
   0xc   :  { %3959 = vmatpush3.bf16.msra.mxu0 %v3956_v9 }
   0xd   :  { %3961 = vmatprep.subr.bf16.mxu0 %v3960_v13 }
   0xe   :  { %136 = vrot.lane.b32.xlu1 %v4521_v12, %s4385_s17  ;;  %134 = vrot.lane.b32.xlu0 %v4494_v3, %s4385_s17 }
  0x10   :  { %3963 = vmatpush3.bf16.msra.mxu0 %v3960_v13 }
  0x12   :  { %91 = vrot.lane.b32.xlu1 %v4530_v14, %s4386_s18  ;;  %89 = vrot.lane.b32.xlu0 %v4521_v12, %s4386_s18 }
  0x16   :  { %140 = vrot.lane.b32.xlu1 %v4539_v15, %s4385_s17  ;;  %138 = vrot.lane.b32.xlu0 %v4530_v14, %s4385_s17 }
  0x1a   :  { %95 = vrot.lane.b32.xlu1 %v4548_v16, %s4386_s18  ;;  %93 = vrot.lane.b32.xlu0 %v4539_v15, %s4386_s18 }
  0x1e   :  { %144 = vrot.lane.b32.xlu1 %v4557_v17, %s4385_s17  ;;  %142 = vrot.lane.b32.xlu0 %v4548_v16, %s4385_s17 }
  0x22   :  { %99 = vrot.lane.b32.xlu1 %v4566_v18, %s4386_s18  ;;  %97 = vrot.lane.b32.xlu0 %v4557_v17, %s4386_s18 }
  0x26   :  { %148 = vrot.lane.b32.xlu1 %v4575_v19, %s4385_s17  ;;  %146 = vrot.lane.b32.xlu0 %v4566_v18, %s4385_s17 }
  0x2a   :  { %103 = vrot.lane.b32.xlu1 %v4584_v20, %s4386_s18  ;;  %101 = vrot.lane.b32.xlu0 %v4575_v19, %s4386_s18 }
  0x2e   :  { %152 = vrot.lane.b32.xlu1 %v4593_v21, %s4385_s17  ;;  %150 = vrot.lane.b32.xlu0 %v4584_v20, %s4385_s17 }
  0x32   :  { %107 = vrot.lane.b32.xlu1 %v4602_v22, %s4386_s18  ;;  %105 = vrot.lane.b32.xlu0 %v4593_v21, %s4386_s18 }
  0x36   :  { %156 = vrot.lane.b32.xlu1 %v4611_v23, %s4385_s17  ;;  %154 = vrot.lane.b32.xlu0 %v4602_v22, %s4385_s17 }
  0x3a   :  { %111 = vrot.lane.b32.xlu1 %v63_v24, %s4386_s18  ;;  %109 = vrot.lane.b32.xlu0 %v4611_v23, %s4386_s18 }
  0x3e   :  { %160 = vrot.lane.b32.xlu1 %v64_v25, %s4385_s17  ;;  %158 = vrot.lane.b32.xlu0 %v63_v24, %s4385_s17 }
  0x74   :  { %v131_v27 = vpop.permute.xlu1 %130  ;;  %v82_v28 = vpop.permute.xlu0 %81 }
  0x75   :  { %v179_v29 = vsel %vm178_vm0, %v47_v26, %v82_v28 }
  0x76   :  { %v196_v30 = vsel %vm195_vm1, %v179_v29, %v131_v27  ;;  %v4387_v29 = vmov 0.0|0.0  }
  0x77   :  { %3592 = vmatprep.mubr.msk.f32.mxu0 %vm225_vm2, %v196_v30  ;;  %3964 = vmatprep.subr.bf16.mxu0 %v4387_v29 }
  0x78   :  { %v133_v31 = vpop.permute.xlu1 %132  ;;  %v84_v32 = vpop.permute.xlu0 %83  ;;  %4229 = vmatprep.subr.bf16.mxu1 %v4387_v29 }
  0x79   :  { %v180_v33 = vsel %vm178_vm0, %v4476_v1, %v84_v32 }
  0x7a   :  { %v197_v34 = vsel %vm195_vm1, %v180_v33, %v133_v31  ;;  %v4707_v31 = vld [vmem:[%s5659_s2] ss:$0 sm:$0xff] }
  0x7b   :  { %3593 = vmatmul.mubr.msk.f32.vlgmr.msra.gmra.mrb[0].mxu0 %vm225_vm2, %v197_v34 }
  0x7c   :  { %v88_v35 = vpop.permute.xlu1 %87  ;;  %v86_v36 = vpop.permute.xlu0 %85 }
  0x7d   :  { %v182_v37 = vsel %vm178_vm0, %v4485_v2, %v88_v35  ;;  %v181_v38 = vsel %vm178_vm0, %v4471_v0, %v86_v36  ;;  %v513_v36 = vld [vmem:[%s5658_s3 + $0x10] sm:$0xff] }
  0x80   :  { %v137_v39 = vpop.permute.xlu1 %136  ;;  %v135_v40 = vpop.permute.xlu0 %134 }
  0x81   :  { %v199_v41 = vsel %vm195_vm1, %v182_v37, %v137_v39  ;;  %v198_v42 = vsel %vm195_vm1, %v181_v38, %v135_v40  ;;  %v514_v37 = vld [vmem:[%s5658_s3 + $0x18] sm:$0xff]  ;;  %v515_v40 = vld [vmem:[%s5658_s3 + $0x20] sm:$0xff] }
  0x82   :  { %3595 = vmatprep.mubr.msk.f32.mxu0 %vm225_vm2, %v198_v42  ;;  %v3968_v39 = vpack.c.bf16 %v514_v37, %v513_v36 }
  0x83   :  { %3596 = vmatmul.mubr.msk.f32.gmra.mrb[2].mxu0 %vm225_vm2, %v199_v41  ;;  %v516_v41 = vld [vmem:[%s5658_s3 + $0x28] sm:$0xff] }
  0x84   :  { %v92_v43 = vpop.permute.xlu1 %91  ;;  %v90_v44 = vpop.permute.xlu0 %89 }
  0x85   :  { %v184_v45 = vsel %vm178_vm0, %v4521_v12, %v92_v43  ;;  %v183_v46 = vsel %vm178_vm0, %v4494_v3, %v90_v44  ;;  %v3971_v43 = vpack.c.bf16 %v516_v41, %v515_v40  ;;  %v4390_v41 = vmov 0.5  }
  0x88   :  { %v141_v47 = vpop.permute.xlu1 %140  ;;  %v139_v48 = vpop.permute.xlu0 %138 }
  0x89   :  { %v201_v49 = vsel %vm195_vm1, %v184_v45, %v141_v47  ;;  %v200_v50 = vsel %vm195_vm1, %v183_v46, %v139_v48 }
  0x8a   :  { %3598 = vmatprep.mubr.msk.f32.mxu0 %vm225_vm2, %v200_v50  ;;  %v4389_v50 = vmov 0.0  }
  0x8b   :  { %3599 = vmatmul.mubr.msk.f32.gmra.mrb[4].mxu0 %vm225_vm2, %v201_v49  ;;  %3640 = vmatprep.mubr.msk.f32.mxu1 %vm4388_vm3, %v4389_v50 }
  0x8c   :  { %v96_v51 = vpop.permute.xlu1 %95  ;;  %v94_v52 = vpop.permute.xlu0 %93 }
  0x8d   :  { %v186_v53 = vsel %vm178_vm0, %v4539_v15, %v96_v51  ;;  %v185_v54 = vsel %vm178_vm0, %v4530_v14, %v94_v52 }
  0x90   :  { %v145_v55 = vpop.permute.xlu1 %144  ;;  %v143_v56 = vpop.permute.xlu0 %142 }
  0x91   :  { %v203_v57 = vsel %vm195_vm1, %v186_v53, %v145_v55  ;;  %v202_v58 = vsel %vm195_vm1, %v185_v54, %v143_v56 }
  0x92   :  { %3601 = vmatprep.mubr.msk.f32.mxu0 %vm225_vm2, %v202_v58 }
  0x93   :  { %3602 = vmatmul.mubr.msk.f32.gmra.mrb[6].mxu0 %vm225_vm2, %v203_v57 }
  0x94   :  { %v100_v59 = vpop.permute.xlu1 %99  ;;  %v98_v60 = vpop.permute.xlu0 %97 }
  0x95   :  { %v188_v61 = vsel %vm178_vm0, %v4557_v17, %v100_v59  ;;  %v187_v62 = vsel %vm178_vm0, %v4548_v16, %v98_v60 }
  0x98   :  { %v149_v63 = vpop.permute.xlu1 %148  ;;  %v147_v0 = vpop.permute.xlu0 %146 }
  0x99   :  { %v205_v1 = vsel %vm195_vm1, %v188_v61, %v149_v63  ;;  %v204_v2 = vsel %vm195_vm1, %v187_v62, %v147_v0 }
  0x9a   :  { %3604 = vmatprep.mubr.msk.f32.mxu0 %vm225_vm2, %v204_v2 }
  0x9b   :  { %3605 = vmatmul.mubr.msk.f32.gmra.mrb[8].mxu0 %vm225_vm2, %v205_v1 }
  0x9c   :  { %v104_v3 = vpop.permute.xlu1 %103  ;;  %v102_v4 = vpop.permute.xlu0 %101 }
  0x9d   :  { %v190_v5 = vsel %vm178_vm0, %v4575_v19, %v104_v3  ;;  %v189_v6 = vsel %vm178_vm0, %v4566_v18, %v102_v4 }
  0xa0   :  { %v153_v7 = vpop.permute.xlu1 %152  ;;  %v151_v8 = vpop.permute.xlu0 %150 }
  0xa1   :  { %v207_v9 = vsel %vm195_vm1, %v190_v5, %v153_v7  ;;  %v206_v10 = vsel %vm195_vm1, %v189_v6, %v151_v8 }
  0xa2   :  { %3607 = vmatprep.mubr.msk.f32.mxu0 %vm225_vm2, %v206_v10 }
  0xa3   :  { %3608 = vmatmul.mubr.msk.f32.gmra.mrb[10].mxu0 %vm225_vm2, %v207_v9 }
  0xa4   :  { %v108_v11 = vpop.permute.xlu1 %107  ;;  %v106_v12 = vpop.permute.xlu0 %105 }
  0xa5   :  { %v192_v13 = vsel %vm178_vm0, %v4593_v21, %v108_v11  ;;  %v191_v14 = vsel %vm178_vm0, %v4584_v20, %v106_v12 }
  0xa8   :  { %v157_v15 = vpop.permute.xlu1 %156  ;;  %v155_v16 = vpop.permute.xlu0 %154 }
  0xa9   :  { %v209_v17 = vsel %vm195_vm1, %v192_v13, %v157_v15  ;;  %v208_v18 = vsel %vm195_vm1, %v191_v14, %v155_v16 }
  0xaa   :  { %3610 = vmatprep.mubr.msk.f32.mxu0 %vm225_vm2, %v208_v18 }
  0xab   :  { %3611 = vmatmul.mubr.msk.f32.gmra.mrb[12].mxu0 %vm225_vm2, %v209_v17 }
  0xac   :  { %v112_v19 = vpop.permute.xlu1 %111  ;;  %v110_v24 = vpop.permute.xlu0 %109 }
  0xad   :  { %v194_v25 = vsel %vm178_vm0, %v4611_v23, %v112_v19  ;;  %v193_v21 = vsel %vm178_vm0, %v4602_v22, %v110_v24  ;;  %v511_v23 = vld [vmem:[%s5658_s3] sm:$0xff]  ;;  %v512_v22 = vld [vmem:[%s5658_s3 + $0x8] sm:$0xff] }
  0xae   :  { %v3965_v30 = vpack.c.bf16 %v512_v22, %v511_v23 }
  0xb0   :  { %v161_v26 = vpop.permute.xlu1 %160  ;;  %v159_v20 = vpop.permute.xlu0 %158  ;;  %3966 = vmatpush3.bf16.msra.mxu0 %v3965_v30  ;;  %4232 = vmatpush3.bf16.msra.mxu1 %v3965_v30 }
  0xb1   :  { %v211_v27 = vsel %vm195_vm1, %v194_v25, %v161_v26  ;;  %v210_v28 = vsel %vm195_vm1, %v193_v21, %v159_v20  ;;  %3967 = vmatprep.subr.bf16.mxu0 %v4387_v29  ;;  %4230 = vmatprep.subr.bf16.mxu1 %v4387_v29 }
  0xb2   :  { %3613 = vmatprep.mubr.msk.f32.mxu0 %vm225_vm2, %v210_v28 }
  0xb3   :  { %3614 = vmatmul.mubr.msk.f32.gmra.mrb[14].mxu0 %vm225_vm2, %v211_v27 }
  0xb4   :  { %3969 = vmatpush3.bf16.msra.mxu0 %v3968_v39  ;;  %4233 = vmatpush3.bf16.msra.mxu1 %v3968_v39  ;;  %v709_v39 = vld [vmem:[%s5660_s6 + $0x8] sm:$0xff] }
  0xb5   :  { %3970 = vmatprep.subr.bf16.mxu0 %v4387_v29  ;;  %4231 = vmatprep.subr.bf16.mxu1 %v4387_v29 }
  0xb6   :  { %3628 = vmatprep.mubr.msk.f32.mxu0 %vm4388_vm3, %v4389_v50 }
  0xb8   :  { %3972 = vmatpush3.bf16.msra.mxu0 %v3971_v43  ;;  %4234 = vmatpush3.bf16.msra.mxu1 %v3971_v43 }
 0x14e   :  { %v3594_v32 = vpop.f32.mrb[0].mxu0 }
 0x14f   :  { %v346_v33 = vadd.f32 %v3594_v32, %v4707_v31  ;;  %v340_v34 = vpop.f32.mrb[1].mxu0 }
 0x150   :  { %v341_v35 = vadd.f32 %v4707_v31, %v340_v34 }
 0x151   :  { %v419_v38 = vmax.f32 %v346_v33, 0.0  ;;  %v652_v33 = vlaneseq }
 0x152   :  { %v418_v42 = vmax.f32 %v341_v35, 0.0 }
 0x153   :  { %v4777_v36 = vand.u32 127, %v652_v33 }
 0x154   :  { %v433_v44 = vmax.f32 %v418_v42, %v419_v38  ;;  %v708_v38 = vld [vmem:[%s5660_s6] sm:$0xff] }
 0x155   :  { %vm679_vm4 = vcmp.ge.s32.totalorder %v4777_v36, 64  ;;  %vm681_vm5 = vcmp.lt.s32.totalorder %v4777_v36, 96  ;;  %vm697_vm10 = vcmp.lt.s32.totalorder %v4777_v36, 32 }
 0x156   :  { %v3597_v45 = vpop.f32.mrb[2].mxu0  ;;  %vm4787_vm6 = vmand %vm679_vm4, %vm681_vm5 }
 0x157   :  { %v356_v46 = vadd.f32 %v3597_v45, %v4707_v31  ;;  %v350_v47 = vpop.f32.mrb[3].mxu0  ;;  %v4794_v42 = vsel %vm4787_vm6, 1.0, %v4390_v41  ;;  %vm698_vm12 = vmxor %vm4392_vm11, %vm697_vm10 }
 0x158   :  { %v351_v48 = vadd.f32 %v4707_v31, %v350_v47  ;;  %v716_v43 = vmul.f32 %v708_v38, %v4794_v42  ;;  %v711_v47 = vld [vmem:[%s5660_s6 + $0x18] sm:$0xff]  ;;  %vm700_vm13 = vmxor %vm698_vm12, %vm4392_vm11 }
 0x159   :  { %v421_v49 = vmax.f32 %v356_v46, 0.0  ;;  %v710_v46 = vld [vmem:[%s5660_s6 + $0x10] sm:$0xff]  ;;  %vm701_vm15 = vmxor %vm697_vm10, %vm4392_vm11 }
 0x15a   :  { %v420_v51 = vmax.f32 %v351_v48, 0.0  ;;  %v718_v48 = vmul.f32 %v710_v46, %v4794_v42 }
 0x15c   :  { %v434_v52 = vmax.f32 %v420_v51, %v421_v49  ;;  %v4731_v53 = vmax.f32 %v433_v44, %v420_v51  ;;  %v717_v44 = vmul.f32 %v709_v39, %v4794_v42  ;;  %v719_v49 = vmul.f32 %v711_v47, %v4794_v42 }
 0x15e   :  { %v3600_v54 = vpop.f32.mrb[4].mxu0  ;;  %454 = vrot.lane.b32.xlu0 %v4731_v53, %s4386_s18  ;;  %v4800_v45 = vpack.c.bf16 %v717_v44, %v716_v43 }
 0x15f   :  { %v366_v55 = vadd.f32 %v3600_v54, %v4707_v31  ;;  %v360_v56 = vpop.f32.mrb[5].mxu0 }
 0x160   :  { %v361_v57 = vadd.f32 %v4707_v31, %v360_v56  ;;  %3978 = vmatprep.subr.bf16.mxu0 %v4800_v45 }
 0x161   :  { %v423_v58 = vmax.f32 %v366_v55, 0.0  ;;  %v4814_v55 = vpack.c.bf16 %v719_v49, %v718_v48 }
 0x162   :  { %v422_v59 = vmax.f32 %v361_v57, 0.0 }
 0x164   :  { %v435_v60 = vmax.f32 %v422_v59, %v423_v58  ;;  %v4737_v61 = vmax.f32 %v434_v52, %v422_v59 }
 0x166   :  { %v3603_v62 = vpop.f32.mrb[6].mxu0  ;;  %476 = vrot.lane.b32.xlu1 %v4737_v61, %s4385_s17  ;;  %456 = vrot.lane.b32.xlu0 %v4737_v61, %s4386_s18 }
 0x167   :  { %v376_v63 = vadd.f32 %v3603_v62, %v4707_v31  ;;  %v370_v0 = vpop.f32.mrb[7].mxu0 }
 0x168   :  { %v371_v1 = vadd.f32 %v4707_v31, %v370_v0 }
 0x169   :  { %v425_v2 = vmax.f32 %v376_v63, 0.0 }
 0x16a   :  { %v424_v3 = vmax.f32 %v371_v1, 0.0 }
 0x16c   :  { %v436_v4 = vmax.f32 %v424_v3, %v425_v2  ;;  %v4745_v5 = vmax.f32 %v435_v60, %v424_v3 }
 0x16e   :  { %v3606_v6 = vpop.f32.mrb[8].mxu0  ;;  %478 = vrot.lane.b32.xlu1 %v4745_v5, %s4385_s17  ;;  %458 = vrot.lane.b32.xlu0 %v4745_v5, %s4386_s18 }
 0x16f   :  { %v386_v7 = vadd.f32 %v3606_v6, %v4707_v31  ;;  %v380_v8 = vpop.f32.mrb[9].mxu0 }
 0x170   :  { %v381_v9 = vadd.f32 %v4707_v31, %v380_v8 }
 0x171   :  { %v427_v10 = vmax.f32 %v386_v7, 0.0 }
 0x172   :  { %v426_v11 = vmax.f32 %v381_v9, 0.0 }
 0x174   :  { %v437_v12 = vmax.f32 %v426_v11, %v427_v10  ;;  %v4753_v13 = vmax.f32 %v436_v4, %v426_v11 }
 0x176   :  { %v3609_v14 = vpop.f32.mrb[10].mxu0  ;;  %480 = vrot.lane.b32.xlu1 %v4753_v13, %s4385_s17  ;;  %460 = vrot.lane.b32.xlu0 %v4753_v13, %s4386_s18 }
 0x177   :  { %v396_v15 = vadd.f32 %v3609_v14, %v4707_v31  ;;  %v390_v16 = vpop.f32.mrb[11].mxu0 }
 0x178   :  { %v391_v17 = vadd.f32 %v4707_v31, %v390_v16  ;;  %v712_v16 = vld [vmem:[%s5660_s6 + $0x20] sm:$0xff] }
 0x179   :  { %v429_v18 = vmax.f32 %v396_v15, 0.0 }
 0x17a   :  { %v428_v19 = vmax.f32 %v391_v17, 0.0  ;;  %v713_v17 = vld [vmem:[%s5660_s6 + $0x28] sm:$0xff] }
 0x17c   :  { %v438_v24 = vmax.f32 %v428_v19, %v429_v18  ;;  %v4761_v25 = vmax.f32 %v437_v12, %v428_v19  ;;  %v720_v18 = vmul.f32 %v712_v16, %v4794_v42  ;;  %v721_v19 = vmul.f32 %v713_v17, %v4794_v42 }
 0x17e   :  { %v3612_v21 = vpop.f32.mrb[12].mxu0  ;;  %482 = vrot.lane.b32.xlu1 %v4761_v25, %s4385_s17  ;;  %462 = vrot.lane.b32.xlu0 %v4761_v25, %s4386_s18 }
 0x17f   :  { %v406_v26 = vadd.f32 %v3612_v21, %v4707_v31  ;;  %v400_v20 = vpop.f32.mrb[13].mxu0  ;;  %v707_v21 = vld [vmem:[%s5661_s5 + $0x18] sm:$0xff] }
 0x180   :  { %v401_v27 = vadd.f32 %v4707_v31, %v400_v20  ;;  %v704_v20 = vld [vmem:[%s5661_s5] sm:$0xff] }
 0x181   :  { %v431_v28 = vmax.f32 %v406_v26, 0.0 }
 0x182   :  { %v430_v23 = vmax.f32 %v401_v27, 0.0  ;;  %v706_v27 = vld [vmem:[%s5661_s5 + $0x10] sm:$0xff] }
 0x184   :  { %v439_v22 = vmax.f32 %v430_v23, %v431_v28  ;;  %v4769_v30 = vmax.f32 %v438_v24, %v430_v23  ;;  %v4865_v24 = vpack.c.bf16 %v721_v19, %v720_v18  ;;  %v714_v28 = vld [vmem:[%s5660_s6 + $0x30] sm:$0xff]  ;;  %v3975_v23 = vpack.c.bf16 %v706_v27, %v704_v20 }
 0x186   :  { %v3615_v32 = vpop.f32.mrb[14].mxu0  ;;  %484 = vrot.lane.b32.xlu1 %v4769_v30, %s4385_s17  ;;  %464 = vrot.lane.b32.xlu0 %v4769_v30, %s4386_s18 }
 0x187   :  { %v410_v34 = vpop.f32.mrb[15].mxu0 }
 0x188   :  { %v411_v35 = vadd.f32 %v4707_v31, %v410_v34 }
 0x18a   :  { %v432_v37 = vmax.f32 %v411_v35, 0.0  ;;  %v3335_v35 = vld [vmem:[%s5662_s4] ss:$0 sm:$0xff] }
 0x18c   :  { %v446_v31 = vmax.f32 %v439_v22, %v432_v37  ;;  %v715_v22 = vld [vmem:[%s5660_s6 + $0x38] sm:$0xff] }
 0x18d   :  { %v723_v32 = vmul.f32 %v715_v22, %v4794_v42  ;;  %v4952_v22 = vsel %vm4787_vm6, 0.0, %v4390_v41 }
 0x18e   :  { %486 = vrot.lane.b32.xlu1 %v446_v31, %s4385_s17  ;;  %466 = vrot.lane.b32.xlu0 %v446_v31, %s4386_s18 }
 0x192   :  { %488 = vrot.lane.b32.xlu1 %v4389_v50, %s4385_s17 }
 0x1d0   :  { %v455_v51 = vpop.permute.xlu0 %454 }
 0x1d1   :  { %v497_v52 = vsel %vm178_vm0, 0.0, %v455_v51 }
 0x1d8   :  { %v477_v54 = vpop.permute.xlu1 %476  ;;  %v457_v57 = vpop.permute.xlu0 %456 }
 0x1d9   :  { %v504_v56 = vsel %vm195_vm1, %v497_v52, %v477_v54  ;;  %v498_v58 = vsel %vm178_vm0, %v4731_v53, %v457_v57 }
 0x1da   :  { %3629 = vmatmul.mubr.msk.f32.vlgmr.msra.gmra.mrb[16].mxu0 %vm225_vm2, %v504_v56 }
 0x1db   :  { %3631 = vmatprep.mubr.msk.f32.mxu0 %vm4388_vm3, %v4389_v50  ;;  %3980 = vmatpush3.bf16.msra.mxu0 %v4800_v45 }
 0x1dc   :  { %3982 = vmatprep.subr.bf16.mxu0 %v4814_v55 }
 0x1df   :  { %3984 = vmatpush3.bf16.msra.mxu0 %v4814_v55 }
 0x1e0   :  { %v479_v59 = vpop.permute.xlu1 %478  ;;  %v459_v62 = vpop.permute.xlu0 %458  ;;  %3986 = vmatprep.subr.bf16.mxu0 %v4865_v24 }
 0x1e1   :  { %v505_v60 = vsel %vm195_vm1, %v498_v58, %v479_v59  ;;  %v499_v63 = vsel %vm178_vm0, %v4737_v61, %v459_v62 }
 0x1e2   :  { %3632 = vmatmul.mubr.msk.f32.gmra.mrb[18].mxu0 %vm225_vm2, %v505_v60 }
 0x1e3   :  { %3634 = vmatprep.mubr.msk.f32.mxu0 %vm4388_vm3, %v4389_v50  ;;  %3988 = vmatpush3.bf16.msra.mxu0 %v4865_v24 }
 0x1e8   :  { %v481_v0 = vpop.permute.xlu1 %480  ;;  %v461_v53 = vpop.permute.xlu0 %460 }
 0x1e9   :  { %v506_v1 = vsel %vm195_vm1, %v499_v63, %v481_v0  ;;  %v500_v2 = vsel %vm178_vm0, %v4745_v5, %v461_v53 }
 0x1ea   :  { %3635 = vmatmul.mubr.msk.f32.gmra.mrb[20].mxu0 %vm225_vm2, %v506_v1 }
 0x1eb   :  { %3637 = vmatprep.mubr.msk.f32.mxu0 %vm4388_vm3, %v4389_v50 }
 0x1f0   :  { %v483_v3 = vpop.permute.xlu1 %482  ;;  %v463_v61 = vpop.permute.xlu0 %462 }
 0x1f1   :  { %v507_v4 = vsel %vm195_vm1, %v500_v2, %v483_v3  ;;  %v501_v6 = vsel %vm178_vm0, %v4753_v13, %v463_v61 }
 0x1f2   :  { %3638 = vmatmul.mubr.msk.f32.gmra.mrb[22].mxu0 %vm225_vm2, %v507_v4 }
 0x1f3   :  { %3665 = vmatprep.mubr.f32.mxu0 %v4389_v50 }
 0x1f8   :  { %v485_v7 = vpop.permute.xlu1 %484  ;;  %v465_v5 = vpop.permute.xlu0 %464 }
 0x1f9   :  { %v508_v8 = vsel %vm195_vm1, %v501_v6, %v485_v7  ;;  %v502_v9 = vsel %vm178_vm0, %v4761_v25, %v465_v5  ;;  %v705_v25 = vld [vmem:[%s5661_s5 + $0x8] sm:$0xff]  ;;  %v4929_v5 = vshrl.u32 %v652_v33, 7 }
 0x1fa   :  { %3641 = vmatmul.mubr.msk.f32.vlgmr.msra.gmra.mrb[0].mxu1 %vm225_vm2, %v508_v8  ;;  %v3973_v26 = vpack.c.bf16 %v707_v21, %v705_v25 }
 0x1fb   :  { %3643 = vmatprep.mubr.msk.f32.mxu1 %vm4388_vm3, %v4389_v50 }
 0x1fc   :  { %3974 = vmatprep.subr.bf16.mxu1 %v3973_v26 }
 0x1fd   :  { %3976 = vmatpush1.bf16.msra.mxu1 %v3975_v23 }
 0x1fe   :  { %4010 = vmatprep.subr.bf16.mxu1 %v4800_v45 }
 0x200   :  { %v487_v10 = vpop.permute.xlu1 %486  ;;  %v467_v12 = vpop.permute.xlu0 %466 }
 0x201   :  { %v509_v11 = vsel %vm195_vm1, %v502_v9, %v487_v10  ;;  %v503_v13 = vsel %vm178_vm0, %v4769_v30, %v467_v12  ;;  %v722_v30 = vmul.f32 %v714_v28, %v4794_v42  ;;  %v728_v9 = vsub.s32 0, %v4929_v5  ;;  %v724_v10 = vld [vmem:[%s5663_s7] sm:$0x3]  ;;  %s4391_s7 = smov 64  }
 0x202   :  { %3644 = vmatmul.mubr.msk.f32.gmra.mrb[2].mxu1 %vm225_vm2, %v509_v11  ;;  %v732_v11 = vsub.s32 1, %v4929_v5 }
 0x203   :  { %3646 = vmatprep.mubr.msk.f32.mxu1 %vm4388_vm3, %v4389_v50  ;;  %v4889_v34 = vpack.c.bf16 %v723_v32, %v722_v30  ;;  %v729_v12 = vrot.slane %v724_v10, %v728_v9 }
 0x204   :  { %v489_v14 = vpop.permute.xlu1 %488 }
 0x205   :  { %v510_v15 = vsel %vm195_vm1, %v503_v13, %v489_v14  ;;  %3990 = vmatprep.subr.bf16.mxu0 %v4889_v34  ;;  %v733_v13 = vrot.slane %v724_v10, %v732_v11 }
 0x206   :  { %3647 = vmatmul.mubr.msk.f32.gmra.mrb[4].mxu1 %vm225_vm2, %v510_v15  ;;  %3992 = vmatpush3.bf16.msra.mxu0 %v4889_v34 }
 0x207   :  { %821 = vmatprep.mubr.f32.mxu1 %v4389_v50  ;;  %3994 = vmatprep.subr.bf16.mxu0 %v4800_v45 }
 0x209   :  { %3666 = vmatmul.mubr.f32.vlgmr.msra.gmra.mrb[24].mxu0 %v4389_v50 }
 0x20a   :  { %3996 = vmatpush3.bf16.msra.mxu0 %v4800_v45 }
 0x20b   :  { %3998 = vmatprep.subr.bf16.mxu0 %v4814_v55 }
 0x20e   :  { %4000 = vmatpush3.bf16.msra.mxu0 %v4814_v55 }
 0x20f   :  { %4002 = vmatprep.subr.bf16.mxu0 %v4865_v24 }
 0x212   :  { %4004 = vmatpush3.bf16.msra.mxu0 %v4865_v24 }
 0x213   :  { %4006 = vmatprep.subr.bf16.mxu0 %v4889_v34 }
 0x216   :  { %4008 = vmatpush3.bf16.msra.mxu0 %v4889_v34 }
 0x217   :  { %4026 = vmatprep.subr.bf16.mxu0 %v4800_v45 }
 0x2ad   :  { %v611_v37 = vpop.f32.mrb[16].mxu0 }
 0x2ae   :  { %v612_v38 = vadd.f32 %v3335_v35, %v611_v37  ;;  %v3630_v39 = vpop.f32.mrb[17].mxu0 }
 0x2b0   :  { %v645_v31 = vmax.f32 %v612_v38, 0.0 }
 0x2b2   :  { %3343 = vmatmul.mubr.msk.f32.vlgmr.msra.gmra.mrb[6].mxu1 %vm178_vm0, %v645_v31 }
 0x2b3   :  { %827 = vmatprep.mubr.f32.mxu1 %v4389_v50  ;;  %4012 = vmatpush3.bf16.msra.mxu1 %v4800_v45 }
 0x2b4   :  { %4014 = vmatprep.subr.bf16.mxu1 %v4814_v55 }
 0x2b5   :  { %v616_v43 = vpop.f32.mrb[18].mxu0 }
 0x2b6   :  { %v617_v44 = vadd.f32 %v3335_v35, %v616_v43  ;;  %v3633_v46 = vpop.f32.mrb[19].mxu0 }
 0x2b7   :  { %4016 = vmatpush3.bf16.msra.mxu1 %v4814_v55  ;;  %v654_v46 = vadd.s32 128, %v4777_v36  ;;  %v5004_v36 = vsel %vm701_vm15, 1.0, %v4389_v50 }
 0x2b8   :  { %v646_v47 = vmax.f32 %v617_v44, 0.0  ;;  %4018 = vmatprep.subr.bf16.mxu1 %v4865_v24 }
 0x2ba   :  { %3344 = vmatmul.mubr.msk.f32.gmra.mrb[8].mxu1 %vm178_vm0, %v646_v47 }
 0x2bb   :  { %833 = vmatprep.mubr.f32.mxu1 %v4389_v50  ;;  %4020 = vmatpush3.bf16.msra.mxu1 %v4865_v24 }
 0x2bc   :  { %4022 = vmatprep.subr.bf16.mxu1 %v4889_v34 }
 0x2bd   :  { %v621_v48 = vpop.f32.mrb[20].mxu0 }
 0x2be   :  { %v622_v49 = vadd.f32 %v3335_v35, %v621_v48  ;;  %v3636_v51 = vpop.f32.mrb[21].mxu0  ;;  %v666_v48 = vand.u32 127, %v654_v46 }
 0x2bf   :  { %4024 = vmatpush3.bf16.msra.mxu1 %v4889_v34 }
 0x2c0   :  { %v647_v52 = vmax.f32 %v622_v49, 0.0  ;;  %4042 = vmatprep.subr.bf16.mxu1 %v4800_v45  ;;  %vm680_vm7 = vcmp.ge.s32.totalorder %v666_v48, 64  ;;  %vm682_vm8 = vcmp.lt.s32.totalorder %v666_v48, 96 }
 0x2c1   :  { %vm684_vm9 = vmand %vm680_vm7, %vm682_vm8 }
 0x2c2   :  { %3345 = vmatmul.mubr.msk.f32.gmra.mrb[10].mxu1 %vm178_vm0, %v647_v52 }
 0x2c3   :  { %839 = vmatprep.mubr.f32.mxu1 %v4389_v50 }
 0x2c5   :  { %v626_v54 = vpop.f32.mrb[22].mxu0 }
 0x2c6   :  { %v627_v56 = vadd.f32 %v3335_v35, %v626_v54  ;;  %v3639_v57 = vpop.f32.mrb[23].mxu0 }
 0x2c8   :  { %v648_v58 = vmax.f32 %v627_v56, 0.0 }
 0x2ca   :  { %3346 = vmatmul.mubr.msk.f32.gmra.mrb[12].mxu1 %vm178_vm0, %v648_v58 }
 0x2cb   :  { %845 = vmatprep.mubr.f32.mxu1 %v4389_v50 }
 0x2cd   :  { %v631_v59 = vpop.f32.mrb[0].mxu1 }
 0x2ce   :  { %v632_v60 = vadd.f32 %v3335_v35, %v631_v59  ;;  %v3642_v62 = vpop.f32.mrb[1].mxu1 }
 0x2d0   :  { %v649_v63 = vmax.f32 %v632_v60, 0.0  ;;  %v4975_v60 = vsel %vm684_vm9, 1.0, %v4390_v41 }
 0x2d2   :  { %3347 = vmatmul.mubr.msk.f32.gmra.mrb[14].mxu1 %vm178_vm0, %v649_v63 }
 0x2d3   :  { %851 = vmatprep.mubr.f32.mxu1 %v4389_v50 }
 0x2d5   :  { %v636_v0 = vpop.f32.mrb[2].mxu1 }
 0x2d6   :  { %v637_v1 = vadd.f32 %v3335_v35, %v636_v0  ;;  %v3645_v53 = vpop.f32.mrb[3].mxu1 }
 0x2d8   :  { %v650_v2 = vmax.f32 %v637_v1, 0.0 }
 0x2d9   :  { %v641_v3 = vpop.f32.mrb[4].mxu1 }
 0x2da   :  { %v642_v4 = vadd.f32 %v3335_v35, %v641_v3  ;;  %v3648_v61 = vpop.f32.mrb[5].mxu1  ;;  %3348 = vmatmul.mubr.msk.f32.gmra.mrb[16].mxu1 %vm178_vm0, %v650_v2 }
 0x2db   :  { %857 = vmatprep.mubr.f32.mxu1 %v4389_v50 }
 0x2dc   :  { %v651_v6 = vmax.f32 %v642_v4, 0.0  ;;  %v3667_v7 = vpop.f32.mrb[24].mxu0 }
 0x2dd   :  { %v969_v8 = vpop.f32.mrb[25].mxu0 }
 0x2de   :  { %3349 = vmatmul.mubr.msk.f32.gmra.mrb[18].mxu1 %vm178_vm0, %v651_v6  ;;  %vm1027_vm0 = vcmask 523520  }
 0x385   :  { %v823_v14 = vpop.f32.mrb[6].mxu1 }
 0x386   :  { %v824_v15 = vadd.f32 %v823_v14, %v729_v12  ;;  %v825_v16 = vpop.f32.mrb[7].mxu1 }
 0x387   :  { %v4940_v17 = vadd.f32 %v825_v16, %v733_v13 }
 0x388   :  { %v864_v33 = vmul.f32 %v824_v15, %v4794_v42 }
 0x38a   :  { %v970_v18 = vadd.f32 %v969_v8, %v864_v33 }
 0x38c   :  { %4243 = vtanh.f32 %v970_v18 }
 0x38d   :  { %v829_v19 = vpop.f32.mrb[8].mxu1 }
 0x38e   :  { %v4943_v25 = vadd.f32 %v829_v19, %v729_v12  ;;  %v831_v21 = vpop.f32.mrb[9].mxu1  ;;  %v4997_v19 = vsel %vm700_vm13, 1.0, %v4389_v50 }
 0x38f   :  { %v4945_v26 = vadd.f32 %v831_v21, %v733_v13 }
 0x390   :  { %v866_v46 = vmul.f32 %v4943_v25, %v4794_v42 }
 0x395   :  { %v835_v20 = vpop.f32.mrb[10].mxu1 }
 0x396   :  { %v4244_v27 = vpop.eup %4243  ;;  %v4947_v28 = vadd.f32 %v835_v20, %v729_v12  ;;  %v837_v23 = vpop.f32.mrb[11].mxu1 }
 0x397   :  { %v4954_v30 = vadd.f32 %v837_v23, %v733_v13  ;;  %v980_v32 = vmul.f32 %v4244_v27, %v4794_v42 }
 0x399   :  { %v982_v35 = vadd.f32 %v980_v32, %v4952_v22 }
 0x39b   :  { %988 = vrot.lane.b32.xlu0 %v982_v35, %s4391_s7  ;;  %v984_v41 = vmul.f32 0.0, %v982_v35 }
 0x39d   :  { %v841_v37 = vpop.f32.mrb[12].mxu1 }
 0x39e   :  { %v4959_v38 = vadd.f32 %v841_v37, %v729_v12  ;;  %v843_v39 = vpop.f32.mrb[13].mxu1 }
 0x39f   :  { %v4961_v31 = vadd.f32 %v843_v39, %v733_v13 }
 0x3a5   :  { %v847_v43 = vpop.f32.mrb[14].mxu1 }
 0x3a6   :  { %v4963_v44 = vadd.f32 %v847_v43, %v729_v12  ;;  %v849_v40 = vpop.f32.mrb[15].mxu1 }
 0x3a7   :  { %v4966_v47 = vadd.f32 %v849_v40, %v733_v13 }
 0x3ad   :  { %v853_v49 = vpop.f32.mrb[16].mxu1 }
 0x3ae   :  { %v4968_v51 = vadd.f32 %v853_v49, %v729_v12  ;;  %v855_v52 = vpop.f32.mrb[17].mxu1 }
 0x3af   :  { %v4970_v54 = vadd.f32 %v855_v52, %v733_v13 }
 0x3b1   :  { %v859_v56 = vpop.f32.mrb[18].mxu1  ;;  %v875_v43 = vmul.f32 %v4970_v54, %v4975_v60 }
 0x3b2   :  { %v4972_v57 = vadd.f32 %v859_v56, %v729_v12  ;;  %v861_v58 = vpop.f32.mrb[19].mxu1 }
 0x3b3   :  { %v862_v59 = vadd.f32 %v861_v58, %v733_v13 }
 0x3b5   :  { %v877_v62 = vmul.f32 %v862_v59, %v4975_v60 }
 0x3b7   :  { %v975_v63 = vadd.f32 %v3667_v7, %v877_v62 }
 0x3b9   :  { %4245 = vtanh.f32 %v975_v63 }
 0x3c3   :  { %v4246_v0 = vpop.eup %4245 }
 0x3c4   :  { %v981_v1 = vmul.f32 %v4246_v0, %v4794_v42 }
 0x3c6   :  { %v983_v53 = vadd.f32 %v981_v1, %v4952_v22 }
 0x3c8   :  { %990 = vrot.lane.b32.xlu1 %v983_v53, %s4391_s7  ;;  %v985_v10 = vmul.f32 0.0, %v983_v53 }
 0x40d   :  { %v989_v2 = vpop.permute.xlu0 %988 }
 0x40e   :  { %v994_v3 = vmul.f32 %v989_v2, %v982_v35 }
 0x410   :  { %998 = vrot.lane.b32.xlu0 %v994_v3, %s4385_s17 }
 0x43a   :  { %v991_v4 = vpop.permute.xlu1 %990 }
 0x43b   :  { %v995_v61 = vmul.f32 %v991_v4, %v983_v53 }
 0x43d   :  { %1000 = vrot.lane.b32.xlu1 %v995_v61, %s4385_s17 }
 0x482   :  { %v999_v6 = vpop.permute.xlu0 %998 }
 0x483   :  { %v4983_v8 = vadd.f32 %v999_v6, %v984_v41 }
 0x485   :  { %4247 = vtanh.f32 %v4983_v8 }
 0x48f   :  { %v4248_v7 = vpop.eup %4247 }
 0x490   :  { %1010 = vrot.lane.b32.xlu0 %v4248_v7, %s4391_s7 }
 0x4af   :  { %v1001_v12 = vpop.permute.xlu1 %1000 }
 0x4b0   :  { %v4987_v13 = vadd.f32 %v1001_v12, %v985_v10 }
 0x4b2   :  { %4249 = vtanh.f32 %v4987_v13 }
 0x4bc   :  { %v4250_v14 = vpop.eup %4249 }
 0x4bd   :  { %1012 = vrot.lane.b32.xlu1 %v4250_v14, %s4391_s7 }
 0x502   :  { %v1011_v15 = vpop.permute.xlu0 %1010 }
 0x503   :  { %v1016_v16 = vmul.f32 %v1011_v15, %v982_v35 }
 0x505   :  { %1032 = vrot.lane.b32.xlu1 %v1016_v16, %s4391_s7  ;;  %1019 = vrot.lane.b32.xlu0 %v1016_v16, %s4385_s17 }
 0x52f   :  { %v1013_v33 = vpop.permute.xlu1 %1012 }
 0x530   :  { %v1017_v18 = vmul.f32 %v1013_v33, %v983_v53 }
 0x532   :  { %1029 = vrot.lane.b32.xlu1 %v1017_v18, %s4385_s17  ;;  %1024 = vrot.lane.b32.xlu0 %v1017_v18, %s4391_s7 }
 0x577   :  { %v1033_v21 = vpop.permute.xlu1 %1032  ;;  %v1020_v20 = vpop.permute.xlu0 %1019 }
 0x578   :  { %1022 = vst.msk [vmem:[#allocation3] sm:$0xff] %vm195_vm1, %v1020_v20  ;;  %v1035_v27 = vsel %vm195_vm1, %v1020_v20, %v1033_v21 }
 0x579   :  { %v1037_v23 = vmul.f32 %v1035_v27, %v4997_v19 }
 0x57b   :  { %3684 = vmatprep.mubr.msk.f32.mxu0 %vm900_vm14, %v1037_v23 }
 0x5a4   :  { %v1030_v32 = vpop.permute.xlu1 %1029  ;;  %v1025_v35 = vpop.permute.xlu0 %1024 }
 0x5a5   :  { %1028 = vst.msk [vmem:[#allocation3 + $0x30] sm:$0xff] %vm1027_vm0, %v1025_v35  ;;  %v1036_v37 = vsel %vm195_vm1, %v1030_v32, %v1025_v35  ;;  %v873_v32 = vmul.f32 %v4966_v47, %v4975_v60 }
 0x5a6   :  { %v1038_v39 = vmul.f32 %v1036_v37, %v5004_v36  ;;  %v868_v37 = vmul.f32 %v4947_v28, %v4794_v42 }
 0x5a8   :  { %3685 = vmatmul.mubr.msk.f32.vlgmr.msra.gmra.mrb[26].mxu0 %vm900_vm14, %v1038_v39 }
 0x5a9   :  { %4028 = vmatpush3.bf16.msra.mxu0 %v4800_v45 }
 0x5aa   :  { %4030 = vmatprep.subr.bf16.mxu0 %v4814_v55 }
 0x5ad   :  { %4032 = vmatpush3.bf16.msra.mxu0 %v4814_v55 }
 0x5ae   :  { %4034 = vmatprep.subr.bf16.mxu0 %v4865_v24 }
 0x5b1   :  { %4036 = vmatpush3.bf16.msra.mxu0 %v4865_v24 }
 0x5b2   :  { %4038 = vmatprep.subr.bf16.mxu0 %v4889_v34 }
 0x5b5   :  { %4040 = vmatpush3.bf16.msra.mxu0 %v4889_v34 }
 0x5b6   :  { %4058 = vmatprep.subr.bf16.mxu0 %v4800_v45 }
 0x67b   :  { %v3686_v40 = vpop.f32.mrb[26].mxu0 }
 0x67c   :  { %v1119_v48 = vadd.f32 %v3686_v40, %v875_v43  ;;  %v1113_v49 = vpop.f32.mrb[27].mxu0 }
 0x67d   :  { %v1114_v52 = vadd.f32 %v1113_v49, %v866_v46 }
 0x67e   :  { %4251 = vtanh.f32 %v1119_v48 }
 0x67f   :  { %4253 = vtanh.f32 %v1114_v52 }
 0x688   :  { %v4252_v56 = vpop.eup %4251 }
 0x689   :  { %v4254_v58 = vpop.eup %4253  ;;  %v1125_v59 = vmul.f32 %v4252_v56, %v4794_v42 }
 0x68a   :  { %v1124_v62 = vmul.f32 %v4254_v58, %v4794_v42 }
 0x68b   :  { %v1127_v63 = vadd.f32 %v1125_v59, %v4952_v22 }
 0x68c   :  { %v1126_v0 = vadd.f32 %v1124_v62, %v4952_v22 }
 0x68d   :  { %1134 = vrot.lane.b32.xlu1 %v1127_v63, %s4391_s7  ;;  %v1129_v2 = vmul.f32 %v1127_v63, %v4987_v13 }
 0x68e   :  { %1132 = vrot.lane.b32.xlu0 %v1126_v0, %s4391_s7  ;;  %v1128_v4 = vmul.f32 %v1126_v0, %v4983_v8 }
 0x6ff   :  { %v1135_v25 = vpop.permute.xlu1 %1134 }
 0x700   :  { %v1139_v54 = vmul.f32 %v1135_v25, %v1127_v63  ;;  %v1133_v1 = vpop.permute.xlu0 %1132 }
 0x701   :  { %v1138_v53 = vmul.f32 %v1133_v1, %v1126_v0 }
 0x702   :  { %1144 = vrot.lane.b32.xlu1 %v1139_v54, %s4385_s17 }
 0x703   :  { %1142 = vrot.lane.b32.xlu0 %v1138_v53, %s4385_s17 }
 0x774   :  { %v1145_v3 = vpop.permute.xlu1 %1144 }
 0x775   :  { %v1149_v61 = vadd.f32 %v1145_v3, %v1129_v2  ;;  %v1143_v41 = vpop.permute.xlu0 %1142 }
 0x776   :  { %v1148_v6 = vadd.f32 %v1143_v41, %v1128_v4 }
 0x777   :  { %4255 = vtanh.f32 %v1149_v61 }
 0x778   :  { %4257 = vtanh.f32 %v1148_v6 }
 0x781   :  { %v4256_v7 = vpop.eup %4255 }
 0x782   :  { %v4258_v10 = vpop.eup %4257  ;;  %1156 = vrot.lane.b32.xlu1 %v4256_v7, %s4391_s7 }
 0x783   :  { %1154 = vrot.lane.b32.xlu0 %v4258_v10, %s4391_s7 }
 0x7f4   :  { %v1157_v15 = vpop.permute.xlu1 %1156 }
 0x7f5   :  { %v1155_v12 = vpop.permute.xlu0 %1154  ;;  %v1161_v13 = vmul.f32 %v1157_v15, %v1127_v63 }
 0x7f6   :  { %v1160_v14 = vmul.f32 %v1155_v12, %v1126_v0 }
 0x7f8   :  { %1175 = vrot.lane.b32.xlu1 %v1160_v14, %s4391_s7  ;;  %1163 = vrot.lane.b32.xlu0 %v1160_v14, %s4385_s17 }
 0x7fc   :  { %1172 = vrot.lane.b32.xlu1 %v1161_v13, %s4385_s17  ;;  %1168 = vrot.lane.b32.xlu0 %v1161_v13, %s4391_s7 }
 0x86a   :  { %v1176_v8 = vpop.permute.xlu1 %1175  ;;  %v1164_v16 = vpop.permute.xlu0 %1163 }
 0x86b   :  { %1166 = vst.msk [vmem:[#allocation3 + $0x8] sm:$0xff] %vm195_vm1, %v1164_v16  ;;  %v1178_v33 = vsel %vm195_vm1, %v1164_v16, %v1176_v8 }
 0x86c   :  { %v1180_v18 = vmul.f32 %v1178_v33, %v4997_v19  ;;  %v871_v33 = vmul.f32 %v4961_v31, %v4975_v60 }
 0x86e   :  { %v1173_v21 = vpop.permute.xlu1 %1172  ;;  %3703 = vmatprep.mubr.msk.f32.mxu1 %vm900_vm14, %v1180_v18  ;;  %v1169_v20 = vpop.permute.xlu0 %1168 }
 0x86f   :  { %1171 = vst.msk [vmem:[#allocation3 + $0x28] sm:$0xff] %vm1027_vm0, %v1169_v20  ;;  %v1179_v27 = vsel %vm195_vm1, %v1173_v21, %v1169_v20  ;;  %v870_v21 = vmul.f32 %v4959_v38, %v4794_v42 }
 0x870   :  { %v1181_v23 = vmul.f32 %v1179_v27, %v5004_v36 }
 0x872   :  { %3704 = vmatmul.mubr.msk.f32.vlgmr.msra.gmra.mrb[20].mxu1 %vm900_vm14, %v1181_v23 }
 0x873   :  { %4044 = vmatpush3.bf16.msra.mxu1 %v4800_v45 }
 0x874   :  { %4046 = vmatprep.subr.bf16.mxu1 %v4814_v55 }
 0x877   :  { %4048 = vmatpush3.bf16.msra.mxu1 %v4814_v55 }
 0x878   :  { %4050 = vmatprep.subr.bf16.mxu1 %v4865_v24 }
 0x87b   :  { %4052 = vmatpush3.bf16.msra.mxu1 %v4865_v24 }
 0x87c   :  { %4054 = vmatprep.subr.bf16.mxu1 %v4889_v34 }
 0x87f   :  { %4056 = vmatpush3.bf16.msra.mxu1 %v4889_v34 }
 0x880   :  { %4074 = vmatprep.subr.bf16.mxu1 %v4800_v45 }
 0x945   :  { %v3705_v35 = vpop.f32.mrb[20].mxu1 }
 0x946   :  { %v1262_v39 = vadd.f32 %v3705_v35, %v873_v32  ;;  %v1256_v43 = vpop.f32.mrb[21].mxu1 }
 0x947   :  { %v1257_v40 = vadd.f32 %v1256_v43, %v868_v37 }
 0x948   :  { %4259 = vtanh.f32 %v1262_v39 }
 0x949   :  { %4261 = vtanh.f32 %v1257_v40 }
 0x952   :  { %v4260_v46 = vpop.eup %4259 }
 0x953   :  { %v4262_v48 = vpop.eup %4261  ;;  %v1268_v49 = vmul.f32 %v4260_v46, %v4794_v42 }
 0x954   :  { %v1267_v52 = vmul.f32 %v4262_v48, %v4794_v42 }
 0x955   :  { %v1270_v56 = vadd.f32 %v1268_v49, %v4952_v22 }
 0x956   :  { %v1269_v58 = vadd.f32 %v1267_v52, %v4952_v22 }
 0x957   :  { %1277 = vrot.lane.b32.xlu1 %v1270_v56, %s4391_s7  ;;  %v1272_v63 = vmul.f32 %v1270_v56, %v1149_v61 }
 0x958   :  { %1275 = vrot.lane.b32.xlu0 %v1269_v58, %s4391_s7  ;;  %v1271_v25 = vmul.f32 %v1269_v58, %v1148_v6 }
 0x9c9   :  { %v1278_v28 = vpop.permute.xlu1 %1277 }
 0x9ca   :  { %v1282_v47 = vmul.f32 %v1278_v28, %v1270_v56  ;;  %v1276_v59 = vpop.permute.xlu0 %1275 }
 0x9cb   :  { %v1281_v62 = vmul.f32 %v1276_v59, %v1269_v58 }
 0x9cc   :  { %1287 = vrot.lane.b32.xlu1 %v1282_v47, %s4385_s17 }
 0x9cd   :  { %1285 = vrot.lane.b32.xlu0 %v1281_v62, %s4385_s17 }
 0xa3e   :  { %v1288_v0 = vpop.permute.xlu1 %1287 }
 0xa3f   :  { %v1292_v54 = vadd.f32 %v1288_v0, %v1272_v63  ;;  %v1286_v1 = vpop.permute.xlu0 %1285 }
 0xa40   :  { %v1291_v53 = vadd.f32 %v1286_v1, %v1271_v25 }
 0xa41   :  { %4263 = vtanh.f32 %v1292_v54 }
 0xa42   :  { %4265 = vtanh.f32 %v1291_v53 }
 0xa4b   :  { %v4264_v2 = vpop.eup %4263 }
 0xa4c   :  { %v4266_v3 = vpop.eup %4265  ;;  %1299 = vrot.lane.b32.xlu1 %v4264_v2, %s4391_s7 }
 0xa4d   :  { %1297 = vrot.lane.b32.xlu0 %v4266_v3, %s4391_s7 }
 0xabe   :  { %v1300_v7 = vpop.permute.xlu1 %1299 }
 0xabf   :  { %v1298_v4 = vpop.permute.xlu0 %1297  ;;  %v1304_v61 = vmul.f32 %v1300_v7, %v1270_v56 }
 0xac0   :  { %v1303_v41 = vmul.f32 %v1298_v4, %v1269_v58 }
 0xac2   :  { %1318 = vrot.lane.b32.xlu1 %v1303_v41, %s4391_s7  ;;  %1306 = vrot.lane.b32.xlu0 %v1303_v41, %s4385_s17 }
 0xac6   :  { %1315 = vrot.lane.b32.xlu1 %v1304_v61, %s4385_s17  ;;  %1311 = vrot.lane.b32.xlu0 %v1304_v61, %s4391_s7 }
 0xb34   :  { %v1319_v6 = vpop.permute.xlu1 %1318  ;;  %v1307_v10 = vpop.permute.xlu0 %1306 }
 0xb35   :  { %1309 = vst.msk [vmem:[#allocation3 + $0x10] sm:$0xff] %vm195_vm1, %v1307_v10  ;;  %v1321_v12 = vsel %vm195_vm1, %v1307_v10, %v1319_v6  ;;  %v869_v6 = vmul.f32 %v4954_v30, %v4975_v60 }
 0xb36   :  { %v1323_v14 = vmul.f32 %v1321_v12, %v4997_v19  ;;  %v872_v12 = vmul.f32 %v4963_v44, %v4794_v42 }
 0xb38   :  { %v1316_v15 = vpop.permute.xlu1 %1315  ;;  %3722 = vmatprep.mubr.msk.f32.mxu0 %vm900_vm14, %v1323_v14  ;;  %v1312_v13 = vpop.permute.xlu0 %1311 }
 0xb39   :  { %1314 = vst.msk [vmem:[#allocation3 + $0x20] sm:$0xff] %vm1027_vm0, %v1312_v13  ;;  %v1322_v8 = vsel %vm195_vm1, %v1316_v15, %v1312_v13 }
 0xb3a   :  { %v1324_v16 = vmul.f32 %v1322_v8, %v5004_v36 }
 0xb3c   :  { %3723 = vmatmul.mubr.msk.f32.vlgmr.msra.gmra.mrb[28].mxu0 %vm900_vm14, %v1324_v16 }
 0xb3d   :  { %4060 = vmatpush3.bf16.msra.mxu0 %v4800_v45 }
 0xb3e   :  { %4062 = vmatprep.subr.bf16.mxu0 %v4814_v55 }
 0xb41   :  { %4064 = vmatpush3.bf16.msra.mxu0 %v4814_v55 }
 0xb42   :  { %4066 = vmatprep.subr.bf16.mxu0 %v4865_v24 }
 0xb45   :  { %4068 = vmatpush3.bf16.msra.mxu0 %v4865_v24 }
 0xb46   :  { %4070 = vmatprep.subr.bf16.mxu0 %v4889_v34 }
 0xb49   :  { %4072 = vmatpush3.bf16.msra.mxu0 %v4889_v34 }
 0xc0f   :  { %v3724_v18 = vpop.f32.mrb[28].mxu0 }
 0xc10   :  { %v1405_v20 = vadd.f32 %v3724_v18, %v871_v33  ;;  %v1399_v27 = vpop.f32.mrb[29].mxu0 }
 0xc11   :  { %v1400_v23 = vadd.f32 %v1399_v27, %v870_v21 }
 0xc12   :  { %4267 = vtanh.f32 %v1405_v20 }
 0xc13   :  { %4269 = vtanh.f32 %v1400_v23 }
 0xc1c   :  { %v4268_v32 = vpop.eup %4267 }
 0xc1d   :  { %v4270_v35 = vpop.eup %4269  ;;  %v1411_v37 = vmul.f32 %v4268_v32, %v4794_v42 }
 0xc1e   :  { %v1410_v39 = vmul.f32 %v4270_v35, %v4794_v42 }
 0xc1f   :  { %v1413_v43 = vadd.f32 %v1411_v37, %v4952_v22 }
 0xc20   :  { %v1412_v40 = vadd.f32 %v1410_v39, %v4952_v22 }
 0xc21   :  { %1420 = vrot.lane.b32.xlu1 %v1413_v43, %s4391_s7  ;;  %v1415_v49 = vmul.f32 %v1413_v43, %v1292_v54 }
 0xc22   :  { %1418 = vrot.lane.b32.xlu0 %v1412_v40, %s4391_s7  ;;  %v1414_v56 = vmul.f32 %v1412_v40, %v1291_v53 }
 0xc93   :  { %v1421_v38 = vpop.permute.xlu1 %1420 }
 0xc94   :  { %v1425_v31 = vmul.f32 %v1421_v38, %v1413_v43  ;;  %v1419_v46 = vpop.permute.xlu0 %1418 }
 0xc95   :  { %v1424_v48 = vmul.f32 %v1419_v46, %v1412_v40 }
 0xc96   :  { %1430 = vrot.lane.b32.xlu1 %v1425_v31, %s4385_s17 }
 0xc97   :  { %1428 = vrot.lane.b32.xlu0 %v1424_v48, %s4385_s17 }
 0xd08   :  { %v1431_v52 = vpop.permute.xlu1 %1430 }
 0xd09   :  { %v1435_v58 = vadd.f32 %v1431_v52, %v1415_v49  ;;  %v1429_v28 = vpop.permute.xlu0 %1428 }
 0xd0a   :  { %v1434_v47 = vadd.f32 %v1429_v28, %v1414_v56 }
 0xd0b   :  { %4271 = vtanh.f32 %v1435_v58 }
 0xd0c   :  { %4273 = vtanh.f32 %v1434_v47 }
 0xd15   :  { %v4272_v59 = vpop.eup %4271 }
 0xd16   :  { %v4274_v62 = vpop.eup %4273  ;;  %1442 = vrot.lane.b32.xlu1 %v4272_v59, %s4391_s7  ;;  %v867_v59 = vmul.f32 %v4945_v26, %v4975_v60 }
 0xd17   :  { %1440 = vrot.lane.b32.xlu0 %v4274_v62, %s4391_s7 }
 0xd88   :  { %v1443_v25 = vpop.permute.xlu1 %1442 }
 0xd89   :  { %v1441_v63 = vpop.permute.xlu0 %1440  ;;  %v1447_v54 = vmul.f32 %v1443_v25, %v1413_v43 }
 0xd8a   :  { %v1446_v0 = vmul.f32 %v1441_v63, %v1412_v40  ;;  %v874_v63 = vmul.f32 %v4968_v51, %v4794_v42 }
 0xd8c   :  { %1461 = vrot.lane.b32.xlu1 %v1446_v0, %s4391_s7  ;;  %1449 = vrot.lane.b32.xlu0 %v1446_v0, %s4385_s17 }
 0xd90   :  { %1458 = vrot.lane.b32.xlu1 %v1447_v54, %s4385_s17  ;;  %1454 = vrot.lane.b32.xlu0 %v1447_v54, %s4391_s7 }
 0xdfe   :  { %v1462_v1 = vpop.permute.xlu1 %1461  ;;  %v1450_v53 = vpop.permute.xlu0 %1449 }
 0xdff   :  { %1452 = vst.msk [vmem:[#allocation3 + $0x18] sm:$0xff] %vm195_vm1, %v1450_v53  ;;  %v1464_v2 = vsel %vm195_vm1, %v1450_v53, %v1462_v1 }
 0xe00   :  { %v1466_v3 = vmul.f32 %v1464_v2, %v4997_v19 }
 0xe02   :  { %v1459_v4 = vpop.permute.xlu1 %1458  ;;  %3741 = vmatprep.mubr.msk.f32.mxu1 %vm900_vm14, %v1466_v3  ;;  %v1455_v41 = vpop.permute.xlu0 %1454 }
 0xe03   :  { %1457 = vst.msk [vmem:[#allocation3 + $0x18] sm:$0xff] %vm1027_vm0, %v1455_v41  ;;  %v1465_v7 = vsel %vm195_vm1, %v1459_v4, %v1455_v41 }
 0xe04   :  { %v1467_v61 = vmul.f32 %v1465_v7, %v5004_v36 }
 0xe06   :  { %3742 = vmatmul.mubr.msk.f32.vlgmr.msra.gmra.mrb[22].mxu1 %vm900_vm14, %v1467_v61 }
 0xe07   :  { %4076 = vmatpush3.bf16.msra.mxu1 %v4800_v45 }
 0xe08   :  { %4078 = vmatprep.subr.bf16.mxu1 %v4814_v55 }
 0xe0b   :  { %4080 = vmatpush3.bf16.msra.mxu1 %v4814_v55 }
 0xe0c   :  { %4082 = vmatprep.subr.bf16.mxu1 %v4865_v24 }
 0xe0f   :  { %4084 = vmatpush3.bf16.msra.mxu1 %v4865_v24 }
 0xe10   :  { %4086 = vmatprep.subr.bf16.mxu1 %v4889_v34 }
 0xe13   :  { %4088 = vmatpush3.bf16.msra.mxu1 %v4889_v34 }
 0xed9   :  { %v3743_v10 = vpop.f32.mrb[22].mxu1 }
 0xeda   :  { %v1548_v45 = vadd.f32 %v3743_v10, %v869_v6  ;;  %v1542_v14 = vpop.f32.mrb[23].mxu1 }
 0xedb   :  { %v1543_v15 = vadd.f32 %v1542_v14, %v872_v12 }
 0xedc   :  { %4275 = vtanh.f32 %v1548_v45 }
 0xedd   :  { %4277 = vtanh.f32 %v1543_v15 }
 0xee6   :  { %v4276_v55 = vpop.eup %4275 }
 0xee7   :  { %v4278_v13 = vpop.eup %4277  ;;  %v1554_v24 = vmul.f32 %v4276_v55, %v4794_v42 }
 0xee8   :  { %v1553_v8 = vmul.f32 %v4278_v13, %v4794_v42 }
 0xee9   :  { %v1556_v34 = vadd.f32 %v1554_v24, %v4952_v22 }
 0xeea   :  { %v1555_v16 = vadd.f32 %v1553_v8, %v4952_v22 }
 0xeeb   :  { %1563 = vrot.lane.b32.xlu1 %v1556_v34, %s4391_s7  ;;  %v1558_v21 = vmul.f32 %v1556_v34, %v1435_v58 }
 0xeec   :  { %1561 = vrot.lane.b32.xlu0 %v1555_v16, %s4391_s7  ;;  %v1557_v27 = vmul.f32 %v1555_v16, %v1434_v47 }
 0xf5d   :  { %v1564_v30 = vpop.permute.xlu1 %1563 }
 0xf5e   :  { %v1568_v44 = vmul.f32 %v1564_v30, %v1556_v34  ;;  %v1562_v33 = vpop.permute.xlu0 %1561 }
 0xf5f   :  { %v1567_v18 = vmul.f32 %v1562_v33, %v1555_v16 }
 0xf60   :  { %1573 = vrot.lane.b32.xlu1 %v1568_v44, %s4385_s17 }
 0xf61   :  { %1571 = vrot.lane.b32.xlu0 %v1567_v18, %s4385_s17 }
 0xfd2   :  { %v1574_v20 = vpop.permute.xlu1 %1573 }
 0xfd3   :  { %v1578_v23 = vadd.f32 %v1574_v20, %v1558_v21  ;;  %v1572_v32 = vpop.permute.xlu0 %1571 }
 0xfd4   :  { %v1577_v35 = vadd.f32 %v1572_v32, %v1557_v27  ;;  %v865_v32 = vmul.f32 %v4940_v17, %v4975_v60 }
 0xfd5   :  { %4279 = vtanh.f32 %v1578_v23 }
 0xfd6   :  { %4281 = vtanh.f32 %v1577_v35 }
 0xfdf   :  { %v4280_v37 = vpop.eup %4279 }
 0xfe0   :  { %v4282_v39 = vpop.eup %4281  ;;  %1585 = vrot.lane.b32.xlu1 %v4280_v37, %s4391_s7  ;;  %v876_v37 = vmul.f32 %v4972_v57, %v4794_v42 }
 0xfe1   :  { %1583 = vrot.lane.b32.xlu0 %v4282_v39, %s4391_s7 }
0x1052   :  { %v1586_v38 = vpop.permute.xlu1 %1585 }
0x1053   :  { %v1584_v43 = vpop.permute.xlu0 %1583  ;;  %v1590_v31 = vmul.f32 %v1586_v38, %v1556_v34 }
0x1054   :  { %v1589_v40 = vmul.f32 %v1584_v43, %v1555_v16 }
0x1056   :  { %1604 = vrot.lane.b32.xlu1 %v1589_v40, %s4391_s7  ;;  %1592 = vrot.lane.b32.xlu0 %v1589_v40, %s4385_s17 }
0x105a   :  { %1601 = vrot.lane.b32.xlu1 %v1590_v31, %s4385_s17  ;;  %1597 = vrot.lane.b32.xlu0 %v1590_v31, %s4391_s7 }
0x10c8   :  { %v1605_v46 = vpop.permute.xlu1 %1604  ;;  %v1593_v48 = vpop.permute.xlu0 %1592 }
0x10c9   :  { %1595 = vst.msk [vmem:[#allocation3 + $0x20] sm:$0xff] %vm195_vm1, %v1593_v48  ;;  %v1607_v49 = vsel %vm195_vm1, %v1593_v48, %v1605_v46 }
0x10ca   :  { %v1609_v52 = vmul.f32 %v1607_v49, %v4997_v19 }
0x10cc   :  { %v1602_v56 = vpop.permute.xlu1 %1601  ;;  %3760 = vmatprep.mubr.msk.f32.mxu0 %vm900_vm14, %v1609_v52  ;;  %v1598_v58 = vpop.permute.xlu0 %1597 }
0x10cd   :  { %1600 = vst.msk [vmem:[#allocation3 + $0x10] sm:$0xff] %vm1027_vm0, %v1598_v58  ;;  %v1608_v28 = vsel %vm195_vm1, %v1602_v56, %v1598_v58 }
0x10ce   :  { %v1610_v47 = vmul.f32 %v1608_v28, %v5004_v36 }
0x10d0   :  { %3761 = vmatmul.mubr.msk.f32.vlgmr.msra.gmra.mrb[30].mxu0 %vm900_vm14, %v1610_v47 }
0x10d1   :  { %2023 = vmatprep.mubr.f32.mxu0 %v4389_v50 }
0x11a3   :  { %v3762_v62 = vpop.f32.mrb[30].mxu0 }
0x11a4   :  { %v1691_v0 = vadd.f32 %v3762_v62, %v867_v59  ;;  %v1685_v25 = vpop.f32.mrb[31].mxu0 }
0x11a5   :  { %v1686_v54 = vadd.f32 %v1685_v25, %v874_v63  ;;  %v1895_v25 = vld [vmem:[%s5664_s8 + $0x8] sm:$0xff] }
0x11a6   :  { %4283 = vtanh.f32 %v1691_v0 }
0x11a7   :  { %4285 = vtanh.f32 %v1686_v54  ;;  %v1897_v54 = vld [vmem:[%s5664_s8 + $0x18] sm:$0xff] }
0x11b0   :  { %v4284_v1 = vpop.eup %4283 }
0x11b1   :  { %v4286_v53 = vpop.eup %4285  ;;  %v1697_v2 = vmul.f32 %v4284_v1, %v4794_v42  ;;  %v1894_v1 = vld [vmem:[%s5664_s8] sm:$0xff] }
0x11b2   :  { %v1696_v3 = vmul.f32 %v4286_v53, %v4794_v42  ;;  %v4089_v53 = vpack.c.bf16 %v1897_v54, %v1895_v25  ;;  %v1889_v25 = vld [vmem:[#allocation3 + $0x10] sm:$0xff]  ;;  %v1890_v54 = vld [vmem:[#allocation3 + $0x18] sm:$0xff] }
0x11b3   :  { %v1699_v4 = vadd.f32 %v1697_v2, %v4952_v22  ;;  %v1896_v2 = vld [vmem:[%s5664_s8 + $0x10] sm:$0xff] }
0x11b4   :  { %v1698_v41 = vadd.f32 %v1696_v3, %v4952_v22  ;;  %v1910_v3 = vld [vmem:[%s5665_s9] sm:$0xff]  ;;  %4090 = vmatprep.subr.bf16.mxu0 %v4089_v53 }
0x11b5   :  { %1706 = vrot.lane.b32.xlu1 %v1699_v4, %s4391_s7  ;;  %v1701_v6 = vmul.f32 %v1699_v4, %v1578_v23 }
0x11b6   :  { %1704 = vrot.lane.b32.xlu0 %v1698_v41, %s4391_s7  ;;  %v1700_v12 = vmul.f32 %v1698_v41, %v1577_v35 }
0x1227   :  { %v1707_v26 = vpop.permute.xlu1 %1706 }
0x1228   :  { %v1711_v51 = vmul.f32 %v1707_v26, %v1699_v4  ;;  %v1705_v7 = vpop.permute.xlu0 %1704  ;;  %v1918_v26 = vmul.f32 %v1910_v3, %v4794_v42 }
0x1229   :  { %v1710_v61 = vmul.f32 %v1705_v7, %v1698_v41  ;;  %v1899_v7 = vld [vmem:[%s5664_s8 + $0x28] sm:$0xff] }
0x122a   :  { %1716 = vrot.lane.b32.xlu1 %v1711_v51, %s4385_s17 }
0x122b   :  { %1714 = vrot.lane.b32.xlu0 %v1710_v61, %s4385_s17  ;;  %v1901_v61 = vld [vmem:[%s5664_s8 + $0x38] sm:$0xff] }
0x129c   :  { %v1717_v10 = vpop.permute.xlu1 %1716 }
0x129d   :  { %v1721_v45 = vadd.f32 %v1717_v10, %v1701_v6  ;;  %v1715_v14 = vpop.permute.xlu0 %1714  ;;  %v1898_v6 = vld [vmem:[%s5664_s8 + $0x20] sm:$0xff]  ;;  %v4093_v10 = vpack.c.bf16 %v1901_v61, %v1899_v7 }
0x129e   :  { %v1720_v15 = vadd.f32 %v1715_v14, %v1700_v12  ;;  %v1900_v12 = vld [vmem:[%s5664_s8 + $0x30] sm:$0xff]  ;;  %v1913_v14 = vld [vmem:[%s5665_s9 + $0x18] sm:$0xff] }
0x129f   :  { %4287 = vtanh.f32 %v1721_v45 }
0x12a0   :  { %4289 = vtanh.f32 %v1720_v15 }
0x12a9   :  { %v4288_v55 = vpop.eup %4287 }
0x12aa   :  { %v4290_v13 = vpop.eup %4289  ;;  %1728 = vrot.lane.b32.xlu1 %v4288_v55, %s4391_s7  ;;  %v4095_v55 = vpack.c.bf16 %v1900_v12, %v1898_v6 }
0x12ab   :  { %1726 = vrot.lane.b32.xlu0 %v4290_v13, %s4391_s7 }
0x131c   :  { %v1729_v34 = vpop.permute.xlu1 %1728 }
0x131d   :  { %v1727_v24 = vpop.permute.xlu0 %1726  ;;  %v1733_v16 = vmul.f32 %v1729_v34, %v1699_v4  ;;  %v1911_v4 = vld [vmem:[%s5665_s9 + $0x8] sm:$0xff] }
0x131e   :  { %v1732_v8 = vmul.f32 %v1727_v24, %v1698_v41  ;;  %v4091_v41 = vpack.c.bf16 %v1896_v2, %v1894_v1  ;;  %v1919_v51 = vmul.f32 %v1911_v4, %v4794_v42  ;;  %v1921_v24 = vmul.f32 %v1913_v14, %v4794_v42  ;;  %v1891_v1 = vld [vmem:[#allocation3 + $0x20] sm:$0xff] }
0x1320   :  { %1747 = vrot.lane.b32.xlu1 %v1732_v8, %s4391_s7  ;;  %1735 = vrot.lane.b32.xlu0 %v1732_v8, %s4385_s17 }
0x1321   :  { %4092 = vmatpush1.bf16.msra.mxu0 %v4091_v41  ;;  %v1926_v41 = vld [vmem:[%s5666_s10] sm:$0x3] }
0x1322   :  { %4094 = vmatprep.subr.bf16.mxu0 %v4093_v10 }
0x1324   :  { %1744 = vrot.lane.b32.xlu1 %v1733_v16, %s4385_s17  ;;  %1740 = vrot.lane.b32.xlu0 %v1733_v16, %s4391_s7 }
0x1325   :  { %4096 = vmatpush1.bf16.msra.mxu0 %v4095_v55 }
0x1392   :  { %v1748_v30 = vpop.permute.xlu1 %1747  ;;  %v1736_v44 = vpop.permute.xlu0 %1735 }
0x1393   :  { %1738 = vst.msk [vmem:[#allocation3 + $0x28] sm:$0xff] %vm195_vm1, %v1736_v44  ;;  %v1750_v33 = vsel %vm195_vm1, %v1736_v44, %v1748_v30  ;;  %v1903_v30 = vld [vmem:[%s5664_s8 + $0x48] sm:$0xff]  ;;  %v1905_v44 = vld [vmem:[%s5664_s8 + $0x58] sm:$0xff] }
0x1394   :  { %v1752_v18 = vmul.f32 %v1750_v33, %v4997_v19  ;;  %v4097_v33 = vpack.c.bf16 %v1905_v44, %v1903_v30 }
0x1396   :  { %v1745_v21 = vpop.permute.xlu1 %1744  ;;  %3779 = vmatprep.mubr.msk.f32.mxu1 %vm900_vm14, %v1752_v18  ;;  %v1741_v20 = vpop.permute.xlu0 %1740  ;;  %v1902_v18 = vld [vmem:[%s5664_s8 + $0x40] sm:$0xff]  ;;  %4098 = vmatprep.subr.bf16.mxu0 %v4097_v33 }
0x1397   :  { %1743 = vst.msk [vmem:[#allocation3 + $0x8] sm:$0xff] %vm1027_vm0, %v1741_v20  ;;  %v1751_v27 = vsel %vm195_vm1, %v1745_v21, %v1741_v20  ;;  %v1904_v21 = vld [vmem:[%s5664_s8 + $0x50] sm:$0xff]  ;;  %v1914_v20 = vld [vmem:[%s5665_s9 + $0x20] sm:$0xff] }
0x1398   :  { %v1753_v23 = vmul.f32 %v1751_v27, %v5004_v36  ;;  %v4099_v27 = vpack.c.bf16 %v1904_v21, %v1902_v18 }
0x139a   :  { %3780 = vmatmul.mubr.msk.f32.vlgmr.msra.gmra.mrb[24].mxu1 %vm900_vm14, %v1753_v23  ;;  %v1915_v23 = vld [vmem:[%s5665_s9 + $0x28] sm:$0xff]  ;;  %4100 = vmatpush1.bf16.msra.mxu0 %v4099_v27 }
0x139b   :  { %3798 = vmatprep.mubr.f32.mxu1 %v4389_v50  ;;  %v1892_v53 = vld [vmem:[#allocation3 + $0x28] sm:$0xff] }
0x146d   :  { %v3781_v35 = vpop.f32.mrb[24].mxu1 }
0x146e   :  { %v1834_v39 = vadd.f32 %v3781_v35, %v865_v32  ;;  %v1828_v43 = vpop.f32.mrb[25].mxu1  ;;  %v1922_v32 = vmul.f32 %v1914_v20, %v4794_v42  ;;  %v1923_v35 = vmul.f32 %v1915_v23, %v4794_v42 }
0x146f   :  { %v1829_v40 = vadd.f32 %v1828_v43, %v876_v37  ;;  %v1907_v37 = vld [vmem:[%s5664_s8 + $0x68] sm:$0xff]  ;;  %v1906_v43 = vld [vmem:[%s5664_s8 + $0x60] sm:$0xff] }
0x1470   :  { %4291 = vtanh.f32 %v1834_v39  ;;  %v1909_v39 = vld [vmem:[%s5664_s8 + $0x78] sm:$0xff] }
0x1471   :  { %4293 = vtanh.f32 %v1829_v40  ;;  %v5275_v40 = vpack.c.bf16 %v1923_v35, %v1922_v32 }
0x147a   :  { %v4292_v38 = vpop.eup %4291 }
0x147b   :  { %v4294_v31 = vpop.eup %4293  ;;  %v1840_v46 = vmul.f32 %v4292_v38, %v4794_v42  ;;  %v4101_v38 = vpack.c.bf16 %v1909_v39, %v1907_v37 }
0x147c   :  { %v1839_v48 = vmul.f32 %v4294_v31, %v4794_v42  ;;  %v1908_v31 = vld [vmem:[%s5664_s8 + $0x70] sm:$0xff] }
0x147d   :  { %v5181_v49 = vadd.f32 %v1840_v46, %v4952_v22  ;;  %v1916_v46 = vld [vmem:[%s5665_s9 + $0x30] sm:$0xff]  ;;  %4102 = vmatprep.subr.bf16.mxu0 %v4101_v38 }
0x147e   :  { %v5184_v17 = vadd.f32 %v1839_v48, %v4952_v22  ;;  %v1917_v48 = vld [vmem:[%s5665_s9 + $0x38] sm:$0xff] }
0x147f   :  { %1849 = vrot.lane.b32.xlu0 %v5181_v49, %s4391_s7  ;;  %v1844_v28 = vmul.f32 %v5181_v49, %v1721_v45  ;;  %v1912_v45 = vld [vmem:[%s5665_s9 + $0x10] sm:$0xff] }
0x1480   :  { %1847 = vrot.lane.b32.xlu1 %v5184_v17, %s4391_s7  ;;  %v1843_v59 = vmul.f32 %v5184_v17, %v1720_v15  ;;  %v5234_v15 = vpack.c.bf16 %v1919_v51, %v1918_v26  ;;  %v1920_v13 = vmul.f32 %v1912_v45, %v4794_v42  ;;  %v1931_v26 = vrot.slane %v1926_v41, %v728_v9 }
0x1481   :  { %v1935_v51 = vrot.slane %v1926_v41, %v732_v11 }
0x1482   :  { %4106 = vmatprep.subr.bf16.mxu1 %v5234_v15  ;;  %v5239_v8 = vpack.c.bf16 %v1921_v24, %v1920_v13 }
0x1483   :  { %4108 = vmatpush3.bf16.msra.mxu1 %v5234_v15 }
0x1484   :  { %4110 = vmatprep.subr.bf16.mxu1 %v5239_v8 }
0x1487   :  { %4112 = vmatpush3.bf16.msra.mxu1 %v5239_v8 }
0x1488   :  { %4114 = vmatprep.subr.bf16.mxu1 %v5275_v40 }
0x148b   :  { %4116 = vmatpush3.bf16.msra.mxu1 %v5275_v40 }
0x14f1   :  { %v1850_v57 = vpop.permute.xlu0 %1849 }
0x14f2   :  { %v1854_v52 = vmul.f32 %v1850_v57, %v5181_v49  ;;  %v1848_v56 = vpop.permute.xlu1 %1847  ;;  %v4103_v57 = vpack.c.bf16 %v1908_v31, %v1906_v43 }
0x14f3   :  { %v1853_v58 = vmul.f32 %v1848_v56, %v5184_v17  ;;  %v1925_v56 = vmul.f32 %v1917_v48, %v4794_v42 }
0x14f4   :  { %1859 = vrot.lane.b32.xlu0 %v1854_v52, %s4385_s17  ;;  %v1924_v52 = vmul.f32 %v1916_v46, %v4794_v42  ;;  %4104 = vmatpush1.bf16.msra.mxu0 %v4103_v57 }
0x14f5   :  { %1857 = vrot.lane.b32.xlu1 %v1853_v58, %s4385_s17  ;;  %4138 = vmatprep.subr.bf16.mxu0 %v5234_v15 }
0x14f6   :  { %v5290_v58 = vpack.c.bf16 %v1925_v56, %v1924_v52 }
0x14f8   :  { %4118 = vmatprep.subr.bf16.mxu1 %v5290_v58 }
0x14f9   :  { %4120 = vmatpush3.bf16.msra.mxu1 %v5290_v58 }
0x14fa   :  { %4122 = vmatprep.subr.bf16.mxu1 %v5234_v15 }
0x14fc   :  { %3799 = vmatmul.mubr.f32.vlgmr.msra.gmra.mrb[26].mxu1 %v4389_v50 }
0x14fd   :  { %4124 = vmatpush3.bf16.msra.mxu1 %v5234_v15 }
0x14fe   :  { %4126 = vmatprep.subr.bf16.mxu1 %v5239_v8 }
0x1501   :  { %4128 = vmatpush3.bf16.msra.mxu1 %v5239_v8 }
0x1502   :  { %4130 = vmatprep.subr.bf16.mxu1 %v5275_v40 }
0x1505   :  { %4132 = vmatpush3.bf16.msra.mxu1 %v5275_v40 }
0x1506   :  { %4134 = vmatprep.subr.bf16.mxu1 %v5290_v58 }
0x1509   :  { %4136 = vmatpush3.bf16.msra.mxu1 %v5290_v58 }
0x150a   :  { %4154 = vmatprep.subr.bf16.mxu1 %v5234_v15 }
0x1566   :  { %v1860_v47 = vpop.permute.xlu0 %1859 }
0x1567   :  { %v1864_v62 = vadd.f32 %v1860_v47, %v1844_v28  ;;  %v1858_v63 = vpop.permute.xlu1 %1857 }
0x1568   :  { %v1863_v0 = vadd.f32 %v1858_v63, %v1843_v59 }
0x1569   :  { %4295 = vtanh.f32 %v1864_v62 }
0x156a   :  { %4297 = vtanh.f32 %v1863_v0  ;;  %v1888_v0 = vld [vmem:[#allocation3 + $0x8] sm:$0xff] }
0x1573   :  { %v4296_v34 = vpop.eup %4295 }
0x1574   :  { %v4298_v16 = vpop.eup %4297  ;;  %1871 = vrot.lane.b32.xlu0 %v4296_v34, %s4391_s7 }
0x1575   :  { %1869 = vrot.lane.b32.xlu1 %v4298_v16, %s4391_s7 }
0x15cf   :  { %v3800_v3 = vpop.f32.mrb[26].mxu1 }
0x15d0   :  { %v2162_v4 = vpop.f32.mrb[27].mxu1 }
0x15e6   :  { %v1872_v28 = vpop.permute.xlu0 %1871 }
0x15e7   :  { %v1876_v47 = vmul.f32 %v1872_v28, %v5181_v49  ;;  %v1870_v59 = vpop.permute.xlu1 %1869 }
0x15e8   :  { %v1875_v62 = vmul.f32 %v1870_v59, %v5184_v17 }
0x15e9   :  { %1883 = vrot.lane.b32.xlu0 %v1876_v47, %s4391_s7 }
0x15ea   :  { %1878 = vrot.lane.b32.xlu1 %v1875_v62, %s4385_s17 }
0x165b   :  { %v1884_v49 = vpop.permute.xlu0 %1883 }
0x165c   :  { %1886 = vst.msk [vmem:[#allocation3] sm:$0xff] %vm1027_vm0, %v1884_v49  ;;  %v1879_v17 = vpop.permute.xlu1 %1878 }
0x165d   :  { %1881 = vst.msk [vmem:[#allocation3 + $0x30] sm:$0xff] %vm195_vm1, %v1879_v17 }
0x1663   :  { %v1887_v63 = vld [vmem:[#allocation3] sm:$0xff] }
0x1664   :  { %3362 = vmatmul.mubr.msk.f32.vlgmr.msra.gmra.mrb[32].mxu0 %vm900_vm14, %v1887_v63  ;;  %v1893_v2 = vld [vmem:[#allocation3 + $0x30] sm:$0xff] }
0x1665   :  { %2029 = vmatprep.mubr.f32.mxu0 %v4389_v50  ;;  %4140 = vmatpush3.bf16.msra.mxu0 %v5234_v15 }
0x1666   :  { %4142 = vmatprep.subr.bf16.mxu0 %v5239_v8 }
0x1668   :  { %3363 = vmatmul.mubr.msk.f32.gmra.mrb[34].mxu0 %vm900_vm14, %v1888_v0 }
0x1669   :  { %2035 = vmatprep.mubr.f32.mxu0 %v4389_v50  ;;  %4144 = vmatpush3.bf16.msra.mxu0 %v5239_v8 }
0x166a   :  { %4146 = vmatprep.subr.bf16.mxu0 %v5275_v40 }
0x166c   :  { %3364 = vmatmul.mubr.msk.f32.gmra.mrb[36].mxu0 %vm900_vm14, %v1889_v25 }
0x166d   :  { %2041 = vmatprep.mubr.f32.mxu0 %v4389_v50  ;;  %4148 = vmatpush3.bf16.msra.mxu0 %v5275_v40 }
0x166e   :  { %4150 = vmatprep.subr.bf16.mxu0 %v5290_v58 }
0x1670   :  { %3365 = vmatmul.mubr.msk.f32.gmra.mrb[38].mxu0 %vm900_vm14, %v1890_v54 }
0x1671   :  { %2047 = vmatprep.mubr.f32.mxu0 %v4389_v50  ;;  %4152 = vmatpush3.bf16.msra.mxu0 %v5290_v58 }
0x1672   :  { %4170 = vmatprep.subr.bf16.mxu0 %v5234_v15 }
0x1674   :  { %3366 = vmatmul.mubr.msk.f32.gmra.mrb[40].mxu0 %vm900_vm14, %v1891_v1 }
0x1675   :  { %2053 = vmatprep.mubr.f32.mxu0 %v4389_v50 }
0x1678   :  { %3367 = vmatmul.mubr.msk.f32.gmra.mrb[42].mxu0 %vm900_vm14, %v1892_v53 }
0x1679   :  { %2059 = vmatprep.mubr.f32.mxu0 %v4389_v50 }
0x167c   :  { %3368 = vmatmul.mubr.msk.f32.gmra.mrb[44].mxu0 %vm900_vm14, %v1893_v2 }
0x1737   :  { %v2025_v7 = vpop.f32.mrb[32].mxu0 }
0x1738   :  { %v2026_v61 = vadd.f32 %v2025_v7, %v1931_v26  ;;  %v2027_v6 = vpop.f32.mrb[33].mxu0 }
0x1739   :  { %v5339_v10 = vadd.f32 %v2027_v6, %v1935_v51 }
0x173a   :  { %v2066_v12 = vmul.f32 %v2026_v61, %v4794_v42 }
0x173b   :  { %v2031_v45 = vpop.f32.mrb[34].mxu0 }
0x173c   :  { %v5342_v14 = vadd.f32 %v2031_v45, %v1931_v26  ;;  %v2163_v55 = vadd.f32 %v2162_v4, %v2066_v12  ;;  %v2033_v13 = vpop.f32.mrb[35].mxu0 }
0x173d   :  { %v5344_v24 = vadd.f32 %v2033_v13, %v1935_v51 }
0x173e   :  { %4299 = vtanh.f32 %v2163_v55 }
0x173f   :  { %v2037_v34 = vpop.f32.mrb[36].mxu0 }
0x1740   :  { %v5346_v9 = vadd.f32 %v2037_v34, %v1931_v26  ;;  %v2039_v5 = vpop.f32.mrb[37].mxu0 }
0x1741   :  { %v5348_v11 = vadd.f32 %v2039_v5, %v1935_v51 }
0x1743   :  { %v2043_v16 = vpop.f32.mrb[38].mxu0 }
0x1744   :  { %v5350_v30 = vadd.f32 %v2043_v16, %v1931_v26  ;;  %v2045_v44 = vpop.f32.mrb[39].mxu0 }
0x1745   :  { %v5352_v33 = vadd.f32 %v2045_v44, %v1935_v51 }
0x1747   :  { %v2049_v18 = vpop.f32.mrb[40].mxu0 }
0x1748   :  { %v4300_v21 = vpop.eup %4299  ;;  %v5354_v20 = vadd.f32 %v2049_v18, %v1931_v26  ;;  %v2051_v27 = vpop.f32.mrb[41].mxu0  ;;  %v2068_v18 = vmul.f32 %v5342_v14, %v4794_v42 }
0x1749   :  { %v5356_v23 = vadd.f32 %v2051_v27, %v1935_v51  ;;  %v2173_v32 = vmul.f32 %v4300_v21, %v4794_v42 }
0x174b   :  { %v2055_v35 = vpop.f32.mrb[42].mxu0  ;;  %v2175_v37 = vadd.f32 %v2173_v32, %v4952_v22 }
0x174c   :  { %v5360_v39 = vadd.f32 %v2055_v35, %v1931_v26  ;;  %v2057_v43 = vpop.f32.mrb[43].mxu0 }
0x174d   :  { %v2058_v38 = vadd.f32 %v2057_v43, %v1935_v51  ;;  %2181 = vrot.lane.b32.xlu0 %v2175_v37, %s4391_s7  ;;  %v2177_v0 = vmul.f32 0.0, %v2175_v37 }
0x174f   :  { %v2061_v31 = vpop.f32.mrb[44].mxu0  ;;  %v2077_v16 = vmul.f32 %v2058_v38, %v4975_v60 }
0x1750   :  { %v5363_v46 = vadd.f32 %v2061_v31, %v1931_v26  ;;  %v2063_v48 = vpop.f32.mrb[45].mxu0 }
0x1751   :  { %v2064_v57 = vadd.f32 %v2063_v48, %v1935_v51 }
0x1753   :  { %v2079_v52 = vmul.f32 %v2064_v57, %v4975_v60 }
0x1755   :  { %v2168_v56 = vadd.f32 %v3800_v3, %v2079_v52 }
0x1757   :  { %4301 = vtanh.f32 %v2168_v56 }
0x1761   :  { %v4302_v28 = vpop.eup %4301 }
0x1762   :  { %v2174_v47 = vmul.f32 %v4302_v28, %v4794_v42 }
0x1764   :  { %v2176_v59 = vadd.f32 %v2174_v47, %v4952_v22 }
0x1766   :  { %2183 = vrot.lane.b32.xlu1 %v2176_v59, %s4391_s7  ;;  %v2178_v53 = vmul.f32 0.0, %v2176_v59 }
0x17bf   :  { %v2182_v62 = vpop.permute.xlu0 %2181 }
0x17c0   :  { %v2187_v49 = vmul.f32 %v2182_v62, %v2175_v37 }
0x17c2   :  { %2191 = vrot.lane.b32.xlu0 %v2187_v49, %s4385_s17 }
0x17d8   :  { %v2184_v17 = vpop.permute.xlu1 %2183 }
0x17d9   :  { %v2188_v63 = vmul.f32 %v2184_v17, %v2176_v59 }
0x17db   :  { %2193 = vrot.lane.b32.xlu1 %v2188_v63, %s4385_s17 }
0x1834   :  { %v2192_v25 = vpop.permute.xlu0 %2191 }
0x1835   :  { %v2197_v54 = vadd.f32 %v2192_v25, %v2177_v0 }
0x1837   :  { %4303 = vtanh.f32 %v2197_v54 }
0x1841   :  { %v4304_v1 = vpop.eup %4303 }
0x1842   :  { %2203 = vrot.lane.b32.xlu0 %v4304_v1, %s4391_s7 }
0x184d   :  { %v2194_v2 = vpop.permute.xlu1 %2193 }
0x184e   :  { %v2198_v3 = vadd.f32 %v2194_v2, %v2178_v53 }
0x1850   :  { %4305 = vtanh.f32 %v2198_v3 }
0x185a   :  { %v4306_v4 = vpop.eup %4305 }
0x185b   :  { %2205 = vrot.lane.b32.xlu1 %v4306_v4, %s4391_s7 }
0x18b4   :  { %v2204_v41 = vpop.permute.xlu0 %2203 }
0x18b5   :  { %v2209_v26 = vmul.f32 %v2204_v41, %v2175_v37 }
0x18b7   :  { %2212 = vrot.lane.b32.xlu0 %v2209_v26, %s4385_s17  ;;  %2224 = vrot.lane.b32.xlu1 %v2209_v26, %s4391_s7 }
0x18cd   :  { %v2206_v51 = vpop.permute.xlu1 %2205 }
0x18ce   :  { %v2210_v7 = vmul.f32 %v2206_v51, %v2176_v59 }
0x18d0   :  { %2221 = vrot.lane.b32.xlu1 %v2210_v7, %s4385_s17  ;;  %2217 = vrot.lane.b32.xlu0 %v2210_v7, %s4391_s7 }
0x1929   :  { %v2213_v61 = vpop.permute.xlu0 %2212  ;;  %v2225_v6 = vpop.permute.xlu1 %2224 }
0x192a   :  { %2215 = vst.msk [vmem:[#allocation3] sm:$0xff] %vm195_vm1, %v2213_v61  ;;  %v2227_v12 = vsel %vm195_vm1, %v2213_v61, %v2225_v6  ;;  %v2075_v6 = vmul.f32 %v5356_v23, %v4975_v60 }
0x192b   :  { %v2229_v45 = vmul.f32 %v2227_v12, %v4997_v19 }
0x192d   :  { %3817 = vmatprep.mubr.msk.f32.mxu1 %vm900_vm14, %v2229_v45  ;;  %v2070_v45 = vmul.f32 %v5346_v9, %v4794_v42 }
0x1942   :  { %v2218_v55 = vpop.permute.xlu0 %2217  ;;  %v2222_v13 = vpop.permute.xlu1 %2221 }
0x1943   :  { %2220 = vst.msk [vmem:[#allocation3 + $0x30] sm:$0xff] %vm1027_vm0, %v2218_v55  ;;  %v2228_v34 = vsel %vm195_vm1, %v2222_v13, %v2218_v55 }
0x1944   :  { %v2230_v5 = vmul.f32 %v2228_v34, %v5004_v36 }
0x1946   :  { %3818 = vmatmul.mubr.msk.f32.vlgmr.msra.gmra.mrb[28].mxu1 %vm900_vm14, %v2230_v5 }
0x1947   :  { %4156 = vmatpush3.bf16.msra.mxu1 %v5234_v15 }
0x1948   :  { %4158 = vmatprep.subr.bf16.mxu1 %v5239_v8 }
0x194b   :  { %4160 = vmatpush3.bf16.msra.mxu1 %v5239_v8 }
0x194c   :  { %4162 = vmatprep.subr.bf16.mxu1 %v5275_v40 }
0x194f   :  { %4164 = vmatpush3.bf16.msra.mxu1 %v5275_v40 }
0x1950   :  { %4166 = vmatprep.subr.bf16.mxu1 %v5290_v58 }
0x1953   :  { %4168 = vmatpush3.bf16.msra.mxu1 %v5290_v58 }
0x1954   :  { %4186 = vmatprep.subr.bf16.mxu1 %v5234_v15 }
0x1a19   :  { %v3819_v44 = vpop.f32.mrb[28].mxu1 }
0x1a1a   :  { %v2311_v21 = vadd.f32 %v3819_v44, %v2077_v16  ;;  %v2305_v27 = vpop.f32.mrb[29].mxu1 }
0x1a1b   :  { %v2306_v32 = vadd.f32 %v2305_v27, %v2068_v18 }
0x1a1c   :  { %4307 = vtanh.f32 %v2311_v21 }
0x1a1d   :  { %4309 = vtanh.f32 %v2306_v32 }
0x1a26   :  { %v4308_v35 = vpop.eup %4307 }
0x1a27   :  { %v4310_v37 = vpop.eup %4309  ;;  %v2317_v43 = vmul.f32 %v4308_v35, %v4794_v42 }
0x1a28   :  { %v2316_v31 = vmul.f32 %v4310_v37, %v4794_v42 }
0x1a29   :  { %v2319_v48 = vadd.f32 %v2317_v43, %v4952_v22 }
0x1a2a   :  { %v2318_v57 = vadd.f32 %v2316_v31, %v4952_v22 }
0x1a2b   :  { %2326 = vrot.lane.b32.xlu1 %v2319_v48, %s4391_s7  ;;  %v2321_v28 = vmul.f32 %v2319_v48, %v2198_v3 }
0x1a2c   :  { %2324 = vrot.lane.b32.xlu0 %v2318_v57, %s4391_s7  ;;  %v2320_v59 = vmul.f32 %v2318_v57, %v2197_v54 }
0x1a9d   :  { %v2327_v14 = vpop.permute.xlu1 %2326 }
0x1a9e   :  { %v2331_v38 = vmul.f32 %v2327_v14, %v2319_v48  ;;  %v2325_v52 = vpop.permute.xlu0 %2324 }
0x1a9f   :  { %v2330_v56 = vmul.f32 %v2325_v52, %v2318_v57 }
0x1aa0   :  { %2336 = vrot.lane.b32.xlu1 %v2331_v38, %s4385_s17 }
0x1aa1   :  { %2334 = vrot.lane.b32.xlu0 %v2330_v56, %s4385_s17 }
0x1b12   :  { %v2337_v47 = vpop.permute.xlu1 %2336 }
0x1b13   :  { %v2341_v62 = vadd.f32 %v2337_v47, %v2321_v28  ;;  %v2335_v49 = vpop.permute.xlu0 %2334 }
0x1b14   :  { %v2340_v17 = vadd.f32 %v2335_v49, %v2320_v59 }
0x1b15   :  { %4311 = vtanh.f32 %v2341_v62 }
0x1b16   :  { %4313 = vtanh.f32 %v2340_v17 }
0x1b1f   :  { %v4312_v63 = vpop.eup %4311 }
0x1b20   :  { %v4314_v0 = vpop.eup %4313  ;;  %2348 = vrot.lane.b32.xlu1 %v4312_v63, %s4391_s7 }
0x1b21   :  { %2346 = vrot.lane.b32.xlu0 %v4314_v0, %s4391_s7 }
0x1b92   :  { %v2349_v53 = vpop.permute.xlu1 %2348 }
0x1b93   :  { %v2347_v25 = vpop.permute.xlu0 %2346  ;;  %v2353_v2 = vmul.f32 %v2349_v53, %v2319_v48 }
0x1b94   :  { %v2352_v1 = vmul.f32 %v2347_v25, %v2318_v57 }
0x1b96   :  { %2367 = vrot.lane.b32.xlu1 %v2352_v1, %s4391_s7  ;;  %2355 = vrot.lane.b32.xlu0 %v2352_v1, %s4385_s17 }
0x1b9a   :  { %2364 = vrot.lane.b32.xlu1 %v2353_v2, %s4385_s17  ;;  %2360 = vrot.lane.b32.xlu0 %v2353_v2, %s4391_s7  ;;  %v2073_v2 = vmul.f32 %v5352_v33, %v4975_v60 }
0x1c08   :  { %v2368_v54 = vpop.permute.xlu1 %2367  ;;  %v2356_v3 = vpop.permute.xlu0 %2355 }
0x1c09   :  { %2358 = vst.msk [vmem:[#allocation3 + $0x8] sm:$0xff] %vm195_vm1, %v2356_v3  ;;  %v2370_v4 = vsel %vm195_vm1, %v2356_v3, %v2368_v54  ;;  %v2072_v3 = vmul.f32 %v5350_v30, %v4794_v42 }
0x1c0a   :  { %v2372_v41 = vmul.f32 %v2370_v4, %v4997_v19 }
0x1c0c   :  { %v2365_v26 = vpop.permute.xlu1 %2364  ;;  %3836 = vmatprep.mubr.msk.f32.mxu0 %vm900_vm14, %v2372_v41  ;;  %v2361_v51 = vpop.permute.xlu0 %2360 }
0x1c0d   :  { %2363 = vst.msk [vmem:[#allocation3 + $0x28] sm:$0xff] %vm1027_vm0, %v2361_v51  ;;  %v2371_v7 = vsel %vm195_vm1, %v2365_v26, %v2361_v51 }
0x1c0e   :  { %v2373_v61 = vmul.f32 %v2371_v7, %v5004_v36 }
0x1c10   :  { %3837 = vmatmul.mubr.msk.f32.vlgmr.msra.gmra.mrb[46].mxu0 %vm900_vm14, %v2373_v61 }
0x1c11   :  { %4172 = vmatpush3.bf16.msra.mxu0 %v5234_v15 }
0x1c12   :  { %4174 = vmatprep.subr.bf16.mxu0 %v5239_v8 }
0x1c15   :  { %4176 = vmatpush3.bf16.msra.mxu0 %v5239_v8 }
0x1c16   :  { %4178 = vmatprep.subr.bf16.mxu0 %v5275_v40 }
0x1c19   :  { %4180 = vmatpush3.bf16.msra.mxu0 %v5275_v40 }
0x1c1a   :  { %4182 = vmatprep.subr.bf16.mxu0 %v5290_v58 }
0x1c1d   :  { %4184 = vmatpush3.bf16.msra.mxu0 %v5290_v58 }
0x1c1e   :  { %4202 = vmatprep.subr.bf16.mxu0 %v5234_v15 }
0x1ce3   :  { %v3838_v12 = vpop.f32.mrb[46].mxu0 }
0x1ce4   :  { %v2454_v55 = vadd.f32 %v3838_v12, %v2075_v6  ;;  %v2448_v13 = vpop.f32.mrb[47].mxu0 }
0x1ce5   :  { %v2449_v34 = vadd.f32 %v2448_v13, %v2070_v45 }
0x1ce6   :  { %4315 = vtanh.f32 %v2454_v55 }
0x1ce7   :  { %4317 = vtanh.f32 %v2449_v34 }
0x1cf0   :  { %v4316_v5 = vpop.eup %4315 }
0x1cf1   :  { %v4318_v16 = vpop.eup %4317  ;;  %v2460_v44 = vmul.f32 %v4316_v5, %v4794_v42 }
0x1cf2   :  { %v2459_v18 = vmul.f32 %v4318_v16, %v4794_v42 }
0x1cf3   :  { %v2462_v21 = vadd.f32 %v2460_v44, %v4952_v22 }
0x1cf4   :  { %v2461_v27 = vadd.f32 %v2459_v18, %v4952_v22 }
0x1cf5   :  { %2469 = vrot.lane.b32.xlu1 %v2462_v21, %s4391_s7  ;;  %v2464_v37 = vmul.f32 %v2462_v21, %v2341_v62 }
0x1cf6   :  { %2467 = vrot.lane.b32.xlu0 %v2461_v27, %s4391_s7  ;;  %v2463_v31 = vmul.f32 %v2461_v27, %v2340_v17 }
0x1d67   :  { %v2470_v9 = vpop.permute.xlu1 %2469 }
0x1d68   :  { %v2474_v23 = vmul.f32 %v2470_v9, %v2462_v21  ;;  %v2468_v32 = vpop.permute.xlu0 %2467 }
0x1d69   :  { %v2473_v35 = vmul.f32 %v2468_v32, %v2461_v27 }
0x1d6a   :  { %2479 = vrot.lane.b32.xlu1 %v2474_v23, %s4385_s17 }
0x1d6b   :  { %2477 = vrot.lane.b32.xlu0 %v2473_v35, %s4385_s17 }
0x1ddc   :  { %v2480_v43 = vpop.permute.xlu1 %2479 }
0x1ddd   :  { %v2484_v48 = vadd.f32 %v2480_v43, %v2464_v37  ;;  %v2478_v57 = vpop.permute.xlu0 %2477 }
0x1dde   :  { %v2483_v14 = vadd.f32 %v2478_v57, %v2463_v31 }
0x1ddf   :  { %4319 = vtanh.f32 %v2484_v48 }
0x1de0   :  { %4321 = vtanh.f32 %v2483_v14 }
0x1de9   :  { %v4320_v38 = vpop.eup %4319 }
0x1dea   :  { %v4322_v52 = vpop.eup %4321  ;;  %2491 = vrot.lane.b32.xlu1 %v4320_v38, %s4391_s7 }
0x1deb   :  { %2489 = vrot.lane.b32.xlu0 %v4322_v52, %s4391_s7 }
0x1e5c   :  { %v2492_v47 = vpop.permute.xlu1 %2491 }
0x1e5d   :  { %v2490_v56 = vpop.permute.xlu0 %2489  ;;  %v2496_v59 = vmul.f32 %v2492_v47, %v2462_v21 }
0x1e5e   :  { %v2495_v28 = vmul.f32 %v2490_v56, %v2461_v27 }
0x1e60   :  { %2510 = vrot.lane.b32.xlu1 %v2495_v28, %s4391_s7  ;;  %2498 = vrot.lane.b32.xlu0 %v2495_v28, %s4385_s17  ;;  %v2071_v28 = vmul.f32 %v5348_v11, %v4975_v60 }
0x1e64   :  { %2507 = vrot.lane.b32.xlu1 %v2496_v59, %s4385_s17  ;;  %2503 = vrot.lane.b32.xlu0 %v2496_v59, %s4391_s7  ;;  %v2074_v59 = vmul.f32 %v5354_v20, %v4794_v42 }
0x1ed2   :  { %v2511_v62 = vpop.permute.xlu1 %2510  ;;  %v2499_v49 = vpop.permute.xlu0 %2498 }
0x1ed3   :  { %2501 = vst.msk [vmem:[#allocation3 + $0x10] sm:$0xff] %vm195_vm1, %v2499_v49  ;;  %v2513_v17 = vsel %vm195_vm1, %v2499_v49, %v2511_v62 }
0x1ed4   :  { %v2515_v63 = vmul.f32 %v2513_v17, %v4997_v19 }
0x1ed6   :  { %v2508_v0 = vpop.permute.xlu1 %2507  ;;  %3855 = vmatprep.mubr.msk.f32.mxu1 %vm900_vm14, %v2515_v63  ;;  %v2504_v25 = vpop.permute.xlu0 %2503 }
0x1ed7   :  { %2506 = vst.msk [vmem:[#allocation3 + $0x20] sm:$0xff] %vm1027_vm0, %v2504_v25  ;;  %v2514_v1 = vsel %vm195_vm1, %v2508_v0, %v2504_v25 }
0x1ed8   :  { %v2516_v53 = vmul.f32 %v2514_v1, %v5004_v36 }
0x1eda   :  { %3856 = vmatmul.mubr.msk.f32.vlgmr.msra.gmra.mrb[30].mxu1 %vm900_vm14, %v2516_v53 }
0x1edb   :  { %4188 = vmatpush3.bf16.msra.mxu1 %v5234_v15 }
0x1edc   :  { %4190 = vmatprep.subr.bf16.mxu1 %v5239_v8 }
0x1edf   :  { %4192 = vmatpush3.bf16.msra.mxu1 %v5239_v8 }
0x1ee0   :  { %4194 = vmatprep.subr.bf16.mxu1 %v5275_v40 }
0x1ee3   :  { %4196 = vmatpush3.bf16.msra.mxu1 %v5275_v40 }
0x1ee4   :  { %4198 = vmatprep.subr.bf16.mxu1 %v5290_v58 }
0x1ee7   :  { %4200 = vmatpush3.bf16.msra.mxu1 %v5290_v58 }
0x1ee8   :  { %4217 = vmatprep.subr.bf16.mxu1 %v4387_v29 }
0x1fad   :  { %v3857_v54 = vpop.f32.mrb[30].mxu1 }
0x1fae   :  { %v2597_v4 = vadd.f32 %v3857_v54, %v2073_v2  ;;  %v2591_v41 = vpop.f32.mrb[31].mxu1 }
0x1faf   :  { %v2592_v26 = vadd.f32 %v2591_v41, %v2072_v3 }
0x1fb0   :  { %4323 = vtanh.f32 %v2597_v4 }
0x1fb1   :  { %4325 = vtanh.f32 %v2592_v26 }
0x1fba   :  { %v4324_v51 = vpop.eup %4323 }
0x1fbb   :  { %v4326_v7 = vpop.eup %4325  ;;  %v2603_v61 = vmul.f32 %v4324_v51, %v4794_v42 }
0x1fbc   :  { %v2602_v6 = vmul.f32 %v4326_v7, %v4794_v42 }
0x1fbd   :  { %v2605_v12 = vadd.f32 %v2603_v61, %v4952_v22 }
0x1fbe   :  { %v2604_v45 = vadd.f32 %v2602_v6, %v4952_v22 }
0x1fbf   :  { %2612 = vrot.lane.b32.xlu1 %v2605_v12, %s4391_s7  ;;  %v2607_v34 = vmul.f32 %v2605_v12, %v2484_v48 }
0x1fc0   :  { %2610 = vrot.lane.b32.xlu0 %v2604_v45, %s4391_s7  ;;  %v2606_v16 = vmul.f32 %v2604_v45, %v2483_v14 }
0x2031   :  { %v2613_v30 = vpop.permute.xlu1 %2612 }
0x2032   :  { %v2617_v33 = vmul.f32 %v2613_v30, %v2605_v12  ;;  %v2611_v55 = vpop.permute.xlu0 %2610 }
0x2033   :  { %v2616_v13 = vmul.f32 %v2611_v55, %v2604_v45 }
0x2034   :  { %2622 = vrot.lane.b32.xlu1 %v2617_v33, %s4385_s17 }
0x2035   :  { %2620 = vrot.lane.b32.xlu0 %v2616_v13, %s4385_s17 }
0x20a6   :  { %v2623_v5 = vpop.permute.xlu1 %2622 }
0x20a7   :  { %v2627_v44 = vadd.f32 %v2623_v5, %v2607_v34  ;;  %v2621_v18 = vpop.permute.xlu0 %2620 }
0x20a8   :  { %v2626_v21 = vadd.f32 %v2621_v18, %v2606_v16 }
0x20a9   :  { %4327 = vtanh.f32 %v2627_v44 }
0x20aa   :  { %4329 = vtanh.f32 %v2626_v21 }
0x20b3   :  { %v4328_v27 = vpop.eup %4327 }
0x20b4   :  { %v4330_v9 = vpop.eup %4329  ;;  %2634 = vrot.lane.b32.xlu1 %v4328_v27, %s4391_s7 }
0x20b5   :  { %2632 = vrot.lane.b32.xlu0 %v4330_v9, %s4391_s7 }
0x2126   :  { %v2635_v35 = vpop.permute.xlu1 %2634 }
0x2127   :  { %v2633_v23 = vpop.permute.xlu0 %2632  ;;  %v2639_v37 = vmul.f32 %v2635_v35, %v2605_v12 }
0x2128   :  { %v2638_v32 = vmul.f32 %v2633_v23, %v2604_v45 }
0x212a   :  { %2653 = vrot.lane.b32.xlu1 %v2638_v32, %s4391_s7  ;;  %2641 = vrot.lane.b32.xlu0 %v2638_v32, %s4385_s17 }
0x212e   :  { %2650 = vrot.lane.b32.xlu1 %v2639_v37, %s4385_s17  ;;  %2646 = vrot.lane.b32.xlu0 %v2639_v37, %s4391_s7 }
0x219c   :  { %v2654_v43 = vpop.permute.xlu1 %2653  ;;  %v2642_v31 = vpop.permute.xlu0 %2641 }
0x219d   :  { %2644 = vst.msk [vmem:[#allocation3 + $0x18] sm:$0xff] %vm195_vm1, %v2642_v31  ;;  %v2656_v48 = vsel %vm195_vm1, %v2642_v31, %v2654_v43 }
0x219e   :  { %v2658_v57 = vmul.f32 %v2656_v48, %v4997_v19 }
0x21a0   :  { %v2651_v14 = vpop.permute.xlu1 %2650  ;;  %3874 = vmatprep.mubr.msk.f32.mxu0 %vm900_vm14, %v2658_v57  ;;  %v2647_v38 = vpop.permute.xlu0 %2646 }
0x21a1   :  { %2649 = vst.msk [vmem:[#allocation3 + $0x18] sm:$0xff] %vm1027_vm0, %v2647_v38  ;;  %v2657_v52 = vsel %vm195_vm1, %v2651_v14, %v2647_v38 }
0x21a2   :  { %v2659_v56 = vmul.f32 %v2657_v52, %v5004_v36 }
0x21a4   :  { %3875 = vmatmul.mubr.msk.f32.vlgmr.msra.gmra.mrb[48].mxu0 %vm900_vm14, %v2659_v56 }
0x21a5   :  { %4204 = vmatpush3.bf16.msra.mxu0 %v5234_v15 }
0x21a6   :  { %4206 = vmatprep.subr.bf16.mxu0 %v5239_v8 }
0x21a9   :  { %4208 = vmatpush3.bf16.msra.mxu0 %v5239_v8 }
0x21aa   :  { %4210 = vmatprep.subr.bf16.mxu0 %v5275_v40 }
0x21ad   :  { %4212 = vmatpush3.bf16.msra.mxu0 %v5275_v40 }
0x21ae   :  { %4214 = vmatprep.subr.bf16.mxu0 %v5290_v58 }
0x21b1   :  { %4216 = vmatpush3.bf16.msra.mxu0 %v5290_v58 }
0x2277   :  { %v3876_v47 = vpop.f32.mrb[48].mxu0 }
0x2278   :  { %v2740_v15 = vadd.f32 %v3876_v47, %v2071_v28  ;;  %v2734_v62 = vpop.f32.mrb[49].mxu0 }
0x2279   :  { %v2735_v49 = vadd.f32 %v2734_v62, %v2074_v59 }
0x227a   :  { %4331 = vtanh.f32 %v2740_v15 }
0x227b   :  { %4333 = vtanh.f32 %v2735_v49 }
0x2284   :  { %v4332_v8 = vpop.eup %4331 }
0x2285   :  { %v4334_v17 = vpop.eup %4333  ;;  %v2746_v40 = vmul.f32 %v4332_v8, %v4794_v42 }
0x2286   :  { %v2745_v63 = vmul.f32 %v4334_v17, %v4794_v42 }
0x2287   :  { %v2748_v58 = vadd.f32 %v2746_v40, %v4952_v22 }
0x2288   :  { %v2747_v0 = vadd.f32 %v2745_v63, %v4952_v22 }
0x2289   :  { %2755 = vrot.lane.b32.xlu1 %v2748_v58, %s4391_s7  ;;  %v2750_v53 = vmul.f32 %v2748_v58, %v2627_v44  ;;  %v2069_v44 = vmul.f32 %v5344_v24, %v4975_v60 }
0x228a   :  { %2753 = vrot.lane.b32.xlu0 %v2747_v0, %s4391_s7  ;;  %v2749_v54 = vmul.f32 %v2747_v0, %v2626_v21  ;;  %v2076_v21 = vmul.f32 %v5360_v39, %v4794_v42 }
0x22fb   :  { %v2756_v11 = vpop.permute.xlu1 %2755 }
0x22fc   :  { %v2760_v20 = vmul.f32 %v2756_v11, %v2748_v58  ;;  %v2754_v25 = vpop.permute.xlu0 %2753 }
0x22fd   :  { %v2759_v1 = vmul.f32 %v2754_v25, %v2747_v0 }
0x22fe   :  { %2765 = vrot.lane.b32.xlu1 %v2760_v20, %s4385_s17 }
0x22ff   :  { %2763 = vrot.lane.b32.xlu0 %v2759_v1, %s4385_s17 }
0x2370   :  { %v2766_v2 = vpop.permute.xlu1 %2765 }
0x2371   :  { %v2770_v3 = vadd.f32 %v2766_v2, %v2750_v53  ;;  %v2764_v4 = vpop.permute.xlu0 %2763  ;;  %v2067_v2 = vmul.f32 %v5339_v10, %v4975_v60 }
0x2372   :  { %v2769_v41 = vadd.f32 %v2764_v4, %v2749_v54 }
0x2373   :  { %4335 = vtanh.f32 %v2770_v3 }
0x2374   :  { %4337 = vtanh.f32 %v2769_v41 }
0x237d   :  { %v4336_v26 = vpop.eup %4335 }
0x237e   :  { %v4338_v51 = vpop.eup %4337  ;;  %2777 = vrot.lane.b32.xlu1 %v4336_v26, %s4391_s7 }
0x237f   :  { %2775 = vrot.lane.b32.xlu0 %v4338_v51, %s4391_s7 }
0x23f0   :  { %v2778_v6 = vpop.permute.xlu1 %2777 }
0x23f1   :  { %v2776_v7 = vpop.permute.xlu0 %2775  ;;  %v2782_v12 = vmul.f32 %v2778_v6, %v2748_v58 }
0x23f2   :  { %v2781_v61 = vmul.f32 %v2776_v7, %v2747_v0 }
0x23f4   :  { %2796 = vrot.lane.b32.xlu1 %v2781_v61, %s4391_s7  ;;  %2784 = vrot.lane.b32.xlu0 %v2781_v61, %s4385_s17 }
0x23f8   :  { %2793 = vrot.lane.b32.xlu1 %v2782_v12, %s4385_s17  ;;  %2789 = vrot.lane.b32.xlu0 %v2782_v12, %s4391_s7 }
0x2466   :  { %v2797_v45 = vpop.permute.xlu1 %2796  ;;  %v2785_v30 = vpop.permute.xlu0 %2784 }
0x2467   :  { %2787 = vst.msk [vmem:[#allocation3 + $0x20] sm:$0xff] %vm195_vm1, %v2785_v30  ;;  %v2799_v33 = vsel %vm195_vm1, %v2785_v30, %v2797_v45 }
0x2468   :  { %v2801_v55 = vmul.f32 %v2799_v33, %v4997_v19 }
0x246a   :  { %v2794_v13 = vpop.permute.xlu1 %2793  ;;  %3893 = vmatprep.mubr.msk.f32.mxu1 %vm900_vm14, %v2801_v55  ;;  %v2790_v34 = vpop.permute.xlu0 %2789 }
0x246b   :  { %2792 = vst.msk [vmem:[#allocation3 + $0x10] sm:$0xff] %vm1027_vm0, %v2790_v34  ;;  %v2800_v5 = vsel %vm195_vm1, %v2794_v13, %v2790_v34  ;;  %v3087_v34 = vld [vmem:[%s5667_s11 + $0x8] sm:$0xff] }
0x246c   :  { %v2802_v16 = vmul.f32 %v2800_v5, %v5004_v36  ;;  %v3088_v5 = vld [vmem:[%s5667_s11 + $0x10] sm:$0xff] }
0x246e   :  { %3894 = vmatmul.mubr.msk.f32.vlgmr.msra.gmra.mrb[32].mxu1 %vm900_vm14, %v2802_v16 }
0x246f   :  { %3931 = vmatprep.mubr.msk.f32.mxu1 %vm4388_vm3, %v4389_v50 }
0x2541   :  { %v3895_v18 = vpop.f32.mrb[32].mxu1 }
0x2542   :  { %v2883_v27 = vadd.f32 %v3895_v18, %v2069_v44  ;;  %v2877_v9 = vpop.f32.mrb[33].mxu1  ;;  %v3089_v44 = vld [vmem:[%s5667_s11 + $0x18] sm:$0xff] }
0x2543   :  { %v2878_v23 = vadd.f32 %v2877_v9, %v2076_v21  ;;  %v4221_v18 = vpack.c.bf16 %v3089_v44, %v3088_v5  ;;  %v3090_v9 = vld [vmem:[%s5667_s11 + $0x20] sm:$0xff] }
0x2544   :  { %4339 = vtanh.f32 %v2883_v27 }
0x2545   :  { %4341 = vtanh.f32 %v2878_v23  ;;  %v3091_v23 = vld [vmem:[%s5667_s11 + $0x28] sm:$0xff] }
0x254e   :  { %v4340_v32 = vpop.eup %4339 }
0x254f   :  { %v4342_v35 = vpop.eup %4341  ;;  %v2889_v37 = vmul.f32 %v4340_v32, %v4794_v42  ;;  %v4224_v32 = vpack.c.bf16 %v3091_v23, %v3090_v9 }
0x2550   :  { %v2888_v43 = vmul.f32 %v4342_v35, %v4794_v42  ;;  %v3092_v35 = vld [vmem:[%s5667_s11 + $0x30] sm:$0xff] }
0x2551   :  { %v2891_v31 = vadd.f32 %v2889_v37, %v4952_v22  ;;  %v3093_v37 = vld [vmem:[%s5667_s11 + $0x38] sm:$0xff] }
0x2552   :  { %v2890_v48 = vadd.f32 %v2888_v43, %v4952_v22  ;;  %v4227_v43 = vpack.c.bf16 %v3093_v37, %v3092_v35 }
0x2553   :  { %2898 = vrot.lane.b32.xlu1 %v2891_v31, %s4391_s7  ;;  %v2893_v38 = vmul.f32 %v2891_v31, %v2770_v3  ;;  %v2078_v3 = vmul.f32 %v5363_v46, %v4794_v42 }
0x2554   :  { %2896 = vrot.lane.b32.xlu0 %v2890_v48, %s4391_s7  ;;  %v2892_v56 = vmul.f32 %v2890_v48, %v2769_v41 }
0x25c5   :  { %v2899_v24 = vpop.permute.xlu1 %2898 }
0x25c6   :  { %v2903_v39 = vmul.f32 %v2899_v24, %v2891_v31  ;;  %v2897_v57 = vpop.permute.xlu0 %2896 }
0x25c7   :  { %v2902_v14 = vmul.f32 %v2897_v57, %v2890_v48 }
0x25c8   :  { %2908 = vrot.lane.b32.xlu1 %v2903_v39, %s4385_s17 }
0x25c9   :  { %2906 = vrot.lane.b32.xlu0 %v2902_v14, %s4385_s17 }
0x263a   :  { %v2909_v52 = vpop.permute.xlu1 %2908 }
0x263b   :  { %v2913_v28 = vadd.f32 %v2909_v52, %v2893_v38  ;;  %v2907_v47 = vpop.permute.xlu0 %2906  ;;  %v5604_v52 = vld [vmem:[#allocation3 + $0x10] sm:$0xff] }
0x263c   :  { %v2912_v59 = vadd.f32 %v2907_v47, %v2892_v56  ;;  %v5610_v56 = vld [vmem:[#allocation3 + $0x18] sm:$0xff] }
0x263d   :  { %4343 = vtanh.f32 %v2913_v28 }
0x263e   :  { %4345 = vtanh.f32 %v2912_v59 }
0x2647   :  { %v4344_v15 = vpop.eup %4343 }
0x2648   :  { %v4346_v62 = vpop.eup %4345  ;;  %2920 = vrot.lane.b32.xlu1 %v4344_v15, %s4391_s7  ;;  %v3381_v15 = vld [vmem:[%s5668_s12] ss:$0 sm:$0xff] }
0x2649   :  { %2918 = vrot.lane.b32.xlu0 %v4346_v62, %s4391_s7 }
0x26ba   :  { %v2921_v17 = vpop.permute.xlu1 %2920 }
0x26bb   :  { %v2919_v49 = vpop.permute.xlu0 %2918  ;;  %v2925_v40 = vmul.f32 %v2921_v17, %v2891_v31 }
0x26bc   :  { %v2924_v8 = vmul.f32 %v2919_v49, %v2890_v48 }
0x26be   :  { %2939 = vrot.lane.b32.xlu1 %v2924_v8, %s4391_s7  ;;  %2927 = vrot.lane.b32.xlu0 %v2924_v8, %s4385_s17 }
0x26c2   :  { %2936 = vrot.lane.b32.xlu1 %v2925_v40, %s4385_s17  ;;  %2932 = vrot.lane.b32.xlu0 %v2925_v40, %s4391_s7 }
0x2730   :  { %v2940_v63 = vpop.permute.xlu1 %2939  ;;  %v2928_v58 = vpop.permute.xlu0 %2927 }
0x2731   :  { %2930 = vst.msk [vmem:[#allocation3 + $0x28] sm:$0xff] %vm195_vm1, %v2928_v58  ;;  %v2942_v0 = vsel %vm195_vm1, %v2928_v58, %v2940_v63 }
0x2732   :  { %v2944_v11 = vmul.f32 %v2942_v0, %v4997_v19 }
0x2734   :  { %v2937_v20 = vpop.permute.xlu1 %2936  ;;  %3912 = vmatprep.mubr.msk.f32.mxu0 %vm900_vm14, %v2944_v11  ;;  %v2933_v25 = vpop.permute.xlu0 %2932  ;;  %v3389_v11 = vld [vmem:[%s5669_s13] ss:$0 sm:$0xff] }
0x2735   :  { %2935 = vst.msk [vmem:[#allocation3 + $0x8] sm:$0xff] %vm1027_vm0, %v2933_v25  ;;  %v2943_v1 = vsel %vm195_vm1, %v2937_v20, %v2933_v25 }
0x2736   :  { %v2945_v53 = vmul.f32 %v2943_v1, %v5004_v36 }
0x2738   :  { %3913 = vmatmul.mubr.msk.f32.vlgmr.msra.gmra.mrb[50].mxu0 %vm900_vm14, %v2945_v53  ;;  %v5622_v47 = vld [vmem:[#allocation3 + $0x28] sm:$0xff] }
0x280b   :  { %v3914_v54 = vpop.f32.mrb[50].mxu0 }
0x280c   :  { %v3026_v19 = vadd.f32 %v3914_v54, %v2067_v2  ;;  %v3020_v4 = vpop.f32.mrb[51].mxu0 }
0x280d   :  { %v3021_v41 = vadd.f32 %v3020_v4, %v2078_v3 }
0x280e   :  { %4347 = vtanh.f32 %v3026_v19 }
0x280f   :  { %4349 = vtanh.f32 %v3021_v41 }
0x2818   :  { %v4348_v26 = vpop.eup %4347 }
0x2819   :  { %v4350_v51 = vpop.eup %4349  ;;  %v3032_v7 = vmul.f32 %v4348_v26, %v4794_v42 }
0x281a   :  { %v3031_v36 = vmul.f32 %v4350_v51, %v4794_v42 }
0x281b   :  { %v3034_v61 = vadd.f32 %v3032_v7, %v4952_v22 }
0x281c   :  { %v3033_v6 = vadd.f32 %v3031_v36, %v4952_v22  ;;  %v3086_v22 = vld [vmem:[%s5667_s11] sm:$0xff] }
0x281d   :  { %3041 = vrot.lane.b32.xlu0 %v3034_v61, %s4391_s7  ;;  %v3036_v45 = vmul.f32 %v3034_v61, %v2913_v28  ;;  %v4218_v16 = vpack.c.bf16 %v3087_v34, %v3086_v22  ;;  %v5616_v28 = vld [vmem:[#allocation3 + $0x20] sm:$0xff] }
0x281e   :  { %3039 = vrot.lane.b32.xlu1 %v3033_v6, %s4391_s7  ;;  %v3035_v33 = vmul.f32 %v3033_v6, %v2912_v59 }
0x281f   :  { %4219 = vmatpush3.bf16.msra.mxu1 %v4218_v16 }
0x2820   :  { %4220 = vmatprep.subr.bf16.mxu1 %v4387_v29 }
0x2823   :  { %4222 = vmatpush3.bf16.msra.mxu1 %v4221_v18 }
0x2824   :  { %4223 = vmatprep.subr.bf16.mxu1 %v4387_v29 }
0x2827   :  { %4225 = vmatpush3.bf16.msra.mxu1 %v4224_v32 }
0x2828   :  { %4226 = vmatprep.subr.bf16.mxu1 %v4387_v29  ;;  %v5598_v29 = vld [vmem:[#allocation3 + $0x8] sm:$0xff] }
0x282b   :  { %4228 = vmatpush3.bf16.msra.mxu1 %v4227_v43 }
0x288f   :  { %v3042_v60 = vpop.permute.xlu0 %3041 }
0x2890   :  { %v3046_v10 = vmul.f32 %v3042_v60, %v3034_v61  ;;  %v3040_v46 = vpop.permute.xlu1 %3039 }
0x2891   :  { %v3045_v12 = vmul.f32 %v3040_v46, %v3033_v6 }
0x2892   :  { %3051 = vrot.lane.b32.xlu0 %v3046_v10, %s4385_s17 }
0x2893   :  { %3049 = vrot.lane.b32.xlu1 %v3045_v12, %s4385_s17 }
0x2904   :  { %v3052_v30 = vpop.permute.xlu0 %3051 }
0x2905   :  { %v3056_v42 = vadd.f32 %v3052_v30, %v3036_v45  ;;  %v3050_v55 = vpop.permute.xlu1 %3049 }
0x2906   :  { %v3055_v13 = vadd.f32 %v3050_v55, %v3035_v33 }
0x2907   :  { %4351 = vtanh.f32 %v3056_v42 }
0x2908   :  { %4353 = vtanh.f32 %v3055_v13 }
0x2911   :  { %v4352_v21 = vpop.eup %4351 }
0x2912   :  { %v4354_v27 = vpop.eup %4353  ;;  %3063 = vrot.lane.b32.xlu0 %v4352_v21, %s4391_s7 }
0x2913   :  { %3061 = vrot.lane.b32.xlu1 %v4354_v27, %s4391_s7 }
0x2984   :  { %v3064_v31 = vpop.permute.xlu0 %3063 }
0x2985   :  { %v3068_v48 = vmul.f32 %v3064_v31, %v3034_v61  ;;  %v3062_v24 = vpop.permute.xlu1 %3061 }
0x2986   :  { %v3067_v39 = vmul.f32 %v3062_v24, %v3033_v6 }
0x2987   :  { %3075 = vrot.lane.b32.xlu0 %v3068_v48, %s4391_s7 }
0x2988   :  { %3070 = vrot.lane.b32.xlu1 %v3067_v39, %s4385_s17 }
0x29f9   :  { %v3076_v57 = vpop.permute.xlu0 %3075 }
0x29fa   :  { %3078 = vst.msk [vmem:[#allocation3] sm:$0xff] %vm1027_vm0, %v3076_v57  ;;  %v3071_v14 = vpop.permute.xlu1 %3070 }
0x29fb   :  { %3073 = vst.msk [vmem:[#allocation3 + $0x30] sm:$0xff] %vm195_vm1, %v3071_v14  ;;  %vm3243_vm1 = vcmask 195584  }
0x2a01   :  { %v5592_v38 = vld [vmem:[#allocation3] sm:$0xff] }
0x2a02   :  { %3932 = vmatmul.mubr.msk.f32.vlgmr.msra.gmra.mrb[34].mxu1 %vm900_vm14, %v5592_v38  ;;  %v5628_v59 = vld [vmem:[#allocation3 + $0x30] sm:$0xff] }
0x2a03   :  { %3934 = vmatprep.mubr.msk.f32.mxu1 %vm4388_vm3, %v4389_v50 }
0x2a06   :  { %3935 = vmatmul.mubr.msk.f32.gmra.mrb[36].mxu1 %vm900_vm14, %v5598_v29 }
0x2a07   :  { %3937 = vmatprep.mubr.msk.f32.mxu1 %vm4388_vm3, %v4389_v50 }
0x2a0a   :  { %3938 = vmatmul.mubr.msk.f32.gmra.mrb[38].mxu1 %vm900_vm14, %v5604_v52 }
0x2a0b   :  { %3940 = vmatprep.mubr.msk.f32.mxu1 %vm4388_vm3, %v4389_v50 }
0x2a0e   :  { %3941 = vmatmul.mubr.msk.f32.gmra.mrb[40].mxu1 %vm900_vm14, %v5610_v56 }
0x2a0f   :  { %3943 = vmatprep.mubr.msk.f32.mxu1 %vm4388_vm3, %v4389_v50 }
0x2a12   :  { %3944 = vmatmul.mubr.msk.f32.gmra.mrb[42].mxu1 %vm900_vm14, %v5616_v28 }
0x2a13   :  { %3946 = vmatprep.mubr.msk.f32.mxu1 %vm4388_vm3, %v4389_v50 }
0x2a16   :  { %3947 = vmatmul.mubr.msk.f32.gmra.mrb[44].mxu1 %vm900_vm14, %v5622_v47 }
0x2a17   :  { %3949 = vmatprep.mubr.msk.f32.mxu1 %vm4388_vm3, %v4389_v50 }
0x2a1a   :  { %3950 = vmatmul.mubr.msk.f32.gmra.mrb[46].mxu1 %vm900_vm14, %v5628_v59 }
0x2ad5   :  { %v3188_v62 = vpop.f32.mrb[34].mxu1 }
0x2ad6   :  { %v3189_v49 = vadd.f32 %v3381_v15, %v3188_v62  ;;  %v3933_v8 = vpop.f32.mrb[35].mxu1 }
0x2ad8   :  { %4355 = vtanh.f32 %v3189_v49 }
0x2ad9   :  { %v3193_v17 = vpop.f32.mrb[36].mxu1 }
0x2ada   :  { %v3194_v40 = vadd.f32 %v3381_v15, %v3193_v17  ;;  %v3936_v63 = vpop.f32.mrb[37].mxu1 }
0x2adc   :  { %4357 = vtanh.f32 %v3194_v40 }
0x2add   :  { %v3198_v58 = vpop.f32.mrb[38].mxu1 }
0x2ade   :  { %v3199_v0 = vadd.f32 %v3381_v15, %v3198_v58  ;;  %v3939_v50 = vpop.f32.mrb[39].mxu1 }
0x2ae0   :  { %4359 = vtanh.f32 %v3199_v0 }
0x2ae1   :  { %v3203_v20 = vpop.f32.mrb[40].mxu1 }
0x2ae2   :  { %v4356_v25 = vpop.eup %4355  ;;  %v3204_v1 = vadd.f32 %v3381_v15, %v3203_v20  ;;  %v3942_v53 = vpop.f32.mrb[41].mxu1 }
0x2ae3   :  { %v3236_v2 = vmul.f32 %v4356_v25, %v3389_v11 }
0x2ae4   :  { %4361 = vtanh.f32 %v3204_v1 }
0x2ae5   :  { %v3208_v54 = vpop.f32.mrb[42].mxu1  ;;  %v3244_v3 = vsel %vm3243_vm1, %v3236_v2, 0.0 }
0x2ae6   :  { %v4358_v19 = vpop.eup %4357  ;;  %v3209_v4 = vadd.f32 %v3381_v15, %v3208_v54  ;;  %3245 = vadd.xlane.f32.xlu0 %v3244_v3  ;;  %v3945_v41 = vpop.f32.mrb[43].mxu1 }
0x2ae7   :  { %v3237_v26 = vmul.f32 %v4358_v19, %v3389_v11 }
0x2ae8   :  { %4363 = vtanh.f32 %v3209_v4 }
0x2ae9   :  { %v3213_v51 = vpop.f32.mrb[44].mxu1  ;;  %v3247_v7 = vsel %vm3243_vm1, %v3237_v26, 0.0 }
0x2aea   :  { %v4360_v36 = vpop.eup %4359  ;;  %v3214_v61 = vadd.f32 %v3381_v15, %v3213_v51  ;;  %v3948_v6 = vpop.f32.mrb[45].mxu1  ;;  %3248 = vadd.xlane.f32.xlu1 %v3247_v7 }
0x2aeb   :  { %v3238_v60 = vmul.f32 %v4360_v36, %v3389_v11 }
0x2aec   :  { %4365 = vtanh.f32 %v3214_v61 }
0x2aed   :  { %v3218_v10 = vpop.f32.mrb[46].mxu1  ;;  %v3250_v46 = vsel %vm3243_vm1, %v3238_v60, 0.0 }
0x2aee   :  { %v4362_v12 = vpop.eup %4361  ;;  %v3219_v45 = vadd.f32 %v3381_v15, %v3218_v10  ;;  %3251 = vadd.xlane.f32.xlu0 %v3250_v46  ;;  %v3951_v30 = vpop.f32.mrb[47].mxu1 }
0x2aef   :  { %v3239_v33 = vmul.f32 %v4362_v12, %v3389_v11 }
0x2af0   :  { %4367 = vtanh.f32 %v3219_v45 }
0x2af1   :  { %v3253_v42 = vsel %vm3243_vm1, %v3239_v33, 0.0 }
0x2af2   :  { %v4364_v55 = vpop.eup %4363  ;;  %3254 = vadd.xlane.f32.xlu0 %v3253_v42 }
0x2af3   :  { %v3240_v13 = vmul.f32 %v4364_v55, %v3389_v11 }
0x2af5   :  { %v3256_v22 = vsel %vm3243_vm1, %v3240_v13, 0.0 }
0x2af6   :  { %v4366_v34 = vpop.eup %4365  ;;  %3257 = vadd.xlane.f32.xlu1 %v3256_v22 }
0x2af7   :  { %v3241_v5 = vmul.f32 %v4366_v34, %v3389_v11 }
0x2af9   :  { %v3259_v16 = vsel %vm3243_vm1, %v3241_v5, 0.0 }
0x2afa   :  { %v4368_v44 = vpop.eup %4367  ;;  %3260 = vadd.xlane.f32.xlu0 %v3259_v16 }
0x2afb   :  { %v3242_v18 = vmul.f32 %v4368_v44, %v3389_v11 }
0x2afd   :  { %v3262_v21 = vsel %vm3243_vm1, %v3242_v18, 0.0 }
0x2afe   :  { %3263 = vadd.xlane.f32.xlu1 %v3262_v21 }
0x2b73   :  { %v3246_v27 = vpop.xlane.xlu0 %3245 }
0x2b77   :  { %v3249_v23 = vpop.xlane.xlu1 %3248 }
0x2b78   :  { %v3265_v32 = vmax.f32 %v3246_v27, %v3249_v23 }
0x2b7b   :  { %v3252_v9 = vpop.xlane.xlu0 %3251 }
0x2b7c   :  { %v3266_v37 = vmax.f32 %v3265_v32, %v3252_v9 }
0x2b7f   :  { %v3255_v35 = vpop.xlane.xlu0 %3254 }
0x2b80   :  { %v3267_v31 = vmax.f32 %v3266_v37, %v3255_v35 }
0x2b83   :  { %v3258_v43 = vpop.xlane.xlu1 %3257 }
0x2b84   :  { %v3268_v24 = vmax.f32 %v3267_v31, %v3258_v43 }
0x2b87   :  { %v3261_v48 = vpop.xlane.xlu0 %3260 }
0x2b88   :  { %v3269_v39 = vmax.f32 %v3268_v24, %v3261_v48 }
0x2b8b   :  { %v3264_v57 = vpop.xlane.xlu1 %3263 }
0x2b8c   :  { %v3270_v14 = vmax.f32 %v3269_v39, %v3264_v57 }
0x2b8e   :  { %v3271_v15 = vsub.f32 %v3246_v27, %v3270_v14  ;;  %v3274_v62 = vsub.f32 %v3249_v23, %v3270_v14  ;;  %v3277_v49 = vsub.f32 %v3252_v9, %v3270_v14  ;;  %v3280_v8 = vsub.f32 %v3255_v35, %v3270_v14 }
0x2b8f   :  { %v3283_v58 = vsub.f32 %v3258_v43, %v3270_v14  ;;  %v3286_v50 = vsub.f32 %v3261_v48, %v3270_v14  ;;  %v3289_v20 = vsub.f32 %v3264_v57, %v3270_v14 }
0x2b90   :  { %v3272_v17 = vmul.f32 1.442695, %v3271_v15  ;;  %v3275_v40 = vmul.f32 1.442695, %v3274_v62  ;;  %v3278_v63 = vmul.f32 1.442695, %v3277_v49 }
0x2b91   :  { %v3281_v0 = vmul.f32 1.442695, %v3280_v8  ;;  %v3284_v11 = vmul.f32 1.442695, %v3283_v58  ;;  %v3287_v25 = vmul.f32 1.442695, %v3286_v50 }
0x2b92   :  { %4369 = vpow2.f32 %v3272_v17  ;;  %v3290_v1 = vmul.f32 1.442695, %v3289_v20 }
0x2b93   :  { %4371 = vpow2.f32 %v3275_v40 }
0x2b94   :  { %4373 = vpow2.f32 %v3278_v63 }
0x2b95   :  { %4375 = vpow2.f32 %v3281_v0 }
0x2b96   :  { %4377 = vpow2.f32 %v3284_v11 }
0x2b97   :  { %4379 = vpow2.f32 %v3287_v25 }
0x2b98   :  { %4381 = vpow2.f32 %v3290_v1 }
0x2b9c   :  { %v4370_v53 = vpop.eup %4369 }
0x2b9d   :  { %v4372_v2 = vpop.eup %4371  ;;  %v3298_v54 = vmul.f32 %v4370_v53, %v5592_v38 }
0x2b9e   :  { %v4374_v3 = vpop.eup %4373  ;;  %v3292_v19 = vadd.f32 %v4372_v2, %v4370_v53  ;;  %v3299_v4 = vmul.f32 %v4372_v2, %v5598_v29 }
0x2b9f   :  { %v4376_v51 = vpop.eup %4375  ;;  %v3301_v7 = vmul.f32 %v4374_v3, %v5604_v52 }
0x2ba0   :  { %v3293_v41 = vadd.f32 %v4374_v3, %v3292_v19  ;;  %v3300_v26 = vadd.f32 %v3299_v4, %v3298_v54  ;;  %v4378_v61 = vpop.eup %4377  ;;  %v3303_v46 = vmul.f32 %v4376_v51, %v5610_v56 }
0x2ba1   :  { %v4380_v10 = vpop.eup %4379  ;;  %v3305_v33 = vmul.f32 %v4378_v61, %v5616_v28 }
0x2ba2   :  { %v3294_v36 = vadd.f32 %v4376_v51, %v3293_v41  ;;  %v3302_v6 = vadd.f32 %v3301_v7, %v3300_v26  ;;  %v4382_v45 = vpop.eup %4381  ;;  %v3307_v42 = vmul.f32 %v4380_v10, %v5622_v47 }
0x2ba3   :  { %v3309_v52 = vmul.f32 %v4382_v45, %v5628_v59 }
0x2ba4   :  { %v3295_v60 = vadd.f32 %v4378_v61, %v3294_v36  ;;  %v3304_v30 = vadd.f32 %v3303_v46, %v3302_v6 }
0x2ba6   :  { %v3296_v12 = vadd.f32 %v4380_v10, %v3295_v60  ;;  %v3306_v29 = vadd.f32 %v3305_v33, %v3304_v30 }
0x2ba8   :  { %v3297_v38 = vadd.f32 %v4382_v45, %v3296_v12  ;;  %v3308_v55 = vadd.f32 %v3307_v42, %v3306_v29 }
0x2baa   :  { %4383 = vrcp.f32 %v3297_v38  ;;  %v3310_v13 = vadd.f32 %v3309_v52, %v3308_v55 }
0x2bb4   :  { %v4384_v22 = vpop.eup %4383 }
0x2bb5   :  { %v3312_v34 = vmul.f32 %v4384_v22, %v3310_v13 }
0x2bb7   :  { %3313 = vst.msk [vmem:[%s5670_s14] sm:$0xff] %vm900_vm14, %v3312_v34 }

</bundles_post_ra>
